<compile_context>
chip_gen: v7x
topology: tpu7x:2x2x1
jax: 0.10.0
libtpu: 0.0.40
codegen_flags: <defaults>
</compile_context>

<pallas_src>
import functools
import math

import jax
import jax.numpy as jnp
from jax.experimental import pallas as pl
from jax.experimental.pallas import tpu as pltpu

# ---- scaled-down Bert config (original: 768 hidden / 12 layers / 12 heads) ----
VOCAB = 128
HIDDEN = 32
LAYERS = 2
HEADS = 4
HEAD_DIM = HIDDEN // HEADS
INTER = 64
MAX_POS = 32
TYPE_VOCAB = 2
LN_EPS = 1e-12
BATCH = 2
SEQ = 8
MASK_NEG = -1e9  # additive mask constant; a fully-masked row degrades to uniform
                 # attention (documented deviation from finfo.min implementations)


# ----------------------------- fused encoder kernel -----------------------------
def _encoder_kernel(ids_ref, tt_ref, mask_ref,
                    wemb_ref, pemb_ref, temb_ref, eg_ref, eb_ref,
                    qw_ref, qb_ref, kw_ref, kb_ref, vw_ref, vb_ref,
                    aow_ref, aob_ref, g1_ref, b1_ref,
                    iw_ref, ib_ref, ow_ref, ob_ref, g2_ref, b2_ref,
                    pw_ref, pb_ref, o_ref,
                    *, batch, seq, heads, ln_eps):
    B, S = batch, seq
    BS = B * S
    H = wemb_ref.shape[-1]
    V = wemb_ref.shape[0]
    L = qw_ref.shape[0]
    D = H // heads
    scale = 1.0 / math.sqrt(D)
    f32 = jnp.float32

    def layer_norm(x, g, b):
        mu = jnp.mean(x, axis=-1, keepdims=True)
        d = x - mu
        var = jnp.mean(d * d, axis=-1, keepdims=True)
        return d * jax.lax.rsqrt(var + ln_eps) * g + b

    # ---- embeddings, gathered in-kernel ----
    # word: one-hot (BS, VOCAB=128) @ (VOCAB, H) -- lane-dense MXU matmul
    ids = ids_ref[...]                                                   # (BS,1) i32
    one_hot = (ids == jax.lax.broadcasted_iota(jnp.int32, (BS, V), 1)).astype(f32)
    word_e = jnp.dot(one_hot, wemb_ref[...], preferred_element_type=f32)  # (BS,H)
    # token type: TYPE_VOCAB == 2, so a single select suffices
    tt = tt_ref[...]                                                     # (BS,1) i32
    type_e = jnp.where(tt == 0, temb_ref[0:1, :], temb_ref[1:2, :])      # (BS,H)
    # positions 0..S-1, broadcast over the batch inside the add
    emb3 = (word_e + type_e).reshape(B, S, H) + pemb_ref[0:S, :][None, :, :]
    h = layer_norm(emb3.reshape(BS, H), eg_ref[...], eb_ref[...])        # (BS,H)

    # additive attention bias, broadcast in-kernel: 1 -> 0, 0 -> -1e9
    bias = ((1.0 - mask_ref[...]) * MASK_NEG)[:, None, :]                # (B,1,S)

    for l in range(L):                                                   # unrolled (L=2)
        # ---- attention: head-major weights, batched-over-B einsums, no concats ----
        attn = jnp.zeros((BS, H), f32)
        for hd in range(heads):
            q = (jnp.dot(h, qw_ref[l, hd], preferred_element_type=f32)
                 + qb_ref[l, hd]).reshape(B, S, D)
            k = (jnp.dot(h, kw_ref[l, hd], preferred_element_type=f32)
                 + kb_ref[l, hd]).reshape(B, S, D)
            v = (jnp.dot(h, vw_ref[l, hd], preferred_element_type=f32)
                 + vb_ref[l, hd]).reshape(B, S, D)
            s = jnp.einsum('bqd,bkd->bqk', q, k,
                           preferred_element_type=f32) * scale + bias    # (B,S,S)
            s = s - jnp.max(s, axis=-1, keepdims=True)
            p = jnp.exp(s)
            p = p * pl.reciprocal(jnp.sum(p, axis=-1, keepdims=True), approx=True)
            ctx = jnp.einsum('bqk,bkd->bqd', p, v,
                             preferred_element_type=f32)                 # (B,S,D)
            # per-head output projection accumulates straight into (BS,H)
            attn = attn + jnp.dot(ctx.reshape(BS, D), aow_ref[l, hd],
                                  preferred_element_type=f32)

        # ---- attention output bias + residual + LayerNorm (fused) ----
        h = layer_norm(attn + aob_ref[l] + h, g1_ref[l], b1_ref[l])

        # ---- FFN: both matmuls fused, intermediate stays in VMEM ----
        inter = (jnp.dot(h, iw_ref[l], preferred_element_type=f32) + ib_ref[l])
        # TODO(synk): HF 'gelu' is the exact erf-GELU; tanh approximation used
        #             because erf has no guaranteed Mosaic lowering.
        inter = jax.nn.gelu(inter, approximate=True)
        ffn = (jnp.dot(inter, ow_ref[l], preferred_element_type=f32) + ob_ref[l])
        h = layer_norm(ffn + h, g2_ref[l], b2_ref[l])
        # (dropout layers are no-ops in eval mode)

    # ---- pooler: tanh(W @ h[CLS]) on the first token of each sequence ----
    cls = h.reshape(B, S, H)[:, 0, :]                                    # (B,H)
    pooled = jnp.tanh(jnp.dot(cls, pw_ref[...], preferred_element_type=f32)
                      + pb_ref[...])
    o_ref[...] = pooled.astype(o_ref.dtype)


# ----------------------------- parameters -----------------------------
def init_params(key):
    keys = iter(jax.random.split(key, 64))

    def w(shape):
        return jax.random.normal(next(keys), shape, jnp.float32) * 0.02

    # Head-major kernel layout.  To load HF BertModel weights:
    #   q_w[l, n]  = layer.attention.self.query.weight.T[:, n*D:(n+1)*D]   (H, D)
    #   ao_w[l, n] = layer.attention.output.dense.weight.T[n*D:(n+1)*D, :] (D, H)
    return {
        "word_emb": w((VOCAB, HIDDEN)),
        "pos_emb": w((MAX_POS, HIDDEN)),
        "type_emb": w((TYPE_VOCAB, HIDDEN)),
        "emb_ln_g": jnp.ones((1, HIDDEN), jnp.float32),
        "emb_ln_b": jnp.zeros((1, HIDDEN), jnp.float32),
        "q_w": w((LAYERS, HEADS, HIDDEN, HEAD_DIM)),
        "q_b": jnp.zeros((LAYERS, HEADS, 1, HEAD_DIM), jnp.float32),
        "k_w": w((LAYERS, HEADS, HIDDEN, HEAD_DIM)),
        "k_b": jnp.zeros((LAYERS, HEADS, 1, HEAD_DIM), jnp.float32),
        "v_w": w((LAYERS, HEADS, HIDDEN, HEAD_DIM)),
        "v_b": jnp.zeros((LAYERS, HEADS, 1, HEAD_DIM), jnp.float32),
        "ao_w": w((LAYERS, HEADS, HEAD_DIM, HIDDEN)),
        "ao_b": jnp.zeros((LAYERS, 1, HIDDEN), jnp.float32),
        "ln1_g": jnp.ones((LAYERS, 1, HIDDEN), jnp.float32),
        "ln1_b": jnp.zeros((LAYERS, 1, HIDDEN), jnp.float32),
        "inter_w": w((LAYERS, HIDDEN, INTER)),
        "inter_b": jnp.zeros((LAYERS, 1, INTER), jnp.float32),
        "out_w": w((LAYERS, INTER, HIDDEN)),
        "out_b": jnp.zeros((LAYERS, 1, HIDDEN), jnp.float32),
        "ln2_g": jnp.ones((LAYERS, 1, HIDDEN), jnp.float32),
        "ln2_b": jnp.zeros((LAYERS, 1, HIDDEN), jnp.float32),
        "pooler_w": w((HIDDEN, HIDDEN)),
        "pooler_b": jnp.zeros((1, HIDDEN), jnp.float32),
    }


# ----------------------------- forward pass -----------------------------
def bert_pooler_output(params, input_ids, attention_mask, token_type_ids):
    B, S = input_ids.shape

    # Everything (embedding lookup included) runs inside ONE pallas_call.
    # ids / type-ids are passed as flat int32 columns so no in-kernel relayout
    # is needed; attention_mask must be 0/1-valued, token_type_ids < TYPE_VOCAB.
    ids = input_ids.astype(jnp.int32).reshape(B * S, 1)
    tt = token_type_ids.astype(jnp.int32).reshape(B * S, 1)
    mask = attention_mask.astype(jnp.float32)                            # (B,S)

    operands = (ids, tt, mask,
                params["word_emb"], params["pos_emb"], params["type_emb"],
                params["emb_ln_g"], params["emb_ln_b"],
                params["q_w"], params["q_b"],
                params["k_w"], params["k_b"],
                params["v_w"], params["v_b"],
                params["ao_w"], params["ao_b"],
                params["ln1_g"], params["ln1_b"],
                params["inter_w"], params["inter_b"],
                params["out_w"], params["out_b"],
                params["ln2_g"], params["ln2_b"],
                params["pooler_w"], params["pooler_b"])

    vmem = pltpu.MemorySpace.VMEM
    # Single invocation (no grid): all ~50 KB of weights + activations sit in
    # VMEM once, with no double-buffering / pipeline bookkeeping.
    # TODO(synk): for v7x with larger batches, add a parallel grid=(B,) batch
    #             axis (2nd TensorCore) and stream per-layer weights at real
    #             BERT size instead of keeping all layers VMEM-resident.
    return pl.pallas_call(
        functools.partial(_encoder_kernel, batch=B, seq=S,
                          heads=HEADS, ln_eps=LN_EPS),
        in_specs=[pl.BlockSpec(memory_space=vmem) for _ in operands],
        out_specs=pl.BlockSpec(memory_space=vmem),
        out_shape=jax.ShapeDtypeStruct((B, HIDDEN), jnp.float32),
    )(*operands)


@jax.jit
def encoder_forward(params, x_CC_token_input_ids, x_CC_token_attention_mask,
                    x_CC_token_token_type_ids):
    # Faithful to model_maac.encoder.forward: the original code builds
    # {'input_ids': ids, 'token_type_ids': attention_mask,
    #  'attention_mask': token_type_ids}, i.e. it SWAPS the last two args.
    return bert_pooler_output(
        params,
        input_ids=x_CC_token_input_ids,
        attention_mask=x_CC_token_token_type_ids,   # swapped, as in the module
        token_type_ids=x_CC_token_attention_mask,   # swapped, as in the module
    )


# ----------------------------- demo -----------------------------
if __name__ == "__main__":
    key = jax.random.PRNGKey(0)
    k_param, k_ids = jax.random.split(key)
    params = init_params(k_param)

    input_ids = jax.random.randint(k_ids, (BATCH, SEQ), 0, VOCAB, dtype=jnp.int32)
    attention_mask = jnp.ones((BATCH, SEQ), jnp.int32)
    token_type_ids = jnp.ones((BATCH, SEQ), jnp.int32)

    # Because of the module's argument swap, the tensor used as the attention
    # mask must be 0/1 and the tensor used as token-type ids must be < 2.
    assert bool(jnp.all((token_type_ids == 0) | (token_type_ids == 1)))
    assert bool(jnp.all((attention_mask >= 0) & (attention_mask < TYPE_VOCAB)))

    pooled = encoder_forward(params, input_ids, attention_mask, token_type_ids)
    pooled = jax.block_until_ready(pooled)
    assert pooled.shape == (BATCH, HIDDEN) and pooled.dtype == jnp.float32
    assert bool(jnp.all(jnp.isfinite(pooled)))
    print("KERNEL_OK")
</pallas_src>

<mosaic_0001>
module attributes {stable_mosaic.version = 11 : i64} {
  func.func @_encoder_kernel(%arg0: memref<16x1xi32, #tpu.memory_space<vmem>>, %arg1: memref<16x1xi32, #tpu.memory_space<vmem>>, %arg2: memref<2x8xf32, #tpu.memory_space<vmem>>, %arg3: memref<128x32xf32, #tpu.memory_space<vmem>>, %arg4: memref<32x32xf32, #tpu.memory_space<vmem>>, %arg5: memref<2x32xf32, #tpu.memory_space<vmem>>, %arg6: memref<1x32xf32, #tpu.memory_space<vmem>>, %arg7: memref<1x32xf32, #tpu.memory_space<vmem>>, %arg8: memref<2x4x32x8xf32, #tpu.memory_space<vmem>>, %arg9: memref<2x4x1x8xf32, #tpu.memory_space<vmem>>, %arg10: memref<2x4x32x8xf32, #tpu.memory_space<vmem>>, %arg11: memref<2x4x1x8xf32, #tpu.memory_space<vmem>>, %arg12: memref<2x4x32x8xf32, #tpu.memory_space<vmem>>, %arg13: memref<2x4x1x8xf32, #tpu.memory_space<vmem>>, %arg14: memref<2x4x8x32xf32, #tpu.memory_space<vmem>>, %arg15: memref<2x1x32xf32, #tpu.memory_space<vmem>>, %arg16: memref<2x1x32xf32, #tpu.memory_space<vmem>>, %arg17: memref<2x1x32xf32, #tpu.memory_space<vmem>>, %arg18: memref<2x32x64xf32, #tpu.memory_space<vmem>>, %arg19: memref<2x1x64xf32, #tpu.memory_space<vmem>>, %arg20: memref<2x64x32xf32, #tpu.memory_space<vmem>>, %arg21: memref<2x1x32xf32, #tpu.memory_space<vmem>>, %arg22: memref<2x1x32xf32, #tpu.memory_space<vmem>>, %arg23: memref<2x1x32xf32, #tpu.memory_space<vmem>>, %arg24: memref<32x32xf32, #tpu.memory_space<vmem>>, %arg25: memref<1x32xf32, #tpu.memory_space<vmem>>, %arg26: memref<2x32xf32, #tpu.memory_space<vmem>>) attributes {dimension_semantics = [], scalar_prefetch = 0 : i64, scratch_operands = 0 : i64, tpu.core_type = #tpu.core_type<tc>} {
    %c0 = arith.constant 0 : index
    %c0_0 = arith.constant 0 : index
    %0 = vector.load %arg0[%c0, %c0_0] : memref<16x1xi32, #tpu.memory_space<vmem>>, vector<16x1xi32>
    %1 = tpu.iota {dimensions = array<i32: 1>} : vector<16x128xi32>
    %2 = vector.broadcast %0 : vector<16x1xi32> to vector<16x128xi32>
    %3 = arith.cmpi eq, %2, %1 : vector<16x128xi32>
    %4 = arith.extui %3 : vector<16x128xi1> to vector<16x128xi32>
    %5 = arith.sitofp %4 : vector<16x128xi32> to vector<16x128xf32>
    %c0_1 = arith.constant 0 : index
    %c0_2 = arith.constant 0 : index
    %6 = vector.load %arg3[%c0_1, %c0_2] : memref<128x32xf32, #tpu.memory_space<vmem>>, vector<128x32xf32>
    %cst = arith.constant dense<0.000000e+00> : vector<16x32xf32>
    %7 = tpu.matmul %5, %6, %cst {dimension_numbers = #tpu.dot_dimension_numbers<[1], [0], [0], [1], [0, 0, 1, 1], [], []>} : vector<16x128xf32>, vector<128x32xf32>, vector<16x32xf32> -> vector<16x32xf32>
    %c0_3 = arith.constant 0 : index
    %c0_4 = arith.constant 0 : index
    %8 = vector.load %arg1[%c0_3, %c0_4] : memref<16x1xi32, #tpu.memory_space<vmem>>, vector<16x1xi32>
    %c0_i32 = arith.constant 0 : i32
    %9 = vector.broadcast %c0_i32 : i32 to vector<16x1xi32>
    %10 = arith.cmpi eq, %8, %9 : vector<16x1xi32>
    %c0_5 = arith.constant 0 : index
    %c0_6 = arith.constant 0 : index
    %11 = vector.load %arg5[%c0_5, %c0_6] : memref<2x32xf32, #tpu.memory_space<vmem>>, vector<1x32xf32>
    %c1 = arith.constant 1 : index
    %c0_7 = arith.constant 0 : index
    %12 = vector.load %arg5[%c1, %c0_7] : memref<2x32xf32, #tpu.memory_space<vmem>>, vector<1x32xf32>
    %13 = vector.shape_cast %10 : vector<16x1xi1> to vector<16x1xi1>
    %14 = vector.broadcast %13 : vector<16x1xi1> to vector<16x32xi1>
    %15 = vector.shape_cast %11 : vector<1x32xf32> to vector<1x32xf32>
    %16 = vector.broadcast %15 : vector<1x32xf32> to vector<16x32xf32>
    %17 = vector.shape_cast %12 : vector<1x32xf32> to vector<1x32xf32>
    %18 = vector.broadcast %17 : vector<1x32xf32> to vector<16x32xf32>
    %19 = arith.select %14, %16, %18 : vector<16x32xi1>, vector<16x32xf32>
    %20 = arith.addf %7, %19 : vector<16x32xf32>
    %21 = vector.shape_cast %20 : vector<16x32xf32> to vector<2x8x32xf32>
    %c0_8 = arith.constant 0 : index
    %c0_9 = arith.constant 0 : index
    %22 = vector.load %arg4[%c0_8, %c0_9] : memref<32x32xf32, #tpu.memory_space<vmem>>, vector<8x32xf32>
    %23 = vector.shape_cast %22 : vector<8x32xf32> to vector<1x8x32xf32>
    %24 = vector.broadcast %23 : vector<1x8x32xf32> to vector<2x8x32xf32>
    %25 = arith.addf %21, %24 : vector<2x8x32xf32>
    %26 = vector.shape_cast %25 : vector<2x8x32xf32> to vector<16x32xf32>
    %c0_10 = arith.constant 0 : index
    %c0_11 = arith.constant 0 : index
    %27 = vector.load %arg6[%c0_10, %c0_11] : memref<1x32xf32, #tpu.memory_space<vmem>>, vector<1x32xf32>
    %c0_12 = arith.constant 0 : index
    %c0_13 = arith.constant 0 : index
    %28 = vector.load %arg7[%c0_12, %c0_13] : memref<1x32xf32, #tpu.memory_space<vmem>>, vector<1x32xf32>
    %cst_14 = arith.constant dense<0.000000e+00> : vector<16xf32>
    %29 = vector.multi_reduction <add>, %26, %cst_14 [1] : vector<16x32xf32> to vector<16xf32>
    %30 = vector.shape_cast %29 : vector<16xf32> to vector<16x1xf32>
    %cst_15 = arith.constant 3.200000e+01 : f32
    %31 = vector.broadcast %cst_15 : f32 to vector<16x1xf32>
    %32 = arith.divf %30, %31 : vector<16x1xf32>
    %33 = vector.broadcast %32 : vector<16x1xf32> to vector<16x32xf32>
    %34 = arith.subf %26, %33 : vector<16x32xf32>
    %35 = arith.mulf %34, %34 : vector<16x32xf32>
    %cst_16 = arith.constant dense<0.000000e+00> : vector<16xf32>
    %36 = vector.multi_reduction <add>, %35, %cst_16 [1] : vector<16x32xf32> to vector<16xf32>
    %37 = vector.shape_cast %36 : vector<16xf32> to vector<16x1xf32>
    %cst_17 = arith.constant 3.200000e+01 : f32
    %38 = vector.broadcast %cst_17 : f32 to vector<16x1xf32>
    %39 = arith.divf %37, %38 : vector<16x1xf32>
    %cst_18 = arith.constant 9.99999996E-13 : f32
    %40 = vector.broadcast %cst_18 : f32 to vector<16x1xf32>
    %41 = arith.addf %39, %40 : vector<16x1xf32>
    %42 = math.rsqrt %41 : vector<16x1xf32>
    %43 = vector.broadcast %42 : vector<16x1xf32> to vector<16x32xf32>
    %44 = arith.mulf %34, %43 : vector<16x32xf32>
    %45 = vector.broadcast %27 : vector<1x32xf32> to vector<16x32xf32>
    %46 = arith.mulf %44, %45 : vector<16x32xf32>
    %47 = vector.broadcast %28 : vector<1x32xf32> to vector<16x32xf32>
    %48 = arith.addf %46, %47 : vector<16x32xf32>
    %c0_19 = arith.constant 0 : index
    %c0_20 = arith.constant 0 : index
    %49 = vector.load %arg2[%c0_19, %c0_20] : memref<2x8xf32, #tpu.memory_space<vmem>>, vector<2x8xf32>
    %cst_21 = arith.constant 1.000000e+00 : f32
    %50 = vector.broadcast %cst_21 : f32 to vector<2x8xf32>
    %51 = arith.subf %50, %49 : vector<2x8xf32>
    %cst_22 = arith.constant -1.000000e+09 : f32
    %52 = vector.broadcast %cst_22 : f32 to vector<2x8xf32>
    %53 = arith.mulf %51, %52 : vector<2x8xf32>
    %54 = vector.shape_cast %53 : vector<2x8xf32> to vector<2x1x8xf32>
    %cst_23 = arith.constant 0.000000e+00 : f32
    %55 = vector.broadcast %cst_23 : f32 to vector<16x32xf32>
    %c0_24 = arith.constant 0 : index
    %c0_25 = arith.constant 0 : index
    %c0_26 = arith.constant 0 : index
    %c0_27 = arith.constant 0 : index
    %56 = vector.load %arg8[%c0_24, %c0_25, %c0_26, %c0_27] : memref<2x4x32x8xf32, #tpu.memory_space<vmem>>, vector<1x1x32x8xf32>
    %57 = vector.shape_cast %56 : vector<1x1x32x8xf32> to vector<32x8xf32>
    %cst_28 = arith.constant dense<0.000000e+00> : vector<16x8xf32>
    %58 = tpu.matmul %48, %57, %cst_28 {dimension_numbers = #tpu.dot_dimension_numbers<[1], [0], [0], [1], [0, 0, 1, 1], [], []>} : vector<16x32xf32>, vector<32x8xf32>, vector<16x8xf32> -> vector<16x8xf32>
    %c0_29 = arith.constant 0 : index
    %c0_30 = arith.constant 0 : index
    %c0_31 = arith.constant 0 : index
    %c0_32 = arith.constant 0 : index
    %59 = vector.load %arg9[%c0_29, %c0_30, %c0_31, %c0_32] : memref<2x4x1x8xf32, #tpu.memory_space<vmem>>, vector<1x1x1x8xf32>
    %60 = vector.shape_cast %59 : vector<1x1x1x8xf32> to vector<1x8xf32>
    %61 = vector.broadcast %60 : vector<1x8xf32> to vector<16x8xf32>
    %62 = arith.addf %58, %61 : vector<16x8xf32>
    %63 = vector.shape_cast %62 : vector<16x8xf32> to vector<2x8x8xf32>
    %c0_33 = arith.constant 0 : index
    %c0_34 = arith.constant 0 : index
    %c0_35 = arith.constant 0 : index
    %c0_36 = arith.constant 0 : index
    %64 = vector.load %arg10[%c0_33, %c0_34, %c0_35, %c0_36] : memref<2x4x32x8xf32, #tpu.memory_space<vmem>>, vector<1x1x32x8xf32>
    %65 = vector.shape_cast %64 : vector<1x1x32x8xf32> to vector<32x8xf32>
    %cst_37 = arith.constant dense<0.000000e+00> : vector<16x8xf32>
    %66 = tpu.matmul %48, %65, %cst_37 {dimension_numbers = #tpu.dot_dimension_numbers<[1], [0], [0], [1], [0, 0, 1, 1], [], []>} : vector<16x32xf32>, vector<32x8xf32>, vector<16x8xf32> -> vector<16x8xf32>
    %c0_38 = arith.constant 0 : index
    %c0_39 = arith.constant 0 : index
    %c0_40 = arith.constant 0 : index
    %c0_41 = arith.constant 0 : index
    %67 = vector.load %arg11[%c0_38, %c0_39, %c0_40, %c0_41] : memref<2x4x1x8xf32, #tpu.memory_space<vmem>>, vector<1x1x1x8xf32>
    %68 = vector.shape_cast %67 : vector<1x1x1x8xf32> to vector<1x8xf32>
    %69 = vector.broadcast %68 : vector<1x8xf32> to vector<16x8xf32>
    %70 = arith.addf %66, %69 : vector<16x8xf32>
    %71 = vector.shape_cast %70 : vector<16x8xf32> to vector<2x8x8xf32>
    %c0_42 = arith.constant 0 : index
    %c0_43 = arith.constant 0 : index
    %c0_44 = arith.constant 0 : index
    %c0_45 = arith.constant 0 : index
    %72 = vector.load %arg12[%c0_42, %c0_43, %c0_44, %c0_45] : memref<2x4x32x8xf32, #tpu.memory_space<vmem>>, vector<1x1x32x8xf32>
    %73 = vector.shape_cast %72 : vector<1x1x32x8xf32> to vector<32x8xf32>
    %cst_46 = arith.constant dense<0.000000e+00> : vector<16x8xf32>
    %74 = tpu.matmul %48, %73, %cst_46 {dimension_numbers = #tpu.dot_dimension_numbers<[1], [0], [0], [1], [0, 0, 1, 1], [], []>} : vector<16x32xf32>, vector<32x8xf32>, vector<16x8xf32> -> vector<16x8xf32>
    %c0_47 = arith.constant 0 : index
    %c0_48 = arith.constant 0 : index
    %c0_49 = arith.constant 0 : index
    %c0_50 = arith.constant 0 : index
    %75 = vector.load %arg13[%c0_47, %c0_48, %c0_49, %c0_50] : memref<2x4x1x8xf32, #tpu.memory_space<vmem>>, vector<1x1x1x8xf32>
    %76 = vector.shape_cast %75 : vector<1x1x1x8xf32> to vector<1x8xf32>
    %77 = vector.broadcast %76 : vector<1x8xf32> to vector<16x8xf32>
    %78 = arith.addf %74, %77 : vector<16x8xf32>
    %79 = vector.shape_cast %78 : vector<16x8xf32> to vector<2x8x8xf32>
    "tpu.trace_start"() <{level = 10 : i32, message = "bqd,bkd->bqk"}> : () -> ()
    %cst_51 = arith.constant dense<0.000000e+00> : vector<2x8x8xf32>
    %80 = tpu.matmul %63, %71, %cst_51 {dimension_numbers = #tpu.dot_dimension_numbers<[2], [2], [1], [1], [0, 0, 0, 1, 1, 1], [0], [0]>} : vector<2x8x8xf32>, vector<2x8x8xf32>, vector<2x8x8xf32> -> vector<2x8x8xf32>
    "tpu.trace_stop"() : () -> ()
    %cst_52 = arith.constant 0.353553385 : f32
    %81 = vector.broadcast %cst_52 : f32 to vector<2x8x8xf32>
    %82 = arith.mulf %80, %81 : vector<2x8x8xf32>
    %83 = vector.broadcast %54 : vector<2x1x8xf32> to vector<2x8x8xf32>
    %84 = arith.addf %82, %83 : vector<2x8x8xf32>
    %cst_53 = arith.constant dense<0xFF800000> : vector<2x8xf32>
    %85 = vector.multi_reduction <maximumf>, %84, %cst_53 [2] : vector<2x8x8xf32> to vector<2x8xf32>
    %86 = vector.shape_cast %85 : vector<2x8xf32> to vector<2x8x1xf32>
    %87 = vector.broadcast %86 : vector<2x8x1xf32> to vector<2x8x8xf32>
    %88 = arith.subf %84, %87 : vector<2x8x8xf32>
    %89 = math.exp %88 : vector<2x8x8xf32>
    %cst_54 = arith.constant dense<0.000000e+00> : vector<2x8xf32>
    %90 = vector.multi_reduction <add>, %89, %cst_54 [2] : vector<2x8x8xf32> to vector<2x8xf32>
    %91 = vector.shape_cast %90 : vector<2x8xf32> to vector<2x8x1xf32>
    %92 = tpu.reciprocal %91 {approx = true} : vector<2x8x1xf32> -> vector<2x8x1xf32>
    %93 = vector.broadcast %92 : vector<2x8x1xf32> to vector<2x8x8xf32>
    %94 = arith.mulf %89, %93 : vector<2x8x8xf32>
    "tpu.trace_start"() <{level = 10 : i32, message = "bqk,bkd->bqd"}> : () -> ()
    %cst_55 = arith.constant dense<0.000000e+00> : vector<2x8x8xf32>
    %95 = tpu.matmul %94, %79, %cst_55 {dimension_numbers = #tpu.dot_dimension_numbers<[2], [1], [1], [2], [0, 0, 0, 1, 1, 2], [0], [0]>} : vector<2x8x8xf32>, vector<2x8x8xf32>, vector<2x8x8xf32> -> vector<2x8x8xf32>
    "tpu.trace_stop"() : () -> ()
    %96 = vector.shape_cast %95 : vector<2x8x8xf32> to vector<16x8xf32>
    %c0_56 = arith.constant 0 : index
    %c0_57 = arith.constant 0 : index
    %c0_58 = arith.constant 0 : index
    %c0_59 = arith.constant 0 : index
    %97 = vector.load %arg14[%c0_56, %c0_57, %c0_58, %c0_59] : memref<2x4x8x32xf32, #tpu.memory_space<vmem>>, vector<1x1x8x32xf32>
    %98 = vector.shape_cast %97 : vector<1x1x8x32xf32> to vector<8x32xf32>
    %cst_60 = arith.constant dense<0.000000e+00> : vector<16x32xf32>
    %99 = tpu.matmul %96, %98, %cst_60 {dimension_numbers = #tpu.dot_dimension_numbers<[1], [0], [0], [1], [0, 0, 1, 1], [], []>} : vector<16x8xf32>, vector<8x32xf32>, vector<16x32xf32> -> vector<16x32xf32>
    %100 = arith.addf %55, %99 : vector<16x32xf32>
    %c0_61 = arith.constant 0 : index
    %c1_62 = arith.constant 1 : index
    %c0_63 = arith.constant 0 : index
    %c0_64 = arith.constant 0 : index
    %101 = vector.load %arg8[%c0_61, %c1_62, %c0_63, %c0_64] : memref<2x4x32x8xf32, #tpu.memory_space<vmem>>, vector<1x1x32x8xf32>
    %102 = vector.shape_cast %101 : vector<1x1x32x8xf32> to vector<32x8xf32>
    %cst_65 = arith.constant dense<0.000000e+00> : vector<16x8xf32>
    %103 = tpu.matmul %48, %102, %cst_65 {dimension_numbers = #tpu.dot_dimension_numbers<[1], [0], [0], [1], [0, 0, 1, 1], [], []>} : vector<16x32xf32>, vector<32x8xf32>, vector<16x8xf32> -> vector<16x8xf32>
    %c0_66 = arith.constant 0 : index
    %c1_67 = arith.constant 1 : index
    %c0_68 = arith.constant 0 : index
    %c0_69 = arith.constant 0 : index
    %104 = vector.load %arg9[%c0_66, %c1_67, %c0_68, %c0_69] : memref<2x4x1x8xf32, #tpu.memory_space<vmem>>, vector<1x1x1x8xf32>
    %105 = vector.shape_cast %104 : vector<1x1x1x8xf32> to vector<1x8xf32>
    %106 = vector.broadcast %105 : vector<1x8xf32> to vector<16x8xf32>
    %107 = arith.addf %103, %106 : vector<16x8xf32>
    %108 = vector.shape_cast %107 : vector<16x8xf32> to vector<2x8x8xf32>
    %c0_70 = arith.constant 0 : index
    %c1_71 = arith.constant 1 : index
    %c0_72 = arith.constant 0 : index
    %c0_73 = arith.constant 0 : index
    %109 = vector.load %arg10[%c0_70, %c1_71, %c0_72, %c0_73] : memref<2x4x32x8xf32, #tpu.memory_space<vmem>>, vector<1x1x32x8xf32>
    %110 = vector.shape_cast %109 : vector<1x1x32x8xf32> to vector<32x8xf32>
    %cst_74 = arith.constant dense<0.000000e+00> : vector<16x8xf32>
    %111 = tpu.matmul %48, %110, %cst_74 {dimension_numbers = #tpu.dot_dimension_numbers<[1], [0], [0], [1], [0, 0, 1, 1], [], []>} : vector<16x32xf32>, vector<32x8xf32>, vector<16x8xf32> -> vector<16x8xf32>
    %c0_75 = arith.constant 0 : index
    %c1_76 = arith.constant 1 : index
    %c0_77 = arith.constant 0 : index
    %c0_78 = arith.constant 0 : index
    %112 = vector.load %arg11[%c0_75, %c1_76, %c0_77, %c0_78] : memref<2x4x1x8xf32, #tpu.memory_space<vmem>>, vector<1x1x1x8xf32>
    %113 = vector.shape_cast %112 : vector<1x1x1x8xf32> to vector<1x8xf32>
    %114 = vector.broadcast %113 : vector<1x8xf32> to vector<16x8xf32>
    %115 = arith.addf %111, %114 : vector<16x8xf32>
    %116 = vector.shape_cast %115 : vector<16x8xf32> to vector<2x8x8xf32>
    %c0_79 = arith.constant 0 : index
    %c1_80 = arith.constant 1 : index
    %c0_81 = arith.constant 0 : index
    %c0_82 = arith.constant 0 : index
    %117 = vector.load %arg12[%c0_79, %c1_80, %c0_81, %c0_82] : memref<2x4x32x8xf32, #tpu.memory_space<vmem>>, vector<1x1x32x8xf32>
    %118 = vector.shape_cast %117 : vector<1x1x32x8xf32> to vector<32x8xf32>
    %cst_83 = arith.constant dense<0.000000e+00> : vector<16x8xf32>
    %119 = tpu.matmul %48, %118, %cst_83 {dimension_numbers = #tpu.dot_dimension_numbers<[1], [0], [0], [1], [0, 0, 1, 1], [], []>} : vector<16x32xf32>, vector<32x8xf32>, vector<16x8xf32> -> vector<16x8xf32>
    %c0_84 = arith.constant 0 : index
    %c1_85 = arith.constant 1 : index
    %c0_86 = arith.constant 0 : index
    %c0_87 = arith.constant 0 : index
    %120 = vector.load %arg13[%c0_84, %c1_85, %c0_86, %c0_87] : memref<2x4x1x8xf32, #tpu.memory_space<vmem>>, vector<1x1x1x8xf32>
    %121 = vector.shape_cast %120 : vector<1x1x1x8xf32> to vector<1x8xf32>
    %122 = vector.broadcast %121 : vector<1x8xf32> to vector<16x8xf32>
    %123 = arith.addf %119, %122 : vector<16x8xf32>
    %124 = vector.shape_cast %123 : vector<16x8xf32> to vector<2x8x8xf32>
    "tpu.trace_start"() <{level = 10 : i32, message = "bqd,bkd->bqk"}> : () -> ()
    %cst_88 = arith.constant dense<0.000000e+00> : vector<2x8x8xf32>
    %125 = tpu.matmul %108, %116, %cst_88 {dimension_numbers = #tpu.dot_dimension_numbers<[2], [2], [1], [1], [0, 0, 0, 1, 1, 1], [0], [0]>} : vector<2x8x8xf32>, vector<2x8x8xf32>, vector<2x8x8xf32> -> vector<2x8x8xf32>
    "tpu.trace_stop"() : () -> ()
    %cst_89 = arith.constant 0.353553385 : f32
    %126 = vector.broadcast %cst_89 : f32 to vector<2x8x8xf32>
    %127 = arith.mulf %125, %126 : vector<2x8x8xf32>
    %128 = vector.broadcast %54 : vector<2x1x8xf32> to vector<2x8x8xf32>
    %129 = arith.addf %127, %128 : vector<2x8x8xf32>
    %cst_90 = arith.constant dense<0xFF800000> : vector<2x8xf32>
    %130 = vector.multi_reduction <maximumf>, %129, %cst_90 [2] : vector<2x8x8xf32> to vector<2x8xf32>
    %131 = vector.shape_cast %130 : vector<2x8xf32> to vector<2x8x1xf32>
    %132 = vector.broadcast %131 : vector<2x8x1xf32> to vector<2x8x8xf32>
    %133 = arith.subf %129, %132 : vector<2x8x8xf32>
    %134 = math.exp %133 : vector<2x8x8xf32>
    %cst_91 = arith.constant dense<0.000000e+00> : vector<2x8xf32>
    %135 = vector.multi_reduction <add>, %134, %cst_91 [2] : vector<2x8x8xf32> to vector<2x8xf32>
    %136 = vector.shape_cast %135 : vector<2x8xf32> to vector<2x8x1xf32>
    %137 = tpu.reciprocal %136 {approx = true} : vector<2x8x1xf32> -> vector<2x8x1xf32>
    %138 = vector.broadcast %137 : vector<2x8x1xf32> to vector<2x8x8xf32>
    %139 = arith.mulf %134, %138 : vector<2x8x8xf32>
    "tpu.trace_start"() <{level = 10 : i32, message = "bqk,bkd->bqd"}> : () -> ()
    %cst_92 = arith.constant dense<0.000000e+00> : vector<2x8x8xf32>
    %140 = tpu.matmul %139, %124, %cst_92 {dimension_numbers = #tpu.dot_dimension_numbers<[2], [1], [1], [2], [0, 0, 0, 1, 1, 2], [0], [0]>} : vector<2x8x8xf32>, vector<2x8x8xf32>, vector<2x8x8xf32> -> vector<2x8x8xf32>
    "tpu.trace_stop"() : () -> ()
    %141 = vector.shape_cast %140 : vector<2x8x8xf32> to vector<16x8xf32>
    %c0_93 = arith.constant 0 : index
    %c1_94 = arith.constant 1 : index
    %c0_95 = arith.constant 0 : index
    %c0_96 = arith.constant 0 : index
    %142 = vector.load %arg14[%c0_93, %c1_94, %c0_95, %c0_96] : memref<2x4x8x32xf32, #tpu.memory_space<vmem>>, vector<1x1x8x32xf32>
    %143 = vector.shape_cast %142 : vector<1x1x8x32xf32> to vector<8x32xf32>
    %cst_97 = arith.constant dense<0.000000e+00> : vector<16x32xf32>
    %144 = tpu.matmul %141, %143, %cst_97 {dimension_numbers = #tpu.dot_dimension_numbers<[1], [0], [0], [1], [0, 0, 1, 1], [], []>} : vector<16x8xf32>, vector<8x32xf32>, vector<16x32xf32> -> vector<16x32xf32>
    %145 = arith.addf %100, %144 : vector<16x32xf32>
    %c0_98 = arith.constant 0 : index
    %c2 = arith.constant 2 : index
    %c0_99 = arith.constant 0 : index
    %c0_100 = arith.constant 0 : index
    %146 = vector.load %arg8[%c0_98, %c2, %c0_99, %c0_100] : memref<2x4x32x8xf32, #tpu.memory_space<vmem>>, vector<1x1x32x8xf32>
    %147 = vector.shape_cast %146 : vector<1x1x32x8xf32> to vector<32x8xf32>
    %cst_101 = arith.constant dense<0.000000e+00> : vector<16x8xf32>
    %148 = tpu.matmul %48, %147, %cst_101 {dimension_numbers = #tpu.dot_dimension_numbers<[1], [0], [0], [1], [0, 0, 1, 1], [], []>} : vector<16x32xf32>, vector<32x8xf32>, vector<16x8xf32> -> vector<16x8xf32>
    %c0_102 = arith.constant 0 : index
    %c2_103 = arith.constant 2 : index
    %c0_104 = arith.constant 0 : index
    %c0_105 = arith.constant 0 : index
    %149 = vector.load %arg9[%c0_102, %c2_103, %c0_104, %c0_105] : memref<2x4x1x8xf32, #tpu.memory_space<vmem>>, vector<1x1x1x8xf32>
    %150 = vector.shape_cast %149 : vector<1x1x1x8xf32> to vector<1x8xf32>
    %151 = vector.broadcast %150 : vector<1x8xf32> to vector<16x8xf32>
    %152 = arith.addf %148, %151 : vector<16x8xf32>
    %153 = vector.shape_cast %152 : vector<16x8xf32> to vector<2x8x8xf32>
    %c0_106 = arith.constant 0 : index
    %c2_107 = arith.constant 2 : index
    %c0_108 = arith.constant 0 : index
    %c0_109 = arith.constant 0 : index
    %154 = vector.load %arg10[%c0_106, %c2_107, %c0_108, %c0_109] : memref<2x4x32x8xf32, #tpu.memory_space<vmem>>, vector<1x1x32x8xf32>
    %155 = vector.shape_cast %154 : vector<1x1x32x8xf32> to vector<32x8xf32>
    %cst_110 = arith.constant dense<0.000000e+00> : vector<16x8xf32>
    %156 = tpu.matmul %48, %155, %cst_110 {dimension_numbers = #tpu.dot_dimension_numbers<[1], [0], [0], [1], [0, 0, 1, 1], [], []>} : vector<16x32xf32>, vector<32x8xf32>, vector<16x8xf32> -> vector<16x8xf32>
    %c0_111 = arith.constant 0 : index
    %c2_112 = arith.constant 2 : index
    %c0_113 = arith.constant 0 : index
    %c0_114 = arith.constant 0 : index
    %157 = vector.load %arg11[%c0_111, %c2_112, %c0_113, %c0_114] : memref<2x4x1x8xf32, #tpu.memory_space<vmem>>, vector<1x1x1x8xf32>
    %158 = vector.shape_cast %157 : vector<1x1x1x8xf32> to vector<1x8xf32>
    %159 = vector.broadcast %158 : vector<1x8xf32> to vector<16x8xf32>
    %160 = arith.addf %156, %159 : vector<16x8xf32>
    %161 = vector.shape_cast %160 : vector<16x8xf32> to vector<2x8x8xf32>
    %c0_115 = arith.constant 0 : index
    %c2_116 = arith.constant 2 : index
    %c0_117 = arith.constant 0 : index
    %c0_118 = arith.constant 0 : index
    %162 = vector.load %arg12[%c0_115, %c2_116, %c0_117, %c0_118] : memref<2x4x32x8xf32, #tpu.memory_space<vmem>>, vector<1x1x32x8xf32>
    %163 = vector.shape_cast %162 : vector<1x1x32x8xf32> to vector<32x8xf32>
    %cst_119 = arith.constant dense<0.000000e+00> : vector<16x8xf32>
    %164 = tpu.matmul %48, %163, %cst_119 {dimension_numbers = #tpu.dot_dimension_numbers<[1], [0], [0], [1], [0, 0, 1, 1], [], []>} : vector<16x32xf32>, vector<32x8xf32>, vector<16x8xf32> -> vector<16x8xf32>
    %c0_120 = arith.constant 0 : index
    %c2_121 = arith.constant 2 : index
    %c0_122 = arith.constant 0 : index
    %c0_123 = arith.constant 0 : index
    %165 = vector.load %arg13[%c0_120, %c2_121, %c0_122, %c0_123] : memref<2x4x1x8xf32, #tpu.memory_space<vmem>>, vector<1x1x1x8xf32>
    %166 = vector.shape_cast %165 : vector<1x1x1x8xf32> to vector<1x8xf32>
    %167 = vector.broadcast %166 : vector<1x8xf32> to vector<16x8xf32>
    %168 = arith.addf %164, %167 : vector<16x8xf32>
    %169 = vector.shape_cast %168 : vector<16x8xf32> to vector<2x8x8xf32>
    "tpu.trace_start"() <{level = 10 : i32, message = "bqd,bkd->bqk"}> : () -> ()
    %cst_124 = arith.constant dense<0.000000e+00> : vector<2x8x8xf32>
    %170 = tpu.matmul %153, %161, %cst_124 {dimension_numbers = #tpu.dot_dimension_numbers<[2], [2], [1], [1], [0, 0, 0, 1, 1, 1], [0], [0]>} : vector<2x8x8xf32>, vector<2x8x8xf32>, vector<2x8x8xf32> -> vector<2x8x8xf32>
    "tpu.trace_stop"() : () -> ()
    %cst_125 = arith.constant 0.353553385 : f32
    %171 = vector.broadcast %cst_125 : f32 to vector<2x8x8xf32>
    %172 = arith.mulf %170, %171 : vector<2x8x8xf32>
    %173 = vector.broadcast %54 : vector<2x1x8xf32> to vector<2x8x8xf32>
    %174 = arith.addf %172, %173 : vector<2x8x8xf32>
    %cst_126 = arith.constant dense<0xFF800000> : vector<2x8xf32>
    %175 = vector.multi_reduction <maximumf>, %174, %cst_126 [2] : vector<2x8x8xf32> to vector<2x8xf32>
    %176 = vector.shape_cast %175 : vector<2x8xf32> to vector<2x8x1xf32>
    %177 = vector.broadcast %176 : vector<2x8x1xf32> to vector<2x8x8xf32>
    %178 = arith.subf %174, %177 : vector<2x8x8xf32>
    %179 = math.exp %178 : vector<2x8x8xf32>
    %cst_127 = arith.constant dense<0.000000e+00> : vector<2x8xf32>
    %180 = vector.multi_reduction <add>, %179, %cst_127 [2] : vector<2x8x8xf32> to vector<2x8xf32>
    %181 = vector.shape_cast %180 : vector<2x8xf32> to vector<2x8x1xf32>
    %182 = tpu.reciprocal %181 {approx = true} : vector<2x8x1xf32> -> vector<2x8x1xf32>
    %183 = vector.broadcast %182 : vector<2x8x1xf32> to vector<2x8x8xf32>
    %184 = arith.mulf %179, %183 : vector<2x8x8xf32>
    "tpu.trace_start"() <{level = 10 : i32, message = "bqk,bkd->bqd"}> : () -> ()
    %cst_128 = arith.constant dense<0.000000e+00> : vector<2x8x8xf32>
    %185 = tpu.matmul %184, %169, %cst_128 {dimension_numbers = #tpu.dot_dimension_numbers<[2], [1], [1], [2], [0, 0, 0, 1, 1, 2], [0], [0]>} : vector<2x8x8xf32>, vector<2x8x8xf32>, vector<2x8x8xf32> -> vector<2x8x8xf32>
    "tpu.trace_stop"() : () -> ()
    %186 = vector.shape_cast %185 : vector<2x8x8xf32> to vector<16x8xf32>
    %c0_129 = arith.constant 0 : index
    %c2_130 = arith.constant 2 : index
    %c0_131 = arith.constant 0 : index
    %c0_132 = arith.constant 0 : index
    %187 = vector.load %arg14[%c0_129, %c2_130, %c0_131, %c0_132] : memref<2x4x8x32xf32, #tpu.memory_space<vmem>>, vector<1x1x8x32xf32>
    %188 = vector.shape_cast %187 : vector<1x1x8x32xf32> to vector<8x32xf32>
    %cst_133 = arith.constant dense<0.000000e+00> : vector<16x32xf32>
    %189 = tpu.matmul %186, %188, %cst_133 {dimension_numbers = #tpu.dot_dimension_numbers<[1], [0], [0], [1], [0, 0, 1, 1], [], []>} : vector<16x8xf32>, vector<8x32xf32>, vector<16x32xf32> -> vector<16x32xf32>
    %190 = arith.addf %145, %189 : vector<16x32xf32>
    %c0_134 = arith.constant 0 : index
    %c3 = arith.constant 3 : index
    %c0_135 = arith.constant 0 : index
    %c0_136 = arith.constant 0 : index
    %191 = vector.load %arg8[%c0_134, %c3, %c0_135, %c0_136] : memref<2x4x32x8xf32, #tpu.memory_space<vmem>>, vector<1x1x32x8xf32>
    %192 = vector.shape_cast %191 : vector<1x1x32x8xf32> to vector<32x8xf32>
    %cst_137 = arith.constant dense<0.000000e+00> : vector<16x8xf32>
    %193 = tpu.matmul %48, %192, %cst_137 {dimension_numbers = #tpu.dot_dimension_numbers<[1], [0], [0], [1], [0, 0, 1, 1], [], []>} : vector<16x32xf32>, vector<32x8xf32>, vector<16x8xf32> -> vector<16x8xf32>
    %c0_138 = arith.constant 0 : index
    %c3_139 = arith.constant 3 : index
    %c0_140 = arith.constant 0 : index
    %c0_141 = arith.constant 0 : index
    %194 = vector.load %arg9[%c0_138, %c3_139, %c0_140, %c0_141] : memref<2x4x1x8xf32, #tpu.memory_space<vmem>>, vector<1x1x1x8xf32>
    %195 = vector.shape_cast %194 : vector<1x1x1x8xf32> to vector<1x8xf32>
    %196 = vector.broadcast %195 : vector<1x8xf32> to vector<16x8xf32>
    %197 = arith.addf %193, %196 : vector<16x8xf32>
    %198 = vector.shape_cast %197 : vector<16x8xf32> to vector<2x8x8xf32>
    %c0_142 = arith.constant 0 : index
    %c3_143 = arith.constant 3 : index
    %c0_144 = arith.constant 0 : index
    %c0_145 = arith.constant 0 : index
    %199 = vector.load %arg10[%c0_142, %c3_143, %c0_144, %c0_145] : memref<2x4x32x8xf32, #tpu.memory_space<vmem>>, vector<1x1x32x8xf32>
    %200 = vector.shape_cast %199 : vector<1x1x32x8xf32> to vector<32x8xf32>
    %cst_146 = arith.constant dense<0.000000e+00> : vector<16x8xf32>
    %201 = tpu.matmul %48, %200, %cst_146 {dimension_numbers = #tpu.dot_dimension_numbers<[1], [0], [0], [1], [0, 0, 1, 1], [], []>} : vector<16x32xf32>, vector<32x8xf32>, vector<16x8xf32> -> vector<16x8xf32>
    %c0_147 = arith.constant 0 : index
    %c3_148 = arith.constant 3 : index
    %c0_149 = arith.constant 0 : index
    %c0_150 = arith.constant 0 : index
    %202 = vector.load %arg11[%c0_147, %c3_148, %c0_149, %c0_150] : memref<2x4x1x8xf32, #tpu.memory_space<vmem>>, vector<1x1x1x8xf32>
    %203 = vector.shape_cast %202 : vector<1x1x1x8xf32> to vector<1x8xf32>
    %204 = vector.broadcast %203 : vector<1x8xf32> to vector<16x8xf32>
    %205 = arith.addf %201, %204 : vector<16x8xf32>
    %206 = vector.shape_cast %205 : vector<16x8xf32> to vector<2x8x8xf32>
    %c0_151 = arith.constant 0 : index
    %c3_152 = arith.constant 3 : index
    %c0_153 = arith.constant 0 : index
    %c0_154 = arith.constant 0 : index
    %207 = vector.load %arg12[%c0_151, %c3_152, %c0_153, %c0_154] : memref<2x4x32x8xf32, #tpu.memory_space<vmem>>, vector<1x1x32x8xf32>
    %208 = vector.shape_cast %207 : vector<1x1x32x8xf32> to vector<32x8xf32>
    %cst_155 = arith.constant dense<0.000000e+00> : vector<16x8xf32>
    %209 = tpu.matmul %48, %208, %cst_155 {dimension_numbers = #tpu.dot_dimension_numbers<[1], [0], [0], [1], [0, 0, 1, 1], [], []>} : vector<16x32xf32>, vector<32x8xf32>, vector<16x8xf32> -> vector<16x8xf32>
    %c0_156 = arith.constant 0 : index
    %c3_157 = arith.constant 3 : index
    %c0_158 = arith.constant 0 : index
    %c0_159 = arith.constant 0 : index
    %210 = vector.load %arg13[%c0_156, %c3_157, %c0_158, %c0_159] : memref<2x4x1x8xf32, #tpu.memory_space<vmem>>, vector<1x1x1x8xf32>
    %211 = vector.shape_cast %210 : vector<1x1x1x8xf32> to vector<1x8xf32>
    %212 = vector.broadcast %211 : vector<1x8xf32> to vector<16x8xf32>
    %213 = arith.addf %209, %212 : vector<16x8xf32>
    %214 = vector.shape_cast %213 : vector<16x8xf32> to vector<2x8x8xf32>
    "tpu.trace_start"() <{level = 10 : i32, message = "bqd,bkd->bqk"}> : () -> ()
    %cst_160 = arith.constant dense<0.000000e+00> : vector<2x8x8xf32>
    %215 = tpu.matmul %198, %206, %cst_160 {dimension_numbers = #tpu.dot_dimension_numbers<[2], [2], [1], [1], [0, 0, 0, 1, 1, 1], [0], [0]>} : vector<2x8x8xf32>, vector<2x8x8xf32>, vector<2x8x8xf32> -> vector<2x8x8xf32>
    "tpu.trace_stop"() : () -> ()
    %cst_161 = arith.constant 0.353553385 : f32
    %216 = vector.broadcast %cst_161 : f32 to vector<2x8x8xf32>
    %217 = arith.mulf %215, %216 : vector<2x8x8xf32>
    %218 = vector.broadcast %54 : vector<2x1x8xf32> to vector<2x8x8xf32>
    %219 = arith.addf %217, %218 : vector<2x8x8xf32>
    %cst_162 = arith.constant dense<0xFF800000> : vector<2x8xf32>
    %220 = vector.multi_reduction <maximumf>, %219, %cst_162 [2] : vector<2x8x8xf32> to vector<2x8xf32>
    %221 = vector.shape_cast %220 : vector<2x8xf32> to vector<2x8x1xf32>
    %222 = vector.broadcast %221 : vector<2x8x1xf32> to vector<2x8x8xf32>
    %223 = arith.subf %219, %222 : vector<2x8x8xf32>
    %224 = math.exp %223 : vector<2x8x8xf32>
    %cst_163 = arith.constant dense<0.000000e+00> : vector<2x8xf32>
    %225 = vector.multi_reduction <add>, %224, %cst_163 [2] : vector<2x8x8xf32> to vector<2x8xf32>
    %226 = vector.shape_cast %225 : vector<2x8xf32> to vector<2x8x1xf32>
    %227 = tpu.reciprocal %226 {approx = true} : vector<2x8x1xf32> -> vector<2x8x1xf32>
    %228 = vector.broadcast %227 : vector<2x8x1xf32> to vector<2x8x8xf32>
    %229 = arith.mulf %224, %228 : vector<2x8x8xf32>
    "tpu.trace_start"() <{level = 10 : i32, message = "bqk,bkd->bqd"}> : () -> ()
    %cst_164 = arith.constant dense<0.000000e+00> : vector<2x8x8xf32>
    %230 = tpu.matmul %229, %214, %cst_164 {dimension_numbers = #tpu.dot_dimension_numbers<[2], [1], [1], [2], [0, 0, 0, 1, 1, 2], [0], [0]>} : vector<2x8x8xf32>, vector<2x8x8xf32>, vector<2x8x8xf32> -> vector<2x8x8xf32>
    "tpu.trace_stop"() : () -> ()
    %231 = vector.shape_cast %230 : vector<2x8x8xf32> to vector<16x8xf32>
    %c0_165 = arith.constant 0 : index
    %c3_166 = arith.constant 3 : index
    %c0_167 = arith.constant 0 : index
    %c0_168 = arith.constant 0 : index
    %232 = vector.load %arg14[%c0_165, %c3_166, %c0_167, %c0_168] : memref<2x4x8x32xf32, #tpu.memory_space<vmem>>, vector<1x1x8x32xf32>
    %233 = vector.shape_cast %232 : vector<1x1x8x32xf32> to vector<8x32xf32>
    %cst_169 = arith.constant dense<0.000000e+00> : vector<16x32xf32>
    %234 = tpu.matmul %231, %233, %cst_169 {dimension_numbers = #tpu.dot_dimension_numbers<[1], [0], [0], [1], [0, 0, 1, 1], [], []>} : vector<16x8xf32>, vector<8x32xf32>, vector<16x32xf32> -> vector<16x32xf32>
    %235 = arith.addf %190, %234 : vector<16x32xf32>
    %c0_170 = arith.constant 0 : index
    %c0_171 = arith.constant 0 : index
    %c0_172 = arith.constant 0 : index
    %236 = vector.load %arg15[%c0_170, %c0_171, %c0_172] : memref<2x1x32xf32, #tpu.memory_space<vmem>>, vector<1x1x32xf32>
    %237 = vector.shape_cast %236 : vector<1x1x32xf32> to vector<1x32xf32>
    %238 = vector.broadcast %237 : vector<1x32xf32> to vector<16x32xf32>
    %239 = arith.addf %235, %238 : vector<16x32xf32>
    %240 = arith.addf %239, %48 : vector<16x32xf32>
    %c0_173 = arith.constant 0 : index
    %c0_174 = arith.constant 0 : index
    %c0_175 = arith.constant 0 : index
    %241 = vector.load %arg16[%c0_173, %c0_174, %c0_175] : memref<2x1x32xf32, #tpu.memory_space<vmem>>, vector<1x1x32xf32>
    %242 = vector.shape_cast %241 : vector<1x1x32xf32> to vector<1x32xf32>
    %c0_176 = arith.constant 0 : index
    %c0_177 = arith.constant 0 : index
    %c0_178 = arith.constant 0 : index
    %243 = vector.load %arg17[%c0_176, %c0_177, %c0_178] : memref<2x1x32xf32, #tpu.memory_space<vmem>>, vector<1x1x32xf32>
    %244 = vector.shape_cast %243 : vector<1x1x32xf32> to vector<1x32xf32>
    %cst_179 = arith.constant dense<0.000000e+00> : vector<16xf32>
    %245 = vector.multi_reduction <add>, %240, %cst_179 [1] : vector<16x32xf32> to vector<16xf32>
    %246 = vector.shape_cast %245 : vector<16xf32> to vector<16x1xf32>
    %cst_180 = arith.constant 3.200000e+01 : f32
    %247 = vector.broadcast %cst_180 : f32 to vector<16x1xf32>
    %248 = arith.divf %246, %247 : vector<16x1xf32>
    %249 = vector.broadcast %248 : vector<16x1xf32> to vector<16x32xf32>
    %250 = arith.subf %240, %249 : vector<16x32xf32>
    %251 = arith.mulf %250, %250 : vector<16x32xf32>
    %cst_181 = arith.constant dense<0.000000e+00> : vector<16xf32>
    %252 = vector.multi_reduction <add>, %251, %cst_181 [1] : vector<16x32xf32> to vector<16xf32>
    %253 = vector.shape_cast %252 : vector<16xf32> to vector<16x1xf32>
    %cst_182 = arith.constant 3.200000e+01 : f32
    %254 = vector.broadcast %cst_182 : f32 to vector<16x1xf32>
    %255 = arith.divf %253, %254 : vector<16x1xf32>
    %cst_183 = arith.constant 9.99999996E-13 : f32
    %256 = vector.broadcast %cst_183 : f32 to vector<16x1xf32>
    %257 = arith.addf %255, %256 : vector<16x1xf32>
    %258 = math.rsqrt %257 : vector<16x1xf32>
    %259 = vector.broadcast %258 : vector<16x1xf32> to vector<16x32xf32>
    %260 = arith.mulf %250, %259 : vector<16x32xf32>
    %261 = vector.broadcast %242 : vector<1x32xf32> to vector<16x32xf32>
    %262 = arith.mulf %260, %261 : vector<16x32xf32>
    %263 = vector.broadcast %244 : vector<1x32xf32> to vector<16x32xf32>
    %264 = arith.addf %262, %263 : vector<16x32xf32>
    %c0_184 = arith.constant 0 : index
    %c0_185 = arith.constant 0 : index
    %c0_186 = arith.constant 0 : index
    %265 = vector.load %arg18[%c0_184, %c0_185, %c0_186] : memref<2x32x64xf32, #tpu.memory_space<vmem>>, vector<1x32x64xf32>
    %266 = vector.shape_cast %265 : vector<1x32x64xf32> to vector<32x64xf32>
    %cst_187 = arith.constant dense<0.000000e+00> : vector<16x64xf32>
    %267 = tpu.matmul %264, %266, %cst_187 {dimension_numbers = #tpu.dot_dimension_numbers<[1], [0], [0], [1], [0, 0, 1, 1], [], []>} : vector<16x32xf32>, vector<32x64xf32>, vector<16x64xf32> -> vector<16x64xf32>
    %c0_188 = arith.constant 0 : index
    %c0_189 = arith.constant 0 : index
    %c0_190 = arith.constant 0 : index
    %268 = vector.load %arg19[%c0_188, %c0_189, %c0_190] : memref<2x1x64xf32, #tpu.memory_space<vmem>>, vector<1x1x64xf32>
    %269 = vector.shape_cast %268 : vector<1x1x64xf32> to vector<1x64xf32>
    %270 = vector.broadcast %269 : vector<1x64xf32> to vector<16x64xf32>
    %271 = arith.addf %267, %270 : vector<16x64xf32>
    %272 = arith.mulf %271, %271 : vector<16x64xf32>
    %273 = arith.mulf %271, %272 : vector<16x64xf32>
    %cst_191 = arith.constant 4.471500e-02 : f32
    %274 = vector.broadcast %cst_191 : f32 to vector<16x64xf32>
    %275 = arith.mulf %274, %273 : vector<16x64xf32>
    %276 = arith.addf %271, %275 : vector<16x64xf32>
    %cst_192 = arith.constant 0.797884583 : f32
    %277 = vector.broadcast %cst_192 : f32 to vector<16x64xf32>
    %278 = arith.mulf %277, %276 : vector<16x64xf32>
    %279 = math.tanh %278 : vector<16x64xf32>
    %cst_193 = arith.constant 1.000000e+00 : f32
    %280 = vector.broadcast %cst_193 : f32 to vector<16x64xf32>
    %281 = arith.addf %280, %279 : vector<16x64xf32>
    %cst_194 = arith.constant 5.000000e-01 : f32
    %282 = vector.broadcast %cst_194 : f32 to vector<16x64xf32>
    %283 = arith.mulf %282, %281 : vector<16x64xf32>
    %284 = arith.mulf %271, %283 : vector<16x64xf32>
    %c0_195 = arith.constant 0 : index
    %c0_196 = arith.constant 0 : index
    %c0_197 = arith.constant 0 : index
    %285 = vector.load %arg20[%c0_195, %c0_196, %c0_197] : memref<2x64x32xf32, #tpu.memory_space<vmem>>, vector<1x64x32xf32>
    %286 = vector.shape_cast %285 : vector<1x64x32xf32> to vector<64x32xf32>
    %cst_198 = arith.constant dense<0.000000e+00> : vector<16x32xf32>
    %287 = tpu.matmul %284, %286, %cst_198 {dimension_numbers = #tpu.dot_dimension_numbers<[1], [0], [0], [1], [0, 0, 1, 1], [], []>} : vector<16x64xf32>, vector<64x32xf32>, vector<16x32xf32> -> vector<16x32xf32>
    %c0_199 = arith.constant 0 : index
    %c0_200 = arith.constant 0 : index
    %c0_201 = arith.constant 0 : index
    %288 = vector.load %arg21[%c0_199, %c0_200, %c0_201] : memref<2x1x32xf32, #tpu.memory_space<vmem>>, vector<1x1x32xf32>
    %289 = vector.shape_cast %288 : vector<1x1x32xf32> to vector<1x32xf32>
    %290 = vector.broadcast %289 : vector<1x32xf32> to vector<16x32xf32>
    %291 = arith.addf %287, %290 : vector<16x32xf32>
    %292 = arith.addf %291, %264 : vector<16x32xf32>
    %c0_202 = arith.constant 0 : index
    %c0_203 = arith.constant 0 : index
    %c0_204 = arith.constant 0 : index
    %293 = vector.load %arg22[%c0_202, %c0_203, %c0_204] : memref<2x1x32xf32, #tpu.memory_space<vmem>>, vector<1x1x32xf32>
    %294 = vector.shape_cast %293 : vector<1x1x32xf32> to vector<1x32xf32>
    %c0_205 = arith.constant 0 : index
    %c0_206 = arith.constant 0 : index
    %c0_207 = arith.constant 0 : index
    %295 = vector.load %arg23[%c0_205, %c0_206, %c0_207] : memref<2x1x32xf32, #tpu.memory_space<vmem>>, vector<1x1x32xf32>
    %296 = vector.shape_cast %295 : vector<1x1x32xf32> to vector<1x32xf32>
    %cst_208 = arith.constant dense<0.000000e+00> : vector<16xf32>
    %297 = vector.multi_reduction <add>, %292, %cst_208 [1] : vector<16x32xf32> to vector<16xf32>
    %298 = vector.shape_cast %297 : vector<16xf32> to vector<16x1xf32>
    %cst_209 = arith.constant 3.200000e+01 : f32
    %299 = vector.broadcast %cst_209 : f32 to vector<16x1xf32>
    %300 = arith.divf %298, %299 : vector<16x1xf32>
    %301 = vector.broadcast %300 : vector<16x1xf32> to vector<16x32xf32>
    %302 = arith.subf %292, %301 : vector<16x32xf32>
    %303 = arith.mulf %302, %302 : vector<16x32xf32>
    %cst_210 = arith.constant dense<0.000000e+00> : vector<16xf32>
    %304 = vector.multi_reduction <add>, %303, %cst_210 [1] : vector<16x32xf32> to vector<16xf32>
    %305 = vector.shape_cast %304 : vector<16xf32> to vector<16x1xf32>
    %cst_211 = arith.constant 3.200000e+01 : f32
    %306 = vector.broadcast %cst_211 : f32 to vector<16x1xf32>
    %307 = arith.divf %305, %306 : vector<16x1xf32>
    %cst_212 = arith.constant 9.99999996E-13 : f32
    %308 = vector.broadcast %cst_212 : f32 to vector<16x1xf32>
    %309 = arith.addf %307, %308 : vector<16x1xf32>
    %310 = math.rsqrt %309 : vector<16x1xf32>
    %311 = vector.broadcast %310 : vector<16x1xf32> to vector<16x32xf32>
    %312 = arith.mulf %302, %311 : vector<16x32xf32>
    %313 = vector.broadcast %294 : vector<1x32xf32> to vector<16x32xf32>
    %314 = arith.mulf %312, %313 : vector<16x32xf32>
    %315 = vector.broadcast %296 : vector<1x32xf32> to vector<16x32xf32>
    %316 = arith.addf %314, %315 : vector<16x32xf32>
    %cst_213 = arith.constant 0.000000e+00 : f32
    %317 = vector.broadcast %cst_213 : f32 to vector<16x32xf32>
    %c1_214 = arith.constant 1 : index
    %c0_215 = arith.constant 0 : index
    %c0_216 = arith.constant 0 : index
    %c0_217 = arith.constant 0 : index
    %318 = vector.load %arg8[%c1_214, %c0_215, %c0_216, %c0_217] : memref<2x4x32x8xf32, #tpu.memory_space<vmem>>, vector<1x1x32x8xf32>
    %319 = vector.shape_cast %318 : vector<1x1x32x8xf32> to vector<32x8xf32>
    %cst_218 = arith.constant dense<0.000000e+00> : vector<16x8xf32>
    %320 = tpu.matmul %316, %319, %cst_218 {dimension_numbers = #tpu.dot_dimension_numbers<[1], [0], [0], [1], [0, 0, 1, 1], [], []>} : vector<16x32xf32>, vector<32x8xf32>, vector<16x8xf32> -> vector<16x8xf32>
    %c1_219 = arith.constant 1 : index
    %c0_220 = arith.constant 0 : index
    %c0_221 = arith.constant 0 : index
    %c0_222 = arith.constant 0 : index
    %321 = vector.load %arg9[%c1_219, %c0_220, %c0_221, %c0_222] : memref<2x4x1x8xf32, #tpu.memory_space<vmem>>, vector<1x1x1x8xf32>
    %322 = vector.shape_cast %321 : vector<1x1x1x8xf32> to vector<1x8xf32>
    %323 = vector.broadcast %322 : vector<1x8xf32> to vector<16x8xf32>
    %324 = arith.addf %320, %323 : vector<16x8xf32>
    %325 = vector.shape_cast %324 : vector<16x8xf32> to vector<2x8x8xf32>
    %c1_223 = arith.constant 1 : index
    %c0_224 = arith.constant 0 : index
    %c0_225 = arith.constant 0 : index
    %c0_226 = arith.constant 0 : index
    %326 = vector.load %arg10[%c1_223, %c0_224, %c0_225, %c0_226] : memref<2x4x32x8xf32, #tpu.memory_space<vmem>>, vector<1x1x32x8xf32>
    %327 = vector.shape_cast %326 : vector<1x1x32x8xf32> to vector<32x8xf32>
    %cst_227 = arith.constant dense<0.000000e+00> : vector<16x8xf32>
    %328 = tpu.matmul %316, %327, %cst_227 {dimension_numbers = #tpu.dot_dimension_numbers<[1], [0], [0], [1], [0, 0, 1, 1], [], []>} : vector<16x32xf32>, vector<32x8xf32>, vector<16x8xf32> -> vector<16x8xf32>
    %c1_228 = arith.constant 1 : index
    %c0_229 = arith.constant 0 : index
    %c0_230 = arith.constant 0 : index
    %c0_231 = arith.constant 0 : index
    %329 = vector.load %arg11[%c1_228, %c0_229, %c0_230, %c0_231] : memref<2x4x1x8xf32, #tpu.memory_space<vmem>>, vector<1x1x1x8xf32>
    %330 = vector.shape_cast %329 : vector<1x1x1x8xf32> to vector<1x8xf32>
    %331 = vector.broadcast %330 : vector<1x8xf32> to vector<16x8xf32>
    %332 = arith.addf %328, %331 : vector<16x8xf32>
    %333 = vector.shape_cast %332 : vector<16x8xf32> to vector<2x8x8xf32>
    %c1_232 = arith.constant 1 : index
    %c0_233 = arith.constant 0 : index
    %c0_234 = arith.constant 0 : index
    %c0_235 = arith.constant 0 : index
    %334 = vector.load %arg12[%c1_232, %c0_233, %c0_234, %c0_235] : memref<2x4x32x8xf32, #tpu.memory_space<vmem>>, vector<1x1x32x8xf32>
    %335 = vector.shape_cast %334 : vector<1x1x32x8xf32> to vector<32x8xf32>
    %cst_236 = arith.constant dense<0.000000e+00> : vector<16x8xf32>
    %336 = tpu.matmul %316, %335, %cst_236 {dimension_numbers = #tpu.dot_dimension_numbers<[1], [0], [0], [1], [0, 0, 1, 1], [], []>} : vector<16x32xf32>, vector<32x8xf32>, vector<16x8xf32> -> vector<16x8xf32>
    %c1_237 = arith.constant 1 : index
    %c0_238 = arith.constant 0 : index
    %c0_239 = arith.constant 0 : index
    %c0_240 = arith.constant 0 : index
    %337 = vector.load %arg13[%c1_237, %c0_238, %c0_239, %c0_240] : memref<2x4x1x8xf32, #tpu.memory_space<vmem>>, vector<1x1x1x8xf32>
    %338 = vector.shape_cast %337 : vector<1x1x1x8xf32> to vector<1x8xf32>
    %339 = vector.broadcast %338 : vector<1x8xf32> to vector<16x8xf32>
    %340 = arith.addf %336, %339 : vector<16x8xf32>
    %341 = vector.shape_cast %340 : vector<16x8xf32> to vector<2x8x8xf32>
    "tpu.trace_start"() <{level = 10 : i32, message = "bqd,bkd->bqk"}> : () -> ()
    %cst_241 = arith.constant dense<0.000000e+00> : vector<2x8x8xf32>
    %342 = tpu.matmul %325, %333, %cst_241 {dimension_numbers = #tpu.dot_dimension_numbers<[2], [2], [1], [1], [0, 0, 0, 1, 1, 1], [0], [0]>} : vector<2x8x8xf32>, vector<2x8x8xf32>, vector<2x8x8xf32> -> vector<2x8x8xf32>
    "tpu.trace_stop"() : () -> ()
    %cst_242 = arith.constant 0.353553385 : f32
    %343 = vector.broadcast %cst_242 : f32 to vector<2x8x8xf32>
    %344 = arith.mulf %342, %343 : vector<2x8x8xf32>
    %345 = vector.broadcast %54 : vector<2x1x8xf32> to vector<2x8x8xf32>
    %346 = arith.addf %344, %345 : vector<2x8x8xf32>
    %cst_243 = arith.constant dense<0xFF800000> : vector<2x8xf32>
    %347 = vector.multi_reduction <maximumf>, %346, %cst_243 [2] : vector<2x8x8xf32> to vector<2x8xf32>
    %348 = vector.shape_cast %347 : vector<2x8xf32> to vector<2x8x1xf32>
    %349 = vector.broadcast %348 : vector<2x8x1xf32> to vector<2x8x8xf32>
    %350 = arith.subf %346, %349 : vector<2x8x8xf32>
    %351 = math.exp %350 : vector<2x8x8xf32>
    %cst_244 = arith.constant dense<0.000000e+00> : vector<2x8xf32>
    %352 = vector.multi_reduction <add>, %351, %cst_244 [2] : vector<2x8x8xf32> to vector<2x8xf32>
    %353 = vector.shape_cast %352 : vector<2x8xf32> to vector<2x8x1xf32>
    %354 = tpu.reciprocal %353 {approx = true} : vector<2x8x1xf32> -> vector<2x8x1xf32>
    %355 = vector.broadcast %354 : vector<2x8x1xf32> to vector<2x8x8xf32>
    %356 = arith.mulf %351, %355 : vector<2x8x8xf32>
    "tpu.trace_start"() <{level = 10 : i32, message = "bqk,bkd->bqd"}> : () -> ()
    %cst_245 = arith.constant dense<0.000000e+00> : vector<2x8x8xf32>
    %357 = tpu.matmul %356, %341, %cst_245 {dimension_numbers = #tpu.dot_dimension_numbers<[2], [1], [1], [2], [0, 0, 0, 1, 1, 2], [0], [0]>} : vector<2x8x8xf32>, vector<2x8x8xf32>, vector<2x8x8xf32> -> vector<2x8x8xf32>
    "tpu.trace_stop"() : () -> ()
    %358 = vector.shape_cast %357 : vector<2x8x8xf32> to vector<16x8xf32>
    %c1_246 = arith.constant 1 : index
    %c0_247 = arith.constant 0 : index
    %c0_248 = arith.constant 0 : index
    %c0_249 = arith.constant 0 : index
    %359 = vector.load %arg14[%c1_246, %c0_247, %c0_248, %c0_249] : memref<2x4x8x32xf32, #tpu.memory_space<vmem>>, vector<1x1x8x32xf32>
    %360 = vector.shape_cast %359 : vector<1x1x8x32xf32> to vector<8x32xf32>
    %cst_250 = arith.constant dense<0.000000e+00> : vector<16x32xf32>
    %361 = tpu.matmul %358, %360, %cst_250 {dimension_numbers = #tpu.dot_dimension_numbers<[1], [0], [0], [1], [0, 0, 1, 1], [], []>} : vector<16x8xf32>, vector<8x32xf32>, vector<16x32xf32> -> vector<16x32xf32>
    %362 = arith.addf %317, %361 : vector<16x32xf32>
    %c1_251 = arith.constant 1 : index
    %c1_252 = arith.constant 1 : index
    %c0_253 = arith.constant 0 : index
    %c0_254 = arith.constant 0 : index
    %363 = vector.load %arg8[%c1_251, %c1_252, %c0_253, %c0_254] : memref<2x4x32x8xf32, #tpu.memory_space<vmem>>, vector<1x1x32x8xf32>
    %364 = vector.shape_cast %363 : vector<1x1x32x8xf32> to vector<32x8xf32>
    %cst_255 = arith.constant dense<0.000000e+00> : vector<16x8xf32>
    %365 = tpu.matmul %316, %364, %cst_255 {dimension_numbers = #tpu.dot_dimension_numbers<[1], [0], [0], [1], [0, 0, 1, 1], [], []>} : vector<16x32xf32>, vector<32x8xf32>, vector<16x8xf32> -> vector<16x8xf32>
    %c1_256 = arith.constant 1 : index
    %c1_257 = arith.constant 1 : index
    %c0_258 = arith.constant 0 : index
    %c0_259 = arith.constant 0 : index
    %366 = vector.load %arg9[%c1_256, %c1_257, %c0_258, %c0_259] : memref<2x4x1x8xf32, #tpu.memory_space<vmem>>, vector<1x1x1x8xf32>
    %367 = vector.shape_cast %366 : vector<1x1x1x8xf32> to vector<1x8xf32>
    %368 = vector.broadcast %367 : vector<1x8xf32> to vector<16x8xf32>
    %369 = arith.addf %365, %368 : vector<16x8xf32>
    %370 = vector.shape_cast %369 : vector<16x8xf32> to vector<2x8x8xf32>
    %c1_260 = arith.constant 1 : index
    %c1_261 = arith.constant 1 : index
    %c0_262 = arith.constant 0 : index
    %c0_263 = arith.constant 0 : index
    %371 = vector.load %arg10[%c1_260, %c1_261, %c0_262, %c0_263] : memref<2x4x32x8xf32, #tpu.memory_space<vmem>>, vector<1x1x32x8xf32>
    %372 = vector.shape_cast %371 : vector<1x1x32x8xf32> to vector<32x8xf32>
    %cst_264 = arith.constant dense<0.000000e+00> : vector<16x8xf32>
    %373 = tpu.matmul %316, %372, %cst_264 {dimension_numbers = #tpu.dot_dimension_numbers<[1], [0], [0], [1], [0, 0, 1, 1], [], []>} : vector<16x32xf32>, vector<32x8xf32>, vector<16x8xf32> -> vector<16x8xf32>
    %c1_265 = arith.constant 1 : index
    %c1_266 = arith.constant 1 : index
    %c0_267 = arith.constant 0 : index
    %c0_268 = arith.constant 0 : index
    %374 = vector.load %arg11[%c1_265, %c1_266, %c0_267, %c0_268] : memref<2x4x1x8xf32, #tpu.memory_space<vmem>>, vector<1x1x1x8xf32>
    %375 = vector.shape_cast %374 : vector<1x1x1x8xf32> to vector<1x8xf32>
    %376 = vector.broadcast %375 : vector<1x8xf32> to vector<16x8xf32>
    %377 = arith.addf %373, %376 : vector<16x8xf32>
    %378 = vector.shape_cast %377 : vector<16x8xf32> to vector<2x8x8xf32>
    %c1_269 = arith.constant 1 : index
    %c1_270 = arith.constant 1 : index
    %c0_271 = arith.constant 0 : index
    %c0_272 = arith.constant 0 : index
    %379 = vector.load %arg12[%c1_269, %c1_270, %c0_271, %c0_272] : memref<2x4x32x8xf32, #tpu.memory_space<vmem>>, vector<1x1x32x8xf32>
    %380 = vector.shape_cast %379 : vector<1x1x32x8xf32> to vector<32x8xf32>
    %cst_273 = arith.constant dense<0.000000e+00> : vector<16x8xf32>
    %381 = tpu.matmul %316, %380, %cst_273 {dimension_numbers = #tpu.dot_dimension_numbers<[1], [0], [0], [1], [0, 0, 1, 1], [], []>} : vector<16x32xf32>, vector<32x8xf32>, vector<16x8xf32> -> vector<16x8xf32>
    %c1_274 = arith.constant 1 : index
    %c1_275 = arith.constant 1 : index
    %c0_276 = arith.constant 0 : index
    %c0_277 = arith.constant 0 : index
    %382 = vector.load %arg13[%c1_274, %c1_275, %c0_276, %c0_277] : memref<2x4x1x8xf32, #tpu.memory_space<vmem>>, vector<1x1x1x8xf32>
    %383 = vector.shape_cast %382 : vector<1x1x1x8xf32> to vector<1x8xf32>
    %384 = vector.broadcast %383 : vector<1x8xf32> to vector<16x8xf32>
    %385 = arith.addf %381, %384 : vector<16x8xf32>
    %386 = vector.shape_cast %385 : vector<16x8xf32> to vector<2x8x8xf32>
    "tpu.trace_start"() <{level = 10 : i32, message = "bqd,bkd->bqk"}> : () -> ()
    %cst_278 = arith.constant dense<0.000000e+00> : vector<2x8x8xf32>
    %387 = tpu.matmul %370, %378, %cst_278 {dimension_numbers = #tpu.dot_dimension_numbers<[2], [2], [1], [1], [0, 0, 0, 1, 1, 1], [0], [0]>} : vector<2x8x8xf32>, vector<2x8x8xf32>, vector<2x8x8xf32> -> vector<2x8x8xf32>
    "tpu.trace_stop"() : () -> ()
    %cst_279 = arith.constant 0.353553385 : f32
    %388 = vector.broadcast %cst_279 : f32 to vector<2x8x8xf32>
    %389 = arith.mulf %387, %388 : vector<2x8x8xf32>
    %390 = vector.broadcast %54 : vector<2x1x8xf32> to vector<2x8x8xf32>
    %391 = arith.addf %389, %390 : vector<2x8x8xf32>
    %cst_280 = arith.constant dense<0xFF800000> : vector<2x8xf32>
    %392 = vector.multi_reduction <maximumf>, %391, %cst_280 [2] : vector<2x8x8xf32> to vector<2x8xf32>
    %393 = vector.shape_cast %392 : vector<2x8xf32> to vector<2x8x1xf32>
    %394 = vector.broadcast %393 : vector<2x8x1xf32> to vector<2x8x8xf32>
    %395 = arith.subf %391, %394 : vector<2x8x8xf32>
    %396 = math.exp %395 : vector<2x8x8xf32>
    %cst_281 = arith.constant dense<0.000000e+00> : vector<2x8xf32>
    %397 = vector.multi_reduction <add>, %396, %cst_281 [2] : vector<2x8x8xf32> to vector<2x8xf32>
    %398 = vector.shape_cast %397 : vector<2x8xf32> to vector<2x8x1xf32>
    %399 = tpu.reciprocal %398 {approx = true} : vector<2x8x1xf32> -> vector<2x8x1xf32>
    %400 = vector.broadcast %399 : vector<2x8x1xf32> to vector<2x8x8xf32>
    %401 = arith.mulf %396, %400 : vector<2x8x8xf32>
    "tpu.trace_start"() <{level = 10 : i32, message = "bqk,bkd->bqd"}> : () -> ()
    %cst_282 = arith.constant dense<0.000000e+00> : vector<2x8x8xf32>
    %402 = tpu.matmul %401, %386, %cst_282 {dimension_numbers = #tpu.dot_dimension_numbers<[2], [1], [1], [2], [0, 0, 0, 1, 1, 2], [0], [0]>} : vector<2x8x8xf32>, vector<2x8x8xf32>, vector<2x8x8xf32> -> vector<2x8x8xf32>
    "tpu.trace_stop"() : () -> ()
    %403 = vector.shape_cast %402 : vector<2x8x8xf32> to vector<16x8xf32>
    %c1_283 = arith.constant 1 : index
    %c1_284 = arith.constant 1 : index
    %c0_285 = arith.constant 0 : index
    %c0_286 = arith.constant 0 : index
    %404 = vector.load %arg14[%c1_283, %c1_284, %c0_285, %c0_286] : memref<2x4x8x32xf32, #tpu.memory_space<vmem>>, vector<1x1x8x32xf32>
    %405 = vector.shape_cast %404 : vector<1x1x8x32xf32> to vector<8x32xf32>
    %cst_287 = arith.constant dense<0.000000e+00> : vector<16x32xf32>
    %406 = tpu.matmul %403, %405, %cst_287 {dimension_numbers = #tpu.dot_dimension_numbers<[1], [0], [0], [1], [0, 0, 1, 1], [], []>} : vector<16x8xf32>, vector<8x32xf32>, vector<16x32xf32> -> vector<16x32xf32>
    %407 = arith.addf %362, %406 : vector<16x32xf32>
    %c1_288 = arith.constant 1 : index
    %c2_289 = arith.constant 2 : index
    %c0_290 = arith.constant 0 : index
    %c0_291 = arith.constant 0 : index
    %408 = vector.load %arg8[%c1_288, %c2_289, %c0_290, %c0_291] : memref<2x4x32x8xf32, #tpu.memory_space<vmem>>, vector<1x1x32x8xf32>
    %409 = vector.shape_cast %408 : vector<1x1x32x8xf32> to vector<32x8xf32>
    %cst_292 = arith.constant dense<0.000000e+00> : vector<16x8xf32>
    %410 = tpu.matmul %316, %409, %cst_292 {dimension_numbers = #tpu.dot_dimension_numbers<[1], [0], [0], [1], [0, 0, 1, 1], [], []>} : vector<16x32xf32>, vector<32x8xf32>, vector<16x8xf32> -> vector<16x8xf32>
    %c1_293 = arith.constant 1 : index
    %c2_294 = arith.constant 2 : index
    %c0_295 = arith.constant 0 : index
    %c0_296 = arith.constant 0 : index
    %411 = vector.load %arg9[%c1_293, %c2_294, %c0_295, %c0_296] : memref<2x4x1x8xf32, #tpu.memory_space<vmem>>, vector<1x1x1x8xf32>
    %412 = vector.shape_cast %411 : vector<1x1x1x8xf32> to vector<1x8xf32>
    %413 = vector.broadcast %412 : vector<1x8xf32> to vector<16x8xf32>
    %414 = arith.addf %410, %413 : vector<16x8xf32>
    %415 = vector.shape_cast %414 : vector<16x8xf32> to vector<2x8x8xf32>
    %c1_297 = arith.constant 1 : index
    %c2_298 = arith.constant 2 : index
    %c0_299 = arith.constant 0 : index
    %c0_300 = arith.constant 0 : index
    %416 = vector.load %arg10[%c1_297, %c2_298, %c0_299, %c0_300] : memref<2x4x32x8xf32, #tpu.memory_space<vmem>>, vector<1x1x32x8xf32>
    %417 = vector.shape_cast %416 : vector<1x1x32x8xf32> to vector<32x8xf32>
    %cst_301 = arith.constant dense<0.000000e+00> : vector<16x8xf32>
    %418 = tpu.matmul %316, %417, %cst_301 {dimension_numbers = #tpu.dot_dimension_numbers<[1], [0], [0], [1], [0, 0, 1, 1], [], []>} : vector<16x32xf32>, vector<32x8xf32>, vector<16x8xf32> -> vector<16x8xf32>
    %c1_302 = arith.constant 1 : index
    %c2_303 = arith.constant 2 : index
    %c0_304 = arith.constant 0 : index
    %c0_305 = arith.constant 0 : index
    %419 = vector.load %arg11[%c1_302, %c2_303, %c0_304, %c0_305] : memref<2x4x1x8xf32, #tpu.memory_space<vmem>>, vector<1x1x1x8xf32>
    %420 = vector.shape_cast %419 : vector<1x1x1x8xf32> to vector<1x8xf32>
    %421 = vector.broadcast %420 : vector<1x8xf32> to vector<16x8xf32>
    %422 = arith.addf %418, %421 : vector<16x8xf32>
    %423 = vector.shape_cast %422 : vector<16x8xf32> to vector<2x8x8xf32>
    %c1_306 = arith.constant 1 : index
    %c2_307 = arith.constant 2 : index
    %c0_308 = arith.constant 0 : index
    %c0_309 = arith.constant 0 : index
    %424 = vector.load %arg12[%c1_306, %c2_307, %c0_308, %c0_309] : memref<2x4x32x8xf32, #tpu.memory_space<vmem>>, vector<1x1x32x8xf32>
    %425 = vector.shape_cast %424 : vector<1x1x32x8xf32> to vector<32x8xf32>
    %cst_310 = arith.constant dense<0.000000e+00> : vector<16x8xf32>
    %426 = tpu.matmul %316, %425, %cst_310 {dimension_numbers = #tpu.dot_dimension_numbers<[1], [0], [0], [1], [0, 0, 1, 1], [], []>} : vector<16x32xf32>, vector<32x8xf32>, vector<16x8xf32> -> vector<16x8xf32>
    %c1_311 = arith.constant 1 : index
    %c2_312 = arith.constant 2 : index
    %c0_313 = arith.constant 0 : index
    %c0_314 = arith.constant 0 : index
    %427 = vector.load %arg13[%c1_311, %c2_312, %c0_313, %c0_314] : memref<2x4x1x8xf32, #tpu.memory_space<vmem>>, vector<1x1x1x8xf32>
    %428 = vector.shape_cast %427 : vector<1x1x1x8xf32> to vector<1x8xf32>
    %429 = vector.broadcast %428 : vector<1x8xf32> to vector<16x8xf32>
    %430 = arith.addf %426, %429 : vector<16x8xf32>
    %431 = vector.shape_cast %430 : vector<16x8xf32> to vector<2x8x8xf32>
    "tpu.trace_start"() <{level = 10 : i32, message = "bqd,bkd->bqk"}> : () -> ()
    %cst_315 = arith.constant dense<0.000000e+00> : vector<2x8x8xf32>
    %432 = tpu.matmul %415, %423, %cst_315 {dimension_numbers = #tpu.dot_dimension_numbers<[2], [2], [1], [1], [0, 0, 0, 1, 1, 1], [0], [0]>} : vector<2x8x8xf32>, vector<2x8x8xf32>, vector<2x8x8xf32> -> vector<2x8x8xf32>
    "tpu.trace_stop"() : () -> ()
    %cst_316 = arith.constant 0.353553385 : f32
    %433 = vector.broadcast %cst_316 : f32 to vector<2x8x8xf32>
    %434 = arith.mulf %432, %433 : vector<2x8x8xf32>
    %435 = vector.broadcast %54 : vector<2x1x8xf32> to vector<2x8x8xf32>
    %436 = arith.addf %434, %435 : vector<2x8x8xf32>
    %cst_317 = arith.constant dense<0xFF800000> : vector<2x8xf32>
    %437 = vector.multi_reduction <maximumf>, %436, %cst_317 [2] : vector<2x8x8xf32> to vector<2x8xf32>
    %438 = vector.shape_cast %437 : vector<2x8xf32> to vector<2x8x1xf32>
    %439 = vector.broadcast %438 : vector<2x8x1xf32> to vector<2x8x8xf32>
    %440 = arith.subf %436, %439 : vector<2x8x8xf32>
    %441 = math.exp %440 : vector<2x8x8xf32>
    %cst_318 = arith.constant dense<0.000000e+00> : vector<2x8xf32>
    %442 = vector.multi_reduction <add>, %441, %cst_318 [2] : vector<2x8x8xf32> to vector<2x8xf32>
    %443 = vector.shape_cast %442 : vector<2x8xf32> to vector<2x8x1xf32>
    %444 = tpu.reciprocal %443 {approx = true} : vector<2x8x1xf32> -> vector<2x8x1xf32>
    %445 = vector.broadcast %444 : vector<2x8x1xf32> to vector<2x8x8xf32>
    %446 = arith.mulf %441, %445 : vector<2x8x8xf32>
    "tpu.trace_start"() <{level = 10 : i32, message = "bqk,bkd->bqd"}> : () -> ()
    %cst_319 = arith.constant dense<0.000000e+00> : vector<2x8x8xf32>
    %447 = tpu.matmul %446, %431, %cst_319 {dimension_numbers = #tpu.dot_dimension_numbers<[2], [1], [1], [2], [0, 0, 0, 1, 1, 2], [0], [0]>} : vector<2x8x8xf32>, vector<2x8x8xf32>, vector<2x8x8xf32> -> vector<2x8x8xf32>
    "tpu.trace_stop"() : () -> ()
    %448 = vector.shape_cast %447 : vector<2x8x8xf32> to vector<16x8xf32>
    %c1_320 = arith.constant 1 : index
    %c2_321 = arith.constant 2 : index
    %c0_322 = arith.constant 0 : index
    %c0_323 = arith.constant 0 : index
    %449 = vector.load %arg14[%c1_320, %c2_321, %c0_322, %c0_323] : memref<2x4x8x32xf32, #tpu.memory_space<vmem>>, vector<1x1x8x32xf32>
    %450 = vector.shape_cast %449 : vector<1x1x8x32xf32> to vector<8x32xf32>
    %cst_324 = arith.constant dense<0.000000e+00> : vector<16x32xf32>
    %451 = tpu.matmul %448, %450, %cst_324 {dimension_numbers = #tpu.dot_dimension_numbers<[1], [0], [0], [1], [0, 0, 1, 1], [], []>} : vector<16x8xf32>, vector<8x32xf32>, vector<16x32xf32> -> vector<16x32xf32>
    %452 = arith.addf %407, %451 : vector<16x32xf32>
    %c1_325 = arith.constant 1 : index
    %c3_326 = arith.constant 3 : index
    %c0_327 = arith.constant 0 : index
    %c0_328 = arith.constant 0 : index
    %453 = vector.load %arg8[%c1_325, %c3_326, %c0_327, %c0_328] : memref<2x4x32x8xf32, #tpu.memory_space<vmem>>, vector<1x1x32x8xf32>
    %454 = vector.shape_cast %453 : vector<1x1x32x8xf32> to vector<32x8xf32>
    %cst_329 = arith.constant dense<0.000000e+00> : vector<16x8xf32>
    %455 = tpu.matmul %316, %454, %cst_329 {dimension_numbers = #tpu.dot_dimension_numbers<[1], [0], [0], [1], [0, 0, 1, 1], [], []>} : vector<16x32xf32>, vector<32x8xf32>, vector<16x8xf32> -> vector<16x8xf32>
    %c1_330 = arith.constant 1 : index
    %c3_331 = arith.constant 3 : index
    %c0_332 = arith.constant 0 : index
    %c0_333 = arith.constant 0 : index
    %456 = vector.load %arg9[%c1_330, %c3_331, %c0_332, %c0_333] : memref<2x4x1x8xf32, #tpu.memory_space<vmem>>, vector<1x1x1x8xf32>
    %457 = vector.shape_cast %456 : vector<1x1x1x8xf32> to vector<1x8xf32>
    %458 = vector.broadcast %457 : vector<1x8xf32> to vector<16x8xf32>
    %459 = arith.addf %455, %458 : vector<16x8xf32>
    %460 = vector.shape_cast %459 : vector<16x8xf32> to vector<2x8x8xf32>
    %c1_334 = arith.constant 1 : index
    %c3_335 = arith.constant 3 : index
    %c0_336 = arith.constant 0 : index
    %c0_337 = arith.constant 0 : index
    %461 = vector.load %arg10[%c1_334, %c3_335, %c0_336, %c0_337] : memref<2x4x32x8xf32, #tpu.memory_space<vmem>>, vector<1x1x32x8xf32>
    %462 = vector.shape_cast %461 : vector<1x1x32x8xf32> to vector<32x8xf32>
    %cst_338 = arith.constant dense<0.000000e+00> : vector<16x8xf32>
    %463 = tpu.matmul %316, %462, %cst_338 {dimension_numbers = #tpu.dot_dimension_numbers<[1], [0], [0], [1], [0, 0, 1, 1], [], []>} : vector<16x32xf32>, vector<32x8xf32>, vector<16x8xf32> -> vector<16x8xf32>
    %c1_339 = arith.constant 1 : index
    %c3_340 = arith.constant 3 : index
    %c0_341 = arith.constant 0 : index
    %c0_342 = arith.constant 0 : index
    %464 = vector.load %arg11[%c1_339, %c3_340, %c0_341, %c0_342] : memref<2x4x1x8xf32, #tpu.memory_space<vmem>>, vector<1x1x1x8xf32>
    %465 = vector.shape_cast %464 : vector<1x1x1x8xf32> to vector<1x8xf32>
    %466 = vector.broadcast %465 : vector<1x8xf32> to vector<16x8xf32>
    %467 = arith.addf %463, %466 : vector<16x8xf32>
    %468 = vector.shape_cast %467 : vector<16x8xf32> to vector<2x8x8xf32>
    %c1_343 = arith.constant 1 : index
    %c3_344 = arith.constant 3 : index
    %c0_345 = arith.constant 0 : index
    %c0_346 = arith.constant 0 : index
    %469 = vector.load %arg12[%c1_343, %c3_344, %c0_345, %c0_346] : memref<2x4x32x8xf32, #tpu.memory_space<vmem>>, vector<1x1x32x8xf32>
    %470 = vector.shape_cast %469 : vector<1x1x32x8xf32> to vector<32x8xf32>
    %cst_347 = arith.constant dense<0.000000e+00> : vector<16x8xf32>
    %471 = tpu.matmul %316, %470, %cst_347 {dimension_numbers = #tpu.dot_dimension_numbers<[1], [0], [0], [1], [0, 0, 1, 1], [], []>} : vector<16x32xf32>, vector<32x8xf32>, vector<16x8xf32> -> vector<16x8xf32>
    %c1_348 = arith.constant 1 : index
    %c3_349 = arith.constant 3 : index
    %c0_350 = arith.constant 0 : index
    %c0_351 = arith.constant 0 : index
    %472 = vector.load %arg13[%c1_348, %c3_349, %c0_350, %c0_351] : memref<2x4x1x8xf32, #tpu.memory_space<vmem>>, vector<1x1x1x8xf32>
    %473 = vector.shape_cast %472 : vector<1x1x1x8xf32> to vector<1x8xf32>
    %474 = vector.broadcast %473 : vector<1x8xf32> to vector<16x8xf32>
    %475 = arith.addf %471, %474 : vector<16x8xf32>
    %476 = vector.shape_cast %475 : vector<16x8xf32> to vector<2x8x8xf32>
    "tpu.trace_start"() <{level = 10 : i32, message = "bqd,bkd->bqk"}> : () -> ()
    %cst_352 = arith.constant dense<0.000000e+00> : vector<2x8x8xf32>
    %477 = tpu.matmul %460, %468, %cst_352 {dimension_numbers = #tpu.dot_dimension_numbers<[2], [2], [1], [1], [0, 0, 0, 1, 1, 1], [0], [0]>} : vector<2x8x8xf32>, vector<2x8x8xf32>, vector<2x8x8xf32> -> vector<2x8x8xf32>
    "tpu.trace_stop"() : () -> ()
    %cst_353 = arith.constant 0.353553385 : f32
    %478 = vector.broadcast %cst_353 : f32 to vector<2x8x8xf32>
    %479 = arith.mulf %477, %478 : vector<2x8x8xf32>
    %480 = vector.broadcast %54 : vector<2x1x8xf32> to vector<2x8x8xf32>
    %481 = arith.addf %479, %480 : vector<2x8x8xf32>
    %cst_354 = arith.constant dense<0xFF800000> : vector<2x8xf32>
    %482 = vector.multi_reduction <maximumf>, %481, %cst_354 [2] : vector<2x8x8xf32> to vector<2x8xf32>
    %483 = vector.shape_cast %482 : vector<2x8xf32> to vector<2x8x1xf32>
    %484 = vector.broadcast %483 : vector<2x8x1xf32> to vector<2x8x8xf32>
    %485 = arith.subf %481, %484 : vector<2x8x8xf32>
    %486 = math.exp %485 : vector<2x8x8xf32>
    %cst_355 = arith.constant dense<0.000000e+00> : vector<2x8xf32>
    %487 = vector.multi_reduction <add>, %486, %cst_355 [2] : vector<2x8x8xf32> to vector<2x8xf32>
    %488 = vector.shape_cast %487 : vector<2x8xf32> to vector<2x8x1xf32>
    %489 = tpu.reciprocal %488 {approx = true} : vector<2x8x1xf32> -> vector<2x8x1xf32>
    %490 = vector.broadcast %489 : vector<2x8x1xf32> to vector<2x8x8xf32>
    %491 = arith.mulf %486, %490 : vector<2x8x8xf32>
    "tpu.trace_start"() <{level = 10 : i32, message = "bqk,bkd->bqd"}> : () -> ()
    %cst_356 = arith.constant dense<0.000000e+00> : vector<2x8x8xf32>
    %492 = tpu.matmul %491, %476, %cst_356 {dimension_numbers = #tpu.dot_dimension_numbers<[2], [1], [1], [2], [0, 0, 0, 1, 1, 2], [0], [0]>} : vector<2x8x8xf32>, vector<2x8x8xf32>, vector<2x8x8xf32> -> vector<2x8x8xf32>
    "tpu.trace_stop"() : () -> ()
    %493 = vector.shape_cast %492 : vector<2x8x8xf32> to vector<16x8xf32>
    %c1_357 = arith.constant 1 : index
    %c3_358 = arith.constant 3 : index
    %c0_359 = arith.constant 0 : index
    %c0_360 = arith.constant 0 : index
    %494 = vector.load %arg14[%c1_357, %c3_358, %c0_359, %c0_360] : memref<2x4x8x32xf32, #tpu.memory_space<vmem>>, vector<1x1x8x32xf32>
    %495 = vector.shape_cast %494 : vector<1x1x8x32xf32> to vector<8x32xf32>
    %cst_361 = arith.constant dense<0.000000e+00> : vector<16x32xf32>
    %496 = tpu.matmul %493, %495, %cst_361 {dimension_numbers = #tpu.dot_dimension_numbers<[1], [0], [0], [1], [0, 0, 1, 1], [], []>} : vector<16x8xf32>, vector<8x32xf32>, vector<16x32xf32> -> vector<16x32xf32>
    %497 = arith.addf %452, %496 : vector<16x32xf32>
    %c1_362 = arith.constant 1 : index
    %c0_363 = arith.constant 0 : index
    %c0_364 = arith.constant 0 : index
    %498 = vector.load %arg15[%c1_362, %c0_363, %c0_364] : memref<2x1x32xf32, #tpu.memory_space<vmem>>, vector<1x1x32xf32>
    %499 = vector.shape_cast %498 : vector<1x1x32xf32> to vector<1x32xf32>
    %500 = vector.broadcast %499 : vector<1x32xf32> to vector<16x32xf32>
    %501 = arith.addf %497, %500 : vector<16x32xf32>
    %502 = arith.addf %501, %316 : vector<16x32xf32>
    %c1_365 = arith.constant 1 : index
    %c0_366 = arith.constant 0 : index
    %c0_367 = arith.constant 0 : index
    %503 = vector.load %arg16[%c1_365, %c0_366, %c0_367] : memref<2x1x32xf32, #tpu.memory_space<vmem>>, vector<1x1x32xf32>
    %504 = vector.shape_cast %503 : vector<1x1x32xf32> to vector<1x32xf32>
    %c1_368 = arith.constant 1 : index
    %c0_369 = arith.constant 0 : index
    %c0_370 = arith.constant 0 : index
    %505 = vector.load %arg17[%c1_368, %c0_369, %c0_370] : memref<2x1x32xf32, #tpu.memory_space<vmem>>, vector<1x1x32xf32>
    %506 = vector.shape_cast %505 : vector<1x1x32xf32> to vector<1x32xf32>
    %cst_371 = arith.constant dense<0.000000e+00> : vector<16xf32>
    %507 = vector.multi_reduction <add>, %502, %cst_371 [1] : vector<16x32xf32> to vector<16xf32>
    %508 = vector.shape_cast %507 : vector<16xf32> to vector<16x1xf32>
    %cst_372 = arith.constant 3.200000e+01 : f32
    %509 = vector.broadcast %cst_372 : f32 to vector<16x1xf32>
    %510 = arith.divf %508, %509 : vector<16x1xf32>
    %511 = vector.broadcast %510 : vector<16x1xf32> to vector<16x32xf32>
    %512 = arith.subf %502, %511 : vector<16x32xf32>
    %513 = arith.mulf %512, %512 : vector<16x32xf32>
    %cst_373 = arith.constant dense<0.000000e+00> : vector<16xf32>
    %514 = vector.multi_reduction <add>, %513, %cst_373 [1] : vector<16x32xf32> to vector<16xf32>
    %515 = vector.shape_cast %514 : vector<16xf32> to vector<16x1xf32>
    %cst_374 = arith.constant 3.200000e+01 : f32
    %516 = vector.broadcast %cst_374 : f32 to vector<16x1xf32>
    %517 = arith.divf %515, %516 : vector<16x1xf32>
    %cst_375 = arith.constant 9.99999996E-13 : f32
    %518 = vector.broadcast %cst_375 : f32 to vector<16x1xf32>
    %519 = arith.addf %517, %518 : vector<16x1xf32>
    %520 = math.rsqrt %519 : vector<16x1xf32>
    %521 = vector.broadcast %520 : vector<16x1xf32> to vector<16x32xf32>
    %522 = arith.mulf %512, %521 : vector<16x32xf32>
    %523 = vector.broadcast %504 : vector<1x32xf32> to vector<16x32xf32>
    %524 = arith.mulf %522, %523 : vector<16x32xf32>
    %525 = vector.broadcast %506 : vector<1x32xf32> to vector<16x32xf32>
    %526 = arith.addf %524, %525 : vector<16x32xf32>
    %c1_376 = arith.constant 1 : index
    %c0_377 = arith.constant 0 : index
    %c0_378 = arith.constant 0 : index
    %527 = vector.load %arg18[%c1_376, %c0_377, %c0_378] : memref<2x32x64xf32, #tpu.memory_space<vmem>>, vector<1x32x64xf32>
    %528 = vector.shape_cast %527 : vector<1x32x64xf32> to vector<32x64xf32>
    %cst_379 = arith.constant dense<0.000000e+00> : vector<16x64xf32>
    %529 = tpu.matmul %526, %528, %cst_379 {dimension_numbers = #tpu.dot_dimension_numbers<[1], [0], [0], [1], [0, 0, 1, 1], [], []>} : vector<16x32xf32>, vector<32x64xf32>, vector<16x64xf32> -> vector<16x64xf32>
    %c1_380 = arith.constant 1 : index
    %c0_381 = arith.constant 0 : index
    %c0_382 = arith.constant 0 : index
    %530 = vector.load %arg19[%c1_380, %c0_381, %c0_382] : memref<2x1x64xf32, #tpu.memory_space<vmem>>, vector<1x1x64xf32>
    %531 = vector.shape_cast %530 : vector<1x1x64xf32> to vector<1x64xf32>
    %532 = vector.broadcast %531 : vector<1x64xf32> to vector<16x64xf32>
    %533 = arith.addf %529, %532 : vector<16x64xf32>
    %534 = arith.mulf %533, %533 : vector<16x64xf32>
    %535 = arith.mulf %533, %534 : vector<16x64xf32>
    %cst_383 = arith.constant 4.471500e-02 : f32
    %536 = vector.broadcast %cst_383 : f32 to vector<16x64xf32>
    %537 = arith.mulf %536, %535 : vector<16x64xf32>
    %538 = arith.addf %533, %537 : vector<16x64xf32>
    %cst_384 = arith.constant 0.797884583 : f32
    %539 = vector.broadcast %cst_384 : f32 to vector<16x64xf32>
    %540 = arith.mulf %539, %538 : vector<16x64xf32>
    %541 = math.tanh %540 : vector<16x64xf32>
    %cst_385 = arith.constant 1.000000e+00 : f32
    %542 = vector.broadcast %cst_385 : f32 to vector<16x64xf32>
    %543 = arith.addf %542, %541 : vector<16x64xf32>
    %cst_386 = arith.constant 5.000000e-01 : f32
    %544 = vector.broadcast %cst_386 : f32 to vector<16x64xf32>
    %545 = arith.mulf %544, %543 : vector<16x64xf32>
    %546 = arith.mulf %533, %545 : vector<16x64xf32>
    %c1_387 = arith.constant 1 : index
    %c0_388 = arith.constant 0 : index
    %c0_389 = arith.constant 0 : index
    %547 = vector.load %arg20[%c1_387, %c0_388, %c0_389] : memref<2x64x32xf32, #tpu.memory_space<vmem>>, vector<1x64x32xf32>
    %548 = vector.shape_cast %547 : vector<1x64x32xf32> to vector<64x32xf32>
    %cst_390 = arith.constant dense<0.000000e+00> : vector<16x32xf32>
    %549 = tpu.matmul %546, %548, %cst_390 {dimension_numbers = #tpu.dot_dimension_numbers<[1], [0], [0], [1], [0, 0, 1, 1], [], []>} : vector<16x64xf32>, vector<64x32xf32>, vector<16x32xf32> -> vector<16x32xf32>
    %c1_391 = arith.constant 1 : index
    %c0_392 = arith.constant 0 : index
    %c0_393 = arith.constant 0 : index
    %550 = vector.load %arg21[%c1_391, %c0_392, %c0_393] : memref<2x1x32xf32, #tpu.memory_space<vmem>>, vector<1x1x32xf32>
    %551 = vector.shape_cast %550 : vector<1x1x32xf32> to vector<1x32xf32>
    %552 = vector.broadcast %551 : vector<1x32xf32> to vector<16x32xf32>
    %553 = arith.addf %549, %552 : vector<16x32xf32>
    %554 = arith.addf %553, %526 : vector<16x32xf32>
    %c1_394 = arith.constant 1 : index
    %c0_395 = arith.constant 0 : index
    %c0_396 = arith.constant 0 : index
    %555 = vector.load %arg22[%c1_394, %c0_395, %c0_396] : memref<2x1x32xf32, #tpu.memory_space<vmem>>, vector<1x1x32xf32>
    %556 = vector.shape_cast %555 : vector<1x1x32xf32> to vector<1x32xf32>
    %c1_397 = arith.constant 1 : index
    %c0_398 = arith.constant 0 : index
    %c0_399 = arith.constant 0 : index
    %557 = vector.load %arg23[%c1_397, %c0_398, %c0_399] : memref<2x1x32xf32, #tpu.memory_space<vmem>>, vector<1x1x32xf32>
    %558 = vector.shape_cast %557 : vector<1x1x32xf32> to vector<1x32xf32>
    %cst_400 = arith.constant dense<0.000000e+00> : vector<16xf32>
    %559 = vector.multi_reduction <add>, %554, %cst_400 [1] : vector<16x32xf32> to vector<16xf32>
    %560 = vector.shape_cast %559 : vector<16xf32> to vector<16x1xf32>
    %cst_401 = arith.constant 3.200000e+01 : f32
    %561 = vector.broadcast %cst_401 : f32 to vector<16x1xf32>
    %562 = arith.divf %560, %561 : vector<16x1xf32>
    %563 = vector.broadcast %562 : vector<16x1xf32> to vector<16x32xf32>
    %564 = arith.subf %554, %563 : vector<16x32xf32>
    %565 = arith.mulf %564, %564 : vector<16x32xf32>
    %cst_402 = arith.constant dense<0.000000e+00> : vector<16xf32>
    %566 = vector.multi_reduction <add>, %565, %cst_402 [1] : vector<16x32xf32> to vector<16xf32>
    %567 = vector.shape_cast %566 : vector<16xf32> to vector<16x1xf32>
    %cst_403 = arith.constant 3.200000e+01 : f32
    %568 = vector.broadcast %cst_403 : f32 to vector<16x1xf32>
    %569 = arith.divf %567, %568 : vector<16x1xf32>
    %cst_404 = arith.constant 9.99999996E-13 : f32
    %570 = vector.broadcast %cst_404 : f32 to vector<16x1xf32>
    %571 = arith.addf %569, %570 : vector<16x1xf32>
    %572 = math.rsqrt %571 : vector<16x1xf32>
    %573 = vector.broadcast %572 : vector<16x1xf32> to vector<16x32xf32>
    %574 = arith.mulf %564, %573 : vector<16x32xf32>
    %575 = vector.broadcast %556 : vector<1x32xf32> to vector<16x32xf32>
    %576 = arith.mulf %574, %575 : vector<16x32xf32>
    %577 = vector.broadcast %558 : vector<1x32xf32> to vector<16x32xf32>
    %578 = arith.addf %576, %577 : vector<16x32xf32>
    %579 = vector.shape_cast %578 : vector<16x32xf32> to vector<2x8x32xf32>
    %580 = vector.extract_strided_slice %579 {offsets = [0, 0, 0], sizes = [2, 1, 32], strides = [1, 1, 1]} : vector<2x8x32xf32> to vector<2x1x32xf32>
    %581 = vector.shape_cast %580 : vector<2x1x32xf32> to vector<2x32xf32>
    %c0_405 = arith.constant 0 : index
    %c0_406 = arith.constant 0 : index
    %582 = vector.load %arg24[%c0_405, %c0_406] : memref<32x32xf32, #tpu.memory_space<vmem>>, vector<32x32xf32>
    %cst_407 = arith.constant dense<0.000000e+00> : vector<2x32xf32>
    %583 = tpu.matmul %581, %582, %cst_407 {dimension_numbers = #tpu.dot_dimension_numbers<[1], [0], [0], [1], [0, 0, 1, 1], [], []>} : vector<2x32xf32>, vector<32x32xf32>, vector<2x32xf32> -> vector<2x32xf32>
    %c0_408 = arith.constant 0 : index
    %c0_409 = arith.constant 0 : index
    %584 = vector.load %arg25[%c0_408, %c0_409] : memref<1x32xf32, #tpu.memory_space<vmem>>, vector<1x32xf32>
    %585 = vector.broadcast %584 : vector<1x32xf32> to vector<2x32xf32>
    %586 = arith.addf %583, %585 : vector<2x32xf32>
    %587 = math.tanh %586 : vector<2x32xf32>
    %c0_410 = arith.constant 0 : index
    %c0_411 = arith.constant 0 : index
    %588 = vector.load %arg26[%c0_410, %c0_411] : memref<2x32xf32, #tpu.memory_space<vmem>>, vector<2x32xf32>
    tpu.vector_store %arg26[%c0_410, %c0_411], %587 {strides = array<i32>} : memref<2x32xf32, #tpu.memory_space<vmem>>, vector<2x32xf32>,
    return
  }
}

</mosaic_0001>

<bundles_post_ra>
// kernel: encoder_forward.1
= control target key start
LH: loop header
LB: loop body
LE: loop exit
PB: predicated region body
PF: predicated region fallthrough
CT: control target
= control target key end

     0   :  { %s9105_s0 = inlined_call_operand.vmem [shape: s32[16,1], index: 0, kind: input, shape index: {}]   ;;  %s9106_s1 = inlined_call_operand.vmem [shape: s32[16,1], index: 1, kind: input, shape index: {}]   ;;  %s9107_s2 = inlined_call_operand.vmem [shape: f32[2,8], index: 2, kind: input, shape index: {}]   ;;  %s9108_s3 = inlined_call_operand.vmem [shape: f32[128,32], index: 3, kind: input, shape index: {}]   ;;  %s9109_s4 = inlined_call_operand.vmem [shape: f32[32,32], index: 4, kind: input, shape index: {}]   ;;  %s9110_s5 = inlined_call_operand.vmem [shape: f32[2,32], index: 5, kind: input, shape index: {}]   ;;  %s9111_s6 = inlined_call_operand.vmem [shape: f32[1,32], index: 6, kind: input, shape index: {}]   ;;  %s9112_s7 = inlined_call_operand.vmem [shape: f32[1,32], index: 7, kind: input, shape index: {}]   ;;  %s9113_s8 = inlined_call_operand.vmem [shape: f32[2,4,32,8], index: 8, kind: input, shape index: {}]   ;;  %s9114_s9 = inlined_call_operand.vmem [shape: f32[2,4,1,8], index: 9, kind: input, shape index: {}]   ;;  %s9115_s10 = inlined_call_operand.vmem [shape: f32[2,4,32,8], index: 10, kind: input, shape index: {}]   ;;  %s9116_s11 = inlined_call_operand.vmem [shape: f32[2,4,1,8], index: 11, kind: input, shape index: {}]   ;;  %s9117_s12 = inlined_call_operand.vmem [shape: f32[2,4,32,8], index: 12, kind: input, shape index: {}]   ;;  %s9118_s13 = inlined_call_operand.vmem [shape: f32[2,4,1,8], index: 13, kind: input, shape index: {}]   ;;  %s9119_s14 = inlined_call_operand.vmem [shape: f32[2,4,8,32], index: 14, kind: input, shape index: {}]   ;;  %s9120_s15 = inlined_call_operand.vmem [shape: f32[2,1,32], index: 15, kind: input, shape index: {}]   ;;  %s9121_s16 = inlined_call_operand.vmem [shape: f32[2,1,32], index: 16, kind: input, shape index: {}]   ;;  %s9122_s17 = inlined_call_operand.vmem [shape: f32[2,1,32], index: 17, kind: input, shape index: {}]   ;;  %s9123_s18 = inlined_call_operand.vmem [shape: f32[2,32,64], index: 18, kind: input, shape index: {}]   ;;  %s9124_s19 = inlined_call_operand.vmem [shape: f32[2,1,64], index: 19, kind: input, shape index: {}]   ;;  %s9125_s20 = inlined_call_operand.vmem [shape: f32[2,64,32], index: 20, kind: input, shape index: {}]   ;;  %s9126_s21 = inlined_call_operand.vmem [shape: f32[2,1,32], index: 21, kind: input, shape index: {}]   ;;  %s9127_s22 = inlined_call_operand.vmem [shape: f32[2,1,32], index: 22, kind: input, shape index: {}]   ;;  %s9128_s23 = inlined_call_operand.vmem [shape: f32[2,1,32], index: 23, kind: input, shape index: {}]   ;;  %s9129_s24 = inlined_call_operand.vmem [shape: f32[32,32], index: 24, kind: input, shape index: {}]   ;;  %s9130_s25 = inlined_call_operand.vmem [shape: f32[1,32], index: 25, kind: input, shape index: {}]   ;;  %s9131_s26 = inlined_call_operand.hbm [shape: f32[2,32], index: 26, kind: output, shape index: {}]  }
   0x1   :  { %9140 = sst [smem:[#allocation5_spill]] %s9105_s0 }
   0x2   :  { %9141 = sst [smem:[#allocation6_spill]] %s9106_s1 }
   0x3   :  { %9142 = sst [smem:[#allocation7_spill]] %s9107_s2 }
   0x4   :  { %9143 = sst [smem:[#allocation8_spill]] %s9108_s3 }
   0x5   :  { %9144 = sst [smem:[#allocation9_spill]] %s9109_s4 }
   0x6   :  { %9145 = sst [smem:[#allocation10_spill]] %s9110_s5 }
   0x7   :  { %9146 = sst [smem:[#allocation11_spill]] %s9111_s6 }
   0x8   :  { %9147 = sst [smem:[#allocation12_spill]] %s9112_s7 }
   0x9   :  { %9148 = sst [smem:[#allocation13_spill]] %s9113_s8 }
   0xa   :  { %9149 = sst [smem:[#allocation14_spill]] %s9114_s9 }
   0xb   :  { %9150 = sst [smem:[#allocation15_spill]] %s9115_s10 }
   0xc   :  { %9151 = sst [smem:[#allocation16_spill]] %s9126_s21 }
   0xd   :  { %s9152_s7 = sld [smem:[#allocation5_spill]]  ;;  %s9153_s21 = sld [smem:[#allocation8_spill]]  ;;  %v7986_v2 = vmov 0  }
   0xe   :  { %7866 = vset.pattern.permute.xlu0 %v7986_v2  ;;  %7867 = vset.pattern.permute.xlu1 %v7986_v2 }
  0x13   :  { %v84_v0 = vld [vmem:[%s9152_s7] sm:$0xff]  ;;  %v101_v3 = vld [vmem:[%s9153_s21 + $0x8] sm:$0xff]  ;;  %v102_v4 = vld [vmem:[%s9153_s21 + $0x10] sm:$0xff] }
  0x14   :  { %v100_v1 = vld [vmem:[%s9153_s21] sm:$0xff]  ;;  %v103_v5 = vld [vmem:[%s9153_s21 + $0x18] sm:$0xff]  ;;  %89 = vperm.xlu0 %7866, %v84_v0   ;;  %v85_v8 = vld [vmem:[%s9152_s7 + $0x8] sm:$0xff] }
  0x15   :  { %v7569_v6 = vpack.c.bf16 %v101_v3, %v100_v1  ;;  %v7573_v7 = vpack.c.bf16 %v103_v5, %v102_v4  ;;  %v104_v9 = vld [vmem:[%s9153_s21 + $0x20] sm:$0xff]  ;;  %v105_v10 = vld [vmem:[%s9153_s21 + $0x28] sm:$0xff]  ;;  %v106_v12 = vld [vmem:[%s9153_s21 + $0x30] sm:$0xff] }
  0x16   :  { %v7577_v11 = vpack.c.bf16 %v105_v10, %v104_v9 }
  0x17   :  { %7570 = vmatprep.subr.bf16.mxu0 %v7569_v6 }
  0x18   :  { %7572 = vmatpush3.bf16.msra.mxu0 %v7569_v6  ;;  %92 = vperm.xlu0 %7866, %v85_v8  }
  0x19   :  { %7574 = vmatprep.subr.bf16.mxu0 %v7573_v7 }
  0x1a   :  { %31 = vsyncpa [#allocation3], 0  ;;  %v107_v13 = vld [vmem:[%s9153_s21 + $0x38] sm:$0xff]  ;;  %s9154_s9 = sld [smem:[#allocation6_spill]]  ;;  %v108_v18 = vld [vmem:[%s9153_s21 + $0x40] sm:$0xff]  ;;  %v86_v31 = vlaneseq  ;;  %v7987_v34 = vmov 1.0  }
  0x1b   :  { %v7581_v17 = vpack.c.bf16 %v107_v13, %v106_v12  ;;  %v109_v19 = vld [vmem:[%s9153_s21 + $0x48] sm:$0xff]  ;;  %v110_v22 = vld [vmem:[%s9153_s21 + $0x50] sm:$0xff]  ;;  %v111_v23 = vld [vmem:[%s9153_s21 + $0x58] sm:$0xff]  ;;  %s9155_s6 = sld [smem:[#allocation10_spill]]  ;;  %s9156_s8 = sld [smem:[#allocation9_spill]]  ;;  %vm222_vm6 = vcmask 261120  }
  0x1c   :  { %7576 = vmatpush3.bf16.msra.mxu0 %v7573_v7  ;;  %v7585_v21 = vpack.c.bf16 %v109_v19, %v108_v18  ;;  %v7589_v24 = vpack.c.bf16 %v111_v23, %v110_v22  ;;  %v112_v25 = vld [vmem:[%s9153_s21 + $0x60] sm:$0xff]  ;;  %v113_v26 = vld [vmem:[%s9153_s21 + $0x68] sm:$0xff]  ;;  %v114_v28 = vld [vmem:[%s9153_s21 + $0x70] sm:$0xff]  ;;  %v87_v32 = vand.u32 127, %v86_v31  ;;  %s9157_s29 = sld [smem:[#allocation13_spill]]  ;;  %s9159_s3 = sld [smem:[#allocation11_spill]] }
  0x1d   :  { %7578 = vmatprep.subr.bf16.mxu0 %v7577_v11  ;;  %v7593_v27 = vpack.c.bf16 %v113_v26, %v112_v25  ;;  %v115_v29 = vld [vmem:[%s9153_s21 + $0x78] sm:$0xff]  ;;  %v6453_v13 = vld [vmem:[%s9117_s12 + $0x28] sm:$0xff]  ;;  %s9160_s4 = sld [smem:[#allocation12_spill]]  ;;  %vm7989_vm7 = vmmov 0   ;;  %vm556_vm8 = vcmask 64512   ;;  %s9161_s1 = sld [smem:[#allocation14_spill]] }
  0x1e   :  { %v7597_v30 = vpack.c.bf16 %v115_v29, %v114_v28  ;;  %vm3170_vm9 = vcmask 523264   ;;  %s9163_s28 = sld [smem:[#allocation16_spill]]  ;;  %vm6322_vm10 = vcmask 1041409   ;;  %vm6397_vm11 = vcmask 254976  }
  0x20   :  { %v116_v14 = vld [vmem:[%s9154_s9] sm:$0xff]  ;;  %v117_v15 = vld [vmem:[%s9154_s9 + $0x8] sm:$0xff]  ;;  %7580 = vmatpush3.bf16.msra.mxu0 %v7577_v11  ;;  %s9158_s9 = sld [smem:[#allocation15_spill]] }
  0x21   :  { %vm118_vm0 = vcmp.eq.s32.totalorder %v116_v14, 0  ;;  %vm119_vm1 = vcmp.eq.s32.totalorder %v117_v15, 0  ;;  %7582 = vmatprep.subr.bf16.mxu0 %v7581_v17  ;;  %v6415_v38 = vld [vmem:[%s9155_s6] ss:$0 sm:$0xff]  ;;  %v6416_v39 = vld [vmem:[%s9155_s6 + $0x1] ss:$0 sm:$0xff] }
  0x22   :  { %v122_v16 = vsel %vm118_vm0, 1, %v7986_v2  ;;  %v123_v20 = vsel %vm119_vm1, 1, %v7986_v2  ;;  %v217_v43 = vld [vmem:[%s9156_s8] sm:$0xff]  ;;  %v293_v62 = vld [vmem:[%s9157_s29 + $0x8] sm:$0xff]  ;;  %v294_v3 = vld [vmem:[%s9157_s29 + $0x10] sm:$0xff] }
  0x23   :  { %125 = vperm.xlu1 %7867, %v122_v16   ;;  %v292_v61 = vld [vmem:[%s9157_s29] sm:$0xff]  ;;  %v6437_v1 = vld [vmem:[%s9157_s29 + $0x28] sm:$0xff]  ;;  %v295_v4 = vld [vmem:[%s9157_s29 + $0x18] sm:$0xff] }
  0x24   :  { %7584 = vmatpush3.bf16.msra.mxu0 %v7581_v17  ;;  %v6436_v63 = vld [vmem:[%s9157_s29 + $0x20] sm:$0xff]  ;;  %v7601_v0 = vpack.c.bf16 %v293_v62, %v292_v61  ;;  %v6438_v5 = vld [vmem:[%s9157_s29 + $0x30] sm:$0xff]  ;;  %v7605_v6 = vpack.c.bf16 %v295_v4, %v294_v3  ;;  %v6439_v7 = vld [vmem:[%s9157_s29 + $0x38] sm:$0xff]  ;;  %v7990_v3 = vmov 1966171168  }
  0x25   :  { %7586 = vmatprep.subr.bf16.mxu0 %v7585_v21  ;;  %v7625_v2 = vpack.c.bf16 %v6437_v1, %v6436_v63  ;;  %v7629_v8 = vpack.c.bf16 %v6439_v7, %v6438_v5  ;;  %v6452_v11 = vld [vmem:[%s9117_s12 + $0x20] sm:$0xff]  ;;  %v271_v4 = vunpack.c.l.s4 %v7990_v3 }
  0x26   :  { %7602 = vmatprep.subr.bf16.mxu1 %v7601_v0  ;;  %v384_v9 = vld [vmem:[%s9158_s9] sm:$0xff]  ;;  %v385_v10 = vld [vmem:[%s9158_s9 + $0x8] sm:$0xff]  ;;  %v7641_v14 = vpack.c.bf16 %v6453_v13, %v6452_v11  ;;  %v386_v29 = vld [vmem:[%s9158_s9 + $0x10] sm:$0xff] }
  0x27   :  { %128 = vperm.xlu1 %7867, %v123_v20   ;;  %7604 = vmatpush3.bf16.msra.mxu1 %v7601_v0  ;;  %v7609_v12 = vpack.c.bf16 %v385_v10, %v384_v9  ;;  %v6419_v22 = vld [vmem:[%s9159_s3] ss:$0 sm:$0xff]  ;;  %v272_v7 = vunpack.c.0.s8 %v271_v4 }
  0x28   :  { %7588 = vmatpush3.bf16.msra.mxu0 %v7585_v21  ;;  %7606 = vmatprep.subr.bf16.mxu1 %v7605_v6  ;;  %v6427_v61 = vld [vmem:[%s9118_s13] ss:$0 sm:$0xff] }
  0x29   :  { %7590 = vmatprep.subr.bf16.mxu0 %v7589_v24 }
  0x2b   :  { %7608 = vmatpush3.bf16.msra.mxu1 %v7605_v6 }
  0x2c   :  { %7592 = vmatpush3.bf16.msra.mxu0 %v7589_v24  ;;  %7610 = vmatprep.subr.bf16.mxu1 %v7609_v12  ;;  %v6420_v24 = vld [vmem:[%s9160_s4] ss:$0 sm:$0xff]  ;;  %s9162_s4 = sld [smem:[#allocation7_spill]] }
  0x2d   :  { %7594 = vmatprep.subr.bf16.mxu0 %v7593_v27 }
  0x30   :  { %7596 = vmatpush3.bf16.msra.mxu0 %v7593_v27 }
  0x31   :  { %7598 = vmatprep.subr.bf16.mxu0 %v7597_v30 }
  0x32   :  { %v266_v5 = vld [vmem:[%s9162_s4] sm:$0x3] }
  0x33   :  { %v267_v6 = vsub.f32 1.0, %v266_v5 }
  0x34   :  { %7600 = vmatpush3.bf16.msra.mxu0 %v7597_v30 }
  0x35   :  { %7626 = vmatprep.subr.bf16.mxu0 %v7625_v2  ;;  %v268_v9 = vmul.f32 -1e+09, %v267_v6 }
  0x93   :  { %v90_v33 = vpop.permute.xlu0 %89 }
  0x94   :  { %vm94_vm2 = vcmp.eq.s32.totalorder %v90_v33, %v87_v32  ;;  %v6454_v33 = vld [vmem:[%s9117_s12 + $0x30] sm:$0xff] }
  0x95   :  { %7031 = vmatprep.mubr.msk.f32.mxu0 %vm94_vm2, %v7987_v34 }
  0x97   :  { %v93_v35 = vpop.permute.xlu0 %92 }
  0x98   :  { %vm95_vm3 = vcmp.eq.s32.totalorder %v93_v35, %v87_v32  ;;  %v387_v32 = vld [vmem:[%s9158_s9 + $0x18] sm:$0xff] }
  0x99   :  { %7032 = vmatmul.mubr.msk.f32.vlgmr.msra.gmra.mrb[0].mxu0 %vm95_vm3, %v7987_v34  ;;  %v6455_v34 = vld [vmem:[%s9117_s12 + $0x38] sm:$0xff] }
  0x9a   :  { %7628 = vmatpush3.bf16.msra.mxu0 %v7625_v2 }
  0x9b   :  { %7630 = vmatprep.subr.bf16.mxu0 %v7629_v8 }
  0x9e   :  { %7632 = vmatpush3.bf16.msra.mxu0 %v7629_v8  ;;  %v274_v8 = vshrl.u32 %v86_v31, 7 }
  0x9f   :  { %7642 = vmatprep.subr.bf16.mxu0 %v7641_v14 }
  0xa0   :  { %v275_v10 = vsub.s32 %v272_v7, %v274_v8 }
  0xa2   :  { %v126_v36 = vpop.permute.xlu1 %125  ;;  %v276_v11 = vrot.slane %v268_v9, %v275_v10 }
  0xa3   :  { %vm130_vm5 = vcmp.eq.s32.totalorder %v126_v36, 1  ;;  %v7613_v36 = vpack.c.bf16 %v387_v32, %v386_v29 }
  0xa4   :  { %v140_v41 = vsel %vm130_vm5, %v6415_v38, %v6416_v39  ;;  %v284_v13 = vrot.slane %v276_v11, %v275_v10 }
  0xa6   :  { %v129_v37 = vpop.permute.xlu1 %128 }
  0xa7   :  { %vm131_vm4 = vcmp.eq.s32.totalorder %v129_v37, 1  ;;  %v7645_v37 = vpack.c.bf16 %v6455_v34, %v6454_v33 }
  0xa8   :  { %v141_v40 = vsel %vm131_vm4, %v6415_v38, %v6416_v39  ;;  %v470_v38 = vld [vmem:[%s9117_s12] sm:$0xff]  ;;  %v471_v39 = vld [vmem:[%s9117_s12 + $0x8] sm:$0xff] }
 0x16c   :  { %v7033_v42 = vpop.f32.mrb[0].mxu0 }
 0x16d   :  { %v214_v44 = vadd.f32 %v7033_v42, %v141_v40  ;;  %v208_v45 = vpop.f32.mrb[1].mxu0  ;;  %v7617_v40 = vpack.c.bf16 %v471_v39, %v470_v38  ;;  %v473_v42 = vld [vmem:[%s9117_s12 + $0x18] sm:$0xff] }
 0x16e   :  { %v209_v46 = vadd.f32 %v208_v45, %v140_v41  ;;  %v472_v41 = vld [vmem:[%s9117_s12 + $0x10] sm:$0xff] }
 0x16f   :  { %v219_v47 = vadd.f32 %v217_v43, %v214_v44  ;;  %v7988_v44 = vmov 0.0  }
 0x170   :  { %v218_v48 = vadd.f32 %v217_v43, %v209_v46  ;;  %v7621_v43 = vpack.c.bf16 %v473_v42, %v472_v41  ;;  %v6444_v42 = vld [vmem:[%s9158_s9 + $0x20] sm:$0xff] }
 0x171   :  { %v226_v49 = vsel %vm222_vm6, %v219_v47, 0.0 }
 0x172   :  { %227 = vadd.xlane.f32.xlu1 %v226_v49  ;;  %v223_v50 = vsel %vm222_vm6, %v218_v48, 0.0  ;;  %v6457_v49 = vld [vmem:[%s9118_s13 + $0x1] ss:$0 sm:$0xff] }
 0x173   :  { %224 = vadd.xlane.f32.xlu0 %v223_v50  ;;  %v6424_v50 = vld [vmem:[%s9116_s11] ss:$0 sm:$0xff] }
 0x1ff   :  { %v228_v51 = vpop.xlane.xlu1 %227 }
 0x200   :  { %v231_v52 = vmul.f32 0.03125, %v228_v51  ;;  %v225_v53 = vpop.xlane.xlu0 %224 }
 0x201   :  { %v230_v54 = vmul.f32 0.03125, %v225_v53 }
 0x202   :  { %v233_v55 = vsub.f32 %v219_v47, %v231_v52 }
 0x203   :  { %v232_v56 = vsub.f32 %v218_v48, %v230_v54 }
 0x204   :  { %v235_v59 = vmul.f32 %v233_v55, %v233_v55 }
 0x205   :  { %v234_v57 = vmul.f32 %v232_v56, %v232_v56 }
 0x206   :  { %v239_v60 = vsel %vm222_vm6, %v235_v59, 0.0 }
 0x207   :  { %v236_v58 = vsel %vm222_vm6, %v234_v57, 0.0 }
 0x208   :  { %237 = vadd.xlane.f32.xlu0 %v236_v58 }
 0x20c   :  { %240 = vadd.xlane.f32.xlu0 %v239_v60 }
 0x295   :  { %v238_v15 = vpop.xlane.xlu0 %237 }
 0x296   :  { %v242_v16 = vmul.f32 0.03125, %v238_v15 }
 0x298   :  { %v244_v17 = vadd.f32 1e-12, %v242_v16 }
 0x299   :  { %v241_v18 = vpop.xlane.xlu0 %240 }
 0x29a   :  { %7868 = vrsqrt.f32 %v244_v17  ;;  %v243_v19 = vmul.f32 0.03125, %v241_v18 }
 0x29c   :  { %v245_v20 = vadd.f32 1e-12, %v243_v19 }
 0x29e   :  { %7870 = vrsqrt.f32 %v245_v20 }
 0x2a4   :  { %v7869_v21 = vpop.eup %7868 }
 0x2a5   :  { %v248_v23 = vmul.f32 %v7869_v21, %v232_v56  ;;  %v6421_v56 = vld [vmem:[%s9161_s1] ss:$0 sm:$0xff] }
 0x2a7   :  { %v256_v25 = vmul.f32 %v6419_v22, %v248_v23 }
 0x2a8   :  { %v7871_v26 = vpop.eup %7870 }
 0x2a9   :  { %v8244_v27 = vadd.f32 %v6420_v24, %v256_v25  ;;  %v249_v28 = vmul.f32 %v7871_v26, %v233_v55 }
 0x2ab   :  { %v257_v30 = vmul.f32 %v6419_v22, %v249_v28  ;;  %7042 = vmatprep.mubr.msk.f32.mxu1 %vm222_vm6, %v8244_v27  ;;  %7095 = vmatprep.mubr.msk.f32.mxu0 %vm222_vm6, %v8244_v27 }
 0x2ad   :  { %v8262_v35 = vadd.f32 %v6420_v24, %v257_v30 }
 0x2af   :  { %7043 = vmatmul.mubr.msk.f32.vlgmr.msra.gmra.mrb[0].mxu1 %vm222_vm6, %v8262_v35  ;;  %7096 = vmatmul.mubr.msk.f32.vlgmr.msra.gmra.mrb[2].mxu0 %vm222_vm6, %v8262_v35 }
 0x2b0   :  { %7612 = vmatpush3.bf16.msra.mxu1 %v7609_v12  ;;  %7644 = vmatpush3.bf16.msra.mxu0 %v7641_v14  ;;  %v277_v12 = vcombine.high %v276_v11, %v276_v11  ;;  %v713_v14 = vsub.s32 0, %v274_v8 }
 0x2b1   :  { %7053 = vmatprep.mubr.msk.f32.mxu1 %vm222_vm6, %v8244_v27  ;;  %7117 = vmatprep.mubr.msk.f32.mxu0 %vm222_vm6, %v8244_v27 }
 0x2b2   :  { %7614 = vmatprep.subr.bf16.mxu1 %v7613_v36  ;;  %7646 = vmatprep.subr.bf16.mxu0 %v7645_v37  ;;  %v291_v15 = vrot.slane %v277_v12, %v275_v10  ;;  %v8331_v16 = vrot.slane %v284_v13, %v713_v14 }
 0x2b4   :  { %7616 = vmatpush3.bf16.msra.mxu1 %v7613_v36  ;;  %7648 = vmatpush3.bf16.msra.mxu0 %v7645_v37  ;;  %v8333_v20 = vrot.slane %v291_v15, %v713_v14 }
 0x2b5   :  { %7618 = vmatprep.subr.bf16.mxu1 %v7617_v40  ;;  %7130 = vmatprep.subr.mxu0 %v7988_v44 }
 0x2b7   :  { %7054 = vmatmul.mubr.msk.f32.vlgmr.msra.gmra.mrb[2].mxu1 %vm222_vm6, %v8262_v35  ;;  %7118 = vmatmul.mubr.msk.f32.vlgmr.msra.gmra.mrb[4].mxu0 %vm222_vm6, %v8262_v35 }
 0x2b8   :  { %7620 = vmatpush3.bf16.msra.mxu1 %v7617_v40  ;;  %7064 = vmatprep.mubr.msk.f32.mxu1 %vm222_vm6, %v8244_v27 }
 0x2b9   :  { %7622 = vmatprep.subr.bf16.mxu1 %v7621_v43  ;;  %7132 = vmatprep.mubr.msk.f32.mxu0 %vm7989_vm7, %v7988_v44 }
 0x2bc   :  { %7624 = vmatpush3.bf16.msra.mxu1 %v7621_v43  ;;  %v6445_v43 = vld [vmem:[%s9158_s9 + $0x28] sm:$0xff] }
 0x2bd   :  { %7067 = vmatprep.subr.mxu1 %v7988_v44 }
 0x2bf   :  { %7065 = vmatmul.mubr.msk.f32.vlgmr.msra.gmra.mrb[4].mxu1 %vm222_vm6, %v8262_v35 }
 0x2c0   :  { %7069 = vmatprep.mubr.msk.f32.mxu1 %vm7989_vm7, %v7988_v44 }
 0x382   :  { %v7044_v45 = vpop.f32.mrb[0].mxu1  ;;  %v8298_v46 = vpop.f32.mrb[2].mxu0 }
 0x383   :  { %v375_v47 = vpop.f32.mrb[1].mxu1  ;;  %v8300_v48 = vpop.f32.mrb[3].mxu0  ;;  %v381_v63 = vadd.f32 %v7044_v45, %v6421_v56 }
 0x384   :  { %v376_v59 = vadd.f32 %v6421_v56, %v375_v47 }
 0x38a   :  { %v7055_v51 = vpop.f32.mrb[2].mxu1  ;;  %v7119_v52 = vpop.f32.mrb[4].mxu0 }
 0x38b   :  { %v8308_v53 = vadd.f32 %v7119_v52, %v6457_v49  ;;  %v461_v54 = vpop.f32.mrb[3].mxu1  ;;  %v1147_v55 = vpop.f32.mrb[5].mxu0  ;;  %v467_v60 = vadd.f32 %v7055_v51, %v6424_v50  ;;  %v6447_v51 = vld [vmem:[%s9158_s9 + $0x38] sm:$0xff] }
 0x38c   :  { %v462_v57 = vadd.f32 %v6424_v50, %v461_v54  ;;  %v1148_v58 = vadd.f32 %v6457_v49, %v1147_v55  ;;  %v7633_v49 = vpack.c.bf16 %v6445_v43, %v6444_v42  ;;  %v6446_v50 = vld [vmem:[%s9158_s9 + $0x30] sm:$0xff]  ;;  %v6466_v43 = vld [vmem:[%s9119_s14 + $0x8] sm:$0xff] }
 0x38d   :  { %v7637_v55 = vpack.c.bf16 %v6447_v51, %v6446_v50  ;;  %v6480_v50 = vld [vmem:[%s9158_s9 + $0x48] sm:$0xff] }
 0x38e   :  { %7068 = vmatpush3.xpose.msk.msra.mxu1 %vm556_vm8, %v462_v57  ;;  %7131 = vmatpush3.msra.mxu0 %v1148_v58 }
 0x38f   :  { %7072 = vmatprep.subr.mxu1 %v7988_v44  ;;  %7140 = vmatprep.subr.mxu0 %v6466_v43 }
 0x391   :  { %7070 = vmatmul.mubr.msk.f32.vlgmr.msra.gmra.mrb[6].mxu1 %vm556_vm8, %v376_v59 }
 0x392   :  { %v7066_v62 = vpop.f32.mrb[4].mxu1  ;;  %7073 = vmatpush3.xpose.msk.msra.mxu1 %vm556_vm8, %v467_v60  ;;  %7074 = vmatprep.mubr.msk.f32.mxu1 %vm7989_vm7, %v7988_v44  ;;  %v6449_v60 = vld [vmem:[%s9116_s11 + $0x1] ss:$0 sm:$0xff] }
 0x393   :  { %v553_v0 = vadd.f32 %v7066_v62, %v6427_v61  ;;  %v547_v1 = vpop.f32.mrb[5].mxu1  ;;  %7077 = vmatprep.subr.mxu1 %v7988_v44 }
 0x394   :  { %v548_v2 = vadd.f32 %v6427_v61, %v547_v1 }
 0x395   :  { %7075 = vmatmul.mubr.msk.f32.vlgmr.msra.gmra.mrb[8].mxu1 %vm556_vm8, %v381_v63  ;;  %v6441_v63 = vld [vmem:[%s9161_s1 + $0x1] ss:$0 sm:$0xff] }
 0x396   :  { %7078 = vmatpush3.msra.mxu1 %v548_v2  ;;  %7079 = vmatprep.mubr.msk.f32.mxu1 %vm7989_vm7, %v7988_v44  ;;  %v972_v1 = vadd.f32 %v6441_v63, %v8300_v48  ;;  %v977_v3 = vadd.f32 %v8298_v46, %v6441_v63 }
 0x397   :  { %7082 = vmatprep.subr.mxu1 %v7988_v44 }
 0x464   :  { %v629_v17 = vpop.f32.mrb[6].mxu1 }
 0x465   :  { %v709_v18 = vmul.f32 0.35355338, %v629_v17  ;;  %v7071_v19 = vpop.f32.mrb[7].mxu1 }
 0x467   :  { %v721_v21 = vadd.f32 %v8331_v16, %v709_v18 }
 0x468   :  { %v705_v22 = vpop.f32.mrb[8].mxu1 }
 0x469   :  { %v710_v23 = vmul.f32 0.35355338, %v705_v22  ;;  %v7076_v24 = vpop.f32.mrb[9].mxu1  ;;  %v723_v31 = vsel %vm556_vm8, %v721_v21, -inf }
 0x46a   :  { %724 = vmax.xlane.f32.xlu1 %v723_v31  ;;  %v6472_v24 = vld [vmem:[%s9157_s29 + $0x48] sm:$0xff] }
 0x46b   :  { %v722_v25 = vadd.f32 %v8333_v20, %v710_v23  ;;  %v6471_v23 = vld [vmem:[%s9157_s29 + $0x40] sm:$0xff] }
 0x46c   :  { %v7649_v31 = vpack.c.bf16 %v6472_v24, %v6471_v23 }
 0x46d   :  { %v726_v26 = vsel %vm556_vm8, %v722_v25, -inf }
 0x46e   :  { %727 = vmax.xlane.f32.xlu0 %v726_v26 }
 0x4f7   :  { %v725_v28 = vpop.xlane.xlu1 %724 }
 0x4f8   :  { %v729_v29 = vsub.f32 %v721_v21, %v725_v28 }
 0x4fa   :  { %v731_v30 = vmul.f32 1.442695, %v729_v29 }
 0x4fb   :  { %v728_v32 = vpop.xlane.xlu0 %727 }
 0x4fc   :  { %7872 = vpow2.f32 %v731_v30  ;;  %v730_v33 = vsub.f32 %v722_v25, %v728_v32  ;;  %v6473_v30 = vld [vmem:[%s9157_s29 + $0x50] sm:$0xff]  ;;  %v6474_v32 = vld [vmem:[%s9157_s29 + $0x58] sm:$0xff] }
 0x4fe   :  { %v733_v34 = vmul.f32 1.442695, %v730_v33 }
 0x500   :  { %7874 = vpow2.f32 %v733_v34 }
 0x506   :  { %v7873_v36 = vpop.eup %7872 }
 0x507   :  { %v735_v37 = vsel %vm556_vm8, %v7873_v36, 0.0 }
 0x508   :  { %736 = vadd.xlane.f32.xlu1 %v735_v37  ;;  %v6487_v37 = vld [vmem:[%s9117_s12 + $0x40] sm:$0xff] }
 0x50a   :  { %v7875_v38 = vpop.eup %7874 }
 0x50b   :  { %v738_v39 = vsel %vm556_vm8, %v7875_v38, 0.0 }
 0x50c   :  { %739 = vadd.xlane.f32.xlu0 %v738_v39 }
 0x595   :  { %v737_v40 = vpop.xlane.xlu1 %736 }
 0x596   :  { %7876 = vrcp.f32 %v737_v40  ;;  %v6489_v40 = vld [vmem:[%s9117_s12 + $0x50] sm:$0xff] }
 0x599   :  { %v740_v41 = vpop.xlane.xlu0 %739 }
 0x59a   :  { %7878 = vrcp.f32 %v740_v41  ;;  %v6490_v41 = vld [vmem:[%s9117_s12 + $0x58] sm:$0xff] }
 0x59b   :  { %v7669_v42 = vpack.c.bf16 %v6490_v41, %v6489_v40 }
 0x5a0   :  { %v7877_v45 = vpop.eup %7876 }
 0x5a1   :  { %v743_v47 = vmul.f32 %v7877_v45, %v7873_v36  ;;  %v7653_v36 = vpack.c.bf16 %v6474_v32, %v6473_v30  ;;  %v891_v45 = vld [vmem:[%s9119_s14] sm:$0xff]  ;;  %v6505_v30 = vld [vmem:[%s9157_s29 + $0x68] sm:$0xff] }
 0x5a3   :  { %7080 = vmatmul.mubr.msk.f32.vlgmr.msra.gmra.mrb[10].mxu1 %vm556_vm8, %v743_v47 }
 0x5a4   :  { %v7879_v52 = vpop.eup %7878  ;;  %7083 = vmatpush3.msra.mxu1 %v553_v0  ;;  %7084 = vmatprep.mubr.msk.f32.mxu1 %vm7989_vm7, %v7988_v44 }
 0x5a5   :  { %v744_v54 = vmul.f32 %v7879_v52, %v7875_v38  ;;  %7634 = vmatprep.subr.bf16.mxu1 %v7633_v49  ;;  %v6488_v38 = vld [vmem:[%s9117_s12 + $0x48] sm:$0xff] }
 0x5a6   :  { %v7665_v39 = vpack.c.bf16 %v6488_v38, %v6487_v37  ;;  %v6506_v37 = vld [vmem:[%s9157_s29 + $0x70] sm:$0xff]  ;;  %v6507_v38 = vld [vmem:[%s9157_s29 + $0x78] sm:$0xff] }
 0x5a7   :  { %7085 = vmatmul.mubr.msk.f32.vlgmr.msra.gmra.mrb[12].mxu1 %vm556_vm8, %v744_v54 }
 0x5a8   :  { %7636 = vmatpush3.bf16.msra.mxu1 %v7633_v49  ;;  %7106 = vmatprep.mubr.msk.f32.mxu1 %vm222_vm6, %v8244_v27  ;;  %v6479_v49 = vld [vmem:[%s9158_s9 + $0x40] sm:$0xff] }
 0x5a9   :  { %7638 = vmatprep.subr.bf16.mxu1 %v7637_v55  ;;  %v7657_v52 = vpack.c.bf16 %v6480_v50, %v6479_v49  ;;  %v6522_v50 = vld [vmem:[%s9117_s12 + $0x70] sm:$0xff] }
 0x5ac   :  { %7640 = vmatpush3.bf16.msra.mxu1 %v7637_v55 }
 0x5ad   :  { %7120 = vmatprep.subr.mxu1 %v7988_v44 }
 0x5af   :  { %7107 = vmatmul.mubr.msk.f32.vlgmr.msra.gmra.mrb[14].mxu1 %vm222_vm6, %v8262_v35 }
 0x5b0   :  { %7122 = vmatprep.mubr.msk.f32.mxu1 %vm7989_vm7, %v7988_v44 }
 0x676   :  { %v8364_v56 = vpop.f32.mrb[10].mxu1 }
 0x677   :  { %v7081_v57 = vpop.f32.mrb[11].mxu1 }
 0x678   :  { %v6481_v57 = vld [vmem:[%s9158_s9 + $0x50] sm:$0xff] }
 0x67a   :  { %v8366_v58 = vpop.f32.mrb[12].mxu1 }
 0x67b   :  { %v7086_v59 = vpop.f32.mrb[13].mxu1 }
 0x67c   :  { %v6482_v59 = vld [vmem:[%s9158_s9 + $0x58] sm:$0xff] }
 0x682   :  { %v7108_v61 = vpop.f32.mrb[14].mxu1 }
 0x683   :  { %v1059_v62 = vpop.f32.mrb[15].mxu1  ;;  %v1065_v2 = vadd.f32 %v7108_v61, %v6449_v60 }
 0x684   :  { %v1060_v0 = vadd.f32 %v6449_v60, %v1059_v62  ;;  %v7661_v60 = vpack.c.bf16 %v6482_v59, %v6481_v57  ;;  %v6514_v59 = vld [vmem:[%s9158_s9 + $0x70] sm:$0xff] }
 0x686   :  { %7121 = vmatpush3.xpose.msk.msra.mxu1 %vm556_vm8, %v1060_v0 }
 0x687   :  { %7125 = vmatprep.subr.mxu1 %v7988_v44 }
 0x689   :  { %7123 = vmatmul.mubr.msk.f32.vlgmr.msra.gmra.mrb[16].mxu1 %vm556_vm8, %v972_v1  ;;  %v6476_v1 = vld [vmem:[%s9161_s1 + $0x2] ss:$0 sm:$0xff] }
 0x68a   :  { %7126 = vmatpush3.xpose.msk.msra.mxu1 %vm556_vm8, %v1065_v2  ;;  %7127 = vmatprep.mubr.msk.f32.mxu1 %vm7989_vm7, %v7988_v44 }
 0x68b   :  { %7135 = vmatprep.subr.mxu1 %v7988_v44 }
 0x68d   :  { %7128 = vmatmul.mubr.msk.f32.vlgmr.msra.gmra.mrb[18].mxu1 %vm556_vm8, %v977_v3 }
 0x68e   :  { %7136 = vmatpush3.msra.mxu1 %v8308_v53  ;;  %7137 = vmatprep.mubr.msk.f32.mxu1 %vm7989_vm7, %v7988_v44 }
 0x68f   :  { %7650 = vmatprep.subr.bf16.mxu1 %v7649_v31 }
 0x75c   :  { %v1228_v48 = vpop.f32.mrb[16].mxu1 }
 0x75d   :  { %v1308_v4 = vmul.f32 0.35355338, %v1228_v48  ;;  %v7124_v5 = vpop.f32.mrb[17].mxu1  ;;  %v6492_v48 = vld [vmem:[%s9118_s13 + $0x2] ss:$0 sm:$0xff] }
 0x75f   :  { %v1310_v6 = vadd.f32 %v1308_v4, %v8331_v16 }
 0x760   :  { %v1304_v7 = vpop.f32.mrb[18].mxu1 }
 0x761   :  { %v1309_v8 = vmul.f32 0.35355338, %v1304_v7  ;;  %v7129_v9 = vpop.f32.mrb[19].mxu1  ;;  %v1312_v10 = vsel %vm556_vm8, %v1310_v6, -inf }
 0x762   :  { %1313 = vmax.xlane.f32.xlu1 %v1312_v10 }
 0x763   :  { %v1311_v46 = vadd.f32 %v1309_v8, %v8333_v20 }
 0x765   :  { %v1315_v11 = vsel %vm556_vm8, %v1311_v46, -inf }
 0x766   :  { %1316 = vmax.xlane.f32.xlu0 %v1315_v11 }
 0x7ef   :  { %v1314_v53 = vpop.xlane.xlu1 %1313 }
 0x7f0   :  { %v1318_v12 = vsub.f32 %v1310_v6, %v1314_v53 }
 0x7f2   :  { %v1320_v13 = vmul.f32 1.442695, %v1318_v12 }
 0x7f3   :  { %v1317_v14 = vpop.xlane.xlu0 %1316 }
 0x7f4   :  { %7880 = vpow2.f32 %v1320_v13  ;;  %v1319_v15 = vsub.f32 %v1311_v46, %v1317_v14 }
 0x7f6   :  { %v1322_v17 = vmul.f32 1.442695, %v1319_v15 }
 0x7f8   :  { %7882 = vpow2.f32 %v1322_v17 }
 0x7fe   :  { %v7881_v18 = vpop.eup %7880 }
 0x7ff   :  { %v1324_v19 = vsel %vm556_vm8, %v7881_v18, 0.0 }
 0x800   :  { %1325 = vadd.xlane.f32.xlu1 %v1324_v19 }
 0x802   :  { %v7883_v21 = vpop.eup %7882 }
 0x803   :  { %v1327_v22 = vsel %vm556_vm8, %v7883_v21, 0.0 }
 0x804   :  { %1328 = vadd.xlane.f32.xlu0 %v1327_v22 }
 0x88d   :  { %v1326_v25 = vpop.xlane.xlu1 %1325 }
 0x88e   :  { %7884 = vrcp.f32 %v1326_v25 }
 0x891   :  { %v1329_v26 = vpop.xlane.xlu0 %1328 }
 0x892   :  { %7886 = vrcp.f32 %v1329_v26 }
 0x898   :  { %v7885_v28 = vpop.eup %7884 }
 0x899   :  { %v1332_v29 = vmul.f32 %v7885_v28, %v7881_v18 }
 0x89b   :  { %7133 = vmatmul.mubr.msk.f32.vlgmr.msra.gmra.mrb[6].mxu0 %vm556_vm8, %v1332_v29  ;;  %v6504_v29 = vld [vmem:[%s9157_s29 + $0x60] sm:$0xff] }
 0x89c   :  { %v7887_v33 = vpop.eup %7886  ;;  %7141 = vmatpush3.msra.mxu0 %v6466_v43  ;;  %v7673_v32 = vpack.c.bf16 %v6505_v30, %v6504_v29 }
 0x89d   :  { %v1333_v34 = vmul.f32 %v7887_v33, %v7883_v21  ;;  %7145 = vmatprep.subr.mxu0 %v891_v45  ;;  %v6501_v33 = vld [vmem:[%s9119_s14 + $0x10] sm:$0xff] }
 0x89f   :  { %7138 = vmatmul.mubr.msk.f32.vlgmr.msra.gmra.mrb[20].mxu1 %vm556_vm8, %v1333_v34 }
 0x8a0   :  { %7652 = vmatpush3.bf16.msra.mxu1 %v7649_v31  ;;  %7158 = vmatprep.mubr.msk.f32.mxu1 %vm222_vm6, %v8244_v27 }
 0x8a1   :  { %7654 = vmatprep.subr.bf16.mxu1 %v7653_v36 }
 0x8a4   :  { %7656 = vmatpush3.bf16.msra.mxu1 %v7653_v36 }
 0x8a5   :  { %7666 = vmatprep.subr.bf16.mxu1 %v7665_v39 }
 0x8a7   :  { %7159 = vmatmul.mubr.msk.f32.vlgmr.msra.gmra.mrb[22].mxu1 %vm222_vm6, %v8262_v35 }
 0x8a8   :  { %7668 = vmatpush3.bf16.msra.mxu1 %v7665_v39  ;;  %7180 = vmatprep.mubr.msk.f32.mxu1 %vm222_vm6, %v8244_v27 }
 0x8a9   :  { %7670 = vmatprep.subr.bf16.mxu1 %v7669_v42 }
 0x8ac   :  { %7672 = vmatpush3.bf16.msra.mxu1 %v7669_v42  ;;  %v7677_v42 = vpack.c.bf16 %v6507_v38, %v6506_v37 }
 0x8ad   :  { %7188 = vmatprep.subr.mxu1 %v7988_v44 }
 0x8af   :  { %7181 = vmatmul.mubr.msk.f32.vlgmr.msra.gmra.mrb[24].mxu1 %vm222_vm6, %v8262_v35 }
 0x8b0   :  { %7190 = vmatprep.mubr.msk.f32.mxu1 %vm7989_vm7, %v7988_v44 }
 0x96e   :  { %v1403_v47 = vpop.f32.mrb[6].mxu0 }
 0x96f   :  { %v7134_v51 = vpop.f32.mrb[7].mxu0  ;;  %7142 = vmatprep.mubr.msk.f32.mxu0 %vm556_vm8, %v1403_v47  ;;  %v6521_v47 = vld [vmem:[%s9117_s12 + $0x68] sm:$0xff] }
 0x970   :  { %v6523_v51 = vld [vmem:[%s9117_s12 + $0x78] sm:$0xff] }
 0x972   :  { %v1476_v54 = vpop.f32.mrb[20].mxu1 }
 0x973   :  { %v7139_v55 = vpop.f32.mrb[21].mxu1  ;;  %7143 = vmatmul.mubr.msk.f32.vlgmr.msra.gmra.mrb[8].mxu0 %vm556_vm8, %v1476_v54  ;;  %v6512_v54 = vld [vmem:[%s9158_s9 + $0x60] sm:$0xff] }
 0x974   :  { %7146 = vmatpush3.msra.mxu0 %v891_v45  ;;  %7147 = vmatprep.mubr.msk.f32.mxu0 %vm556_vm8, %v8364_v56  ;;  %v6520_v45 = vld [vmem:[%s9117_s12 + $0x60] sm:$0xff]  ;;  %v6513_v55 = vld [vmem:[%s9158_s9 + $0x68] sm:$0xff] }
 0x975   :  { %7658 = vmatprep.subr.bf16.mxu0 %v7657_v52  ;;  %v7689_v49 = vpack.c.bf16 %v6521_v47, %v6520_v45  ;;  %v7681_v57 = vpack.c.bf16 %v6513_v55, %v6512_v54 }
 0x97a   :  { %v7160_v61 = vpop.f32.mrb[22].mxu1 }
 0x97b   :  { %v1723_v62 = vpop.f32.mrb[23].mxu1  ;;  %7148 = vmatmul.mubr.msk.f32.vlgmr.msra.gmra.mrb[8].mxu0 %vm556_vm8, %v8366_v58  ;;  %v6484_v58 = vld [vmem:[%s9116_s11 + $0x2] ss:$0 sm:$0xff]  ;;  %v1729_v5 = vadd.f32 %v7160_v61, %v6476_v1 }
 0x97c   :  { %7660 = vmatpush3.bf16.msra.mxu0 %v7657_v52  ;;  %7169 = vmatprep.mubr.msk.f32.mxu0 %vm222_vm6, %v8244_v27  ;;  %v1724_v6 = vadd.f32 %v6476_v1, %v1723_v62  ;;  %v7693_v52 = vpack.c.bf16 %v6523_v51, %v6522_v50  ;;  %v6537_v50 = vld [vmem:[%s9120_s15] ss:$0 sm:$0xff] }
 0x97d   :  { %7662 = vmatprep.subr.bf16.mxu0 %v7661_v60 }
 0x980   :  { %7664 = vmatpush3.bf16.msra.mxu0 %v7661_v60  ;;  %v6515_v60 = vld [vmem:[%s9158_s9 + $0x78] sm:$0xff] }
 0x981   :  { %7183 = vmatprep.subr.mxu0 %v7988_v44 }
 0x982   :  { %v7182_v56 = vpop.f32.mrb[24].mxu1 }
 0x983   :  { %7170 = vmatmul.mubr.msk.f32.vlgmr.msra.gmra.mrb[10].mxu0 %vm222_vm6, %v8262_v35  ;;  %v1899_v63 = vpop.f32.mrb[25].mxu1  ;;  %v1905_v7 = vadd.f32 %v7182_v56, %v6492_v48 }
 0x984   :  { %7185 = vmatprep.mubr.msk.f32.mxu0 %vm7989_vm7, %v7988_v44  ;;  %v1900_v8 = vadd.f32 %v6492_v48, %v1899_v63  ;;  %v7685_v63 = vpack.c.bf16 %v6515_v60, %v6514_v59 }
 0xa56   :  { %v7171_v0 = vpop.f32.mrb[10].mxu0 }
 0xa57   :  { %v1817_v2 = vadd.f32 %v7171_v0, %v6484_v58  ;;  %v1811_v3 = vpop.f32.mrb[11].mxu0 }
 0xa58   :  { %v1812_v4 = vadd.f32 %v6484_v58, %v1811_v3 }
 0xa59   :  { %7189 = vmatpush3.xpose.msk.msra.mxu1 %vm556_vm8, %v1817_v2  ;;  %v6525_v2 = vld [vmem:[%s9118_s13 + $0x3] ss:$0 sm:$0xff] }
 0xa5a   :  { %7184 = vmatpush3.xpose.msk.msra.mxu0 %vm556_vm8, %v1812_v4  ;;  %7198 = vmatprep.subr.mxu1 %v7988_v44 }
 0xa5b   :  { %7193 = vmatprep.subr.mxu0 %v7988_v44 }
 0xa5c   :  { %7191 = vmatmul.mubr.msk.f32.vlgmr.msra.gmra.mrb[26].mxu1 %vm556_vm8, %v1729_v5 }
 0xa5d   :  { %7186 = vmatmul.mubr.msk.f32.vlgmr.msra.gmra.mrb[12].mxu0 %vm556_vm8, %v1724_v6  ;;  %7199 = vmatpush3.msra.mxu1 %v1905_v7  ;;  %v6517_v6 = vld [vmem:[%s9116_s11 + $0x3] ss:$0 sm:$0xff] }
 0xa5e   :  { %7194 = vmatpush3.msra.mxu0 %v1900_v8  ;;  %7200 = vmatprep.mubr.msk.f32.mxu1 %vm7989_vm7, %v7988_v44 }
 0xa5f   :  { %7195 = vmatprep.mubr.msk.f32.mxu0 %vm7989_vm7, %v7988_v44  ;;  %7674 = vmatprep.subr.bf16.mxu1 %v7673_v32 }
 0xa60   :  { %7203 = vmatprep.subr.mxu0 %v6501_v33 }
 0xb2f   :  { %v2056_v9 = vpop.f32.mrb[26].mxu1 }
 0xb30   :  { %v2061_v10 = vmul.f32 0.35355338, %v2056_v9  ;;  %v1980_v46 = vpop.f32.mrb[12].mxu0  ;;  %v7192_v11 = vpop.f32.mrb[27].mxu1  ;;  %v6509_v9 = vld [vmem:[%s9161_s1 + $0x3] ss:$0 sm:$0xff] }
 0xb31   :  { %v2060_v53 = vmul.f32 0.35355338, %v1980_v46  ;;  %v7187_v12 = vpop.f32.mrb[13].mxu0 }
 0xb32   :  { %v2063_v13 = vadd.f32 %v2061_v10, %v8333_v20 }
 0xb33   :  { %v2062_v14 = vadd.f32 %v2060_v53, %v8331_v16 }
 0xb34   :  { %v2067_v15 = vsel %vm556_vm8, %v2063_v13, -inf }
 0xb35   :  { %2068 = vmax.xlane.f32.xlu0 %v2067_v15  ;;  %v2064_v17 = vsel %vm556_vm8, %v2062_v14, -inf }
 0xb36   :  { %2065 = vmax.xlane.f32.xlu1 %v2064_v17 }
 0xbc2   :  { %v2069_v18 = vpop.xlane.xlu0 %2068 }
 0xbc3   :  { %v2071_v19 = vsub.f32 %v2063_v13, %v2069_v18  ;;  %v2066_v21 = vpop.xlane.xlu1 %2065 }
 0xbc4   :  { %v2070_v22 = vsub.f32 %v2062_v14, %v2066_v21 }
 0xbc5   :  { %v2074_v23 = vmul.f32 1.442695, %v2071_v19 }
 0xbc6   :  { %v2072_v24 = vmul.f32 1.442695, %v2070_v22 }
 0xbc7   :  { %7888 = vpow2.f32 %v2074_v23 }
 0xbc8   :  { %7890 = vpow2.f32 %v2072_v24 }
 0xbd1   :  { %v7889_v31 = vpop.eup %7888 }
 0xbd2   :  { %v7891_v25 = vpop.eup %7890  ;;  %v2079_v26 = vsel %vm556_vm8, %v7889_v31, 0.0 }
 0xbd3   :  { %2080 = vadd.xlane.f32.xlu0 %v2079_v26  ;;  %v2076_v28 = vsel %vm556_vm8, %v7891_v25, 0.0 }
 0xbd4   :  { %2077 = vadd.xlane.f32.xlu1 %v2076_v28 }
 0xc60   :  { %v2081_v34 = vpop.xlane.xlu0 %2080 }
 0xc61   :  { %7892 = vrcp.f32 %v2081_v34  ;;  %v2078_v36 = vpop.xlane.xlu1 %2077 }
 0xc62   :  { %7894 = vrcp.f32 %v2078_v36 }
 0xc6b   :  { %v7893_v39 = vpop.eup %7892 }
 0xc6c   :  { %v7895_v40 = vpop.eup %7894  ;;  %v2085_v41 = vmul.f32 %v7893_v39, %v7889_v31 }
 0xc6d   :  { %v2084_v43 = vmul.f32 %v7895_v40, %v7891_v25 }
 0xc6e   :  { %7201 = vmatmul.mubr.msk.f32.vlgmr.msra.gmra.mrb[28].mxu1 %vm556_vm8, %v2085_v41 }
 0xc6f   :  { %7676 = vmatpush3.bf16.msra.mxu1 %v7673_v32  ;;  %7196 = vmatmul.mubr.msk.f32.vlgmr.msra.gmra.mrb[14].mxu0 %vm556_vm8, %v2084_v43 }
 0xc70   :  { %7216 = vmatprep.mubr.msk.f32.mxu1 %vm222_vm6, %v8244_v27  ;;  %7678 = vmatprep.subr.bf16.mxu1 %v7677_v42 }
 0xc71   :  { %7204 = vmatpush3.msra.mxu0 %v6501_v33 }
 0xc72   :  { %7682 = vmatprep.subr.bf16.mxu0 %v7681_v57 }
 0xc73   :  { %7680 = vmatpush3.bf16.msra.mxu1 %v7677_v42  ;;  %v6534_v42 = vld [vmem:[%s9119_s14 + $0x18] sm:$0xff] }
 0xc74   :  { %7690 = vmatprep.subr.bf16.mxu1 %v7689_v49 }
 0xc76   :  { %7217 = vmatmul.mubr.msk.f32.vlgmr.msra.gmra.mrb[30].mxu1 %vm222_vm6, %v8262_v35 }
 0xc77   :  { %7692 = vmatpush3.bf16.msra.mxu1 %v7689_v49  ;;  %7238 = vmatprep.mubr.msk.f32.mxu1 %vm222_vm6, %v8244_v27 }
 0xc78   :  { %7694 = vmatprep.subr.bf16.mxu1 %v7693_v52 }
 0xc7b   :  { %7696 = vmatpush3.bf16.msra.mxu1 %v7693_v52 }
 0xc7c   :  { %7251 = vmatprep.subr.mxu1 %v7988_v44 }
 0xc7e   :  { %7239 = vmatmul.mubr.msk.f32.vlgmr.msra.gmra.mrb[32].mxu1 %vm222_vm6, %v8262_v35 }
 0xc7f   :  { %7253 = vmatprep.mubr.msk.f32.mxu1 %vm7989_vm7, %v7988_v44 }
 0xd41   :  { %v2228_v61 = vpop.f32.mrb[28].mxu1 }
 0xd42   :  { %v2155_v62 = vpop.f32.mrb[14].mxu0  ;;  %v7202_v56 = vpop.f32.mrb[29].mxu1 }
 0xd43   :  { %v7197_v58 = vpop.f32.mrb[15].mxu0  ;;  %7205 = vmatprep.mubr.msk.f32.mxu0 %vm556_vm8, %v2155_v62 }
 0xd44   :  { %7206 = vmatmul.mubr.msk.f32.vlgmr.msra.gmra.mrb[8].mxu0 %vm556_vm8, %v2228_v61 }
 0xd45   :  { %7684 = vmatpush3.bf16.msra.mxu0 %v7681_v57  ;;  %7227 = vmatprep.mubr.msk.f32.mxu0 %vm222_vm6, %v8244_v27 }
 0xd46   :  { %7686 = vmatprep.subr.bf16.mxu0 %v7685_v63 }
 0xd49   :  { %v7218_v0 = vpop.f32.mrb[30].mxu1  ;;  %7688 = vmatpush3.bf16.msra.mxu0 %v7685_v63 }
 0xd4a   :  { %v2396_v1 = vpop.f32.mrb[31].mxu1  ;;  %7241 = vmatprep.subr.mxu0 %v7988_v44  ;;  %v2402_v53 = vadd.f32 %v7218_v0, %v6509_v9 }
 0xd4b   :  { %v2397_v46 = vadd.f32 %v6509_v9, %v2396_v1 }
 0xd4c   :  { %7228 = vmatmul.mubr.msk.f32.vlgmr.msra.gmra.mrb[16].mxu0 %vm222_vm6, %v8262_v35 }
 0xd4d   :  { %7243 = vmatprep.mubr.msk.f32.mxu0 %vm7989_vm7, %v7988_v44 }
 0xd51   :  { %v7240_v3 = vpop.f32.mrb[32].mxu1 }
 0xd52   :  { %v2578_v48 = vadd.f32 %v7240_v3, %v6525_v2  ;;  %v2572_v4 = vpop.f32.mrb[33].mxu1 }
 0xd53   :  { %v2573_v5 = vadd.f32 %v6525_v2, %v2572_v4  ;;  %v3046_v4 = vld [vmem:[%s9123_s18 + $0x8] sm:$0xff] }
 0xd55   :  { %7252 = vmatpush3.msra.mxu1 %v2573_v5 }
 0xe1f   :  { %v7229_v7 = vpop.f32.mrb[16].mxu0 }
 0xe20   :  { %v2484_v8 = vpop.f32.mrb[17].mxu0  ;;  %v2490_v11 = vadd.f32 %v7229_v7, %v6517_v6  ;;  %v3048_v7 = vld [vmem:[%s9123_s18 + $0x18] sm:$0xff] }
 0xe21   :  { %v2485_v10 = vadd.f32 %v6517_v6, %v2484_v8  ;;  %v3047_v6 = vld [vmem:[%s9123_s18 + $0x10] sm:$0xff] }
 0xe22   :  { %v7701_v8 = vpack.c.bf16 %v3048_v7, %v3047_v6 }
 0xe23   :  { %7242 = vmatpush3.xpose.msk.msra.mxu0 %vm556_vm8, %v2485_v10 }
 0xe24   :  { %7246 = vmatprep.subr.mxu0 %v7988_v44 }
 0xe26   :  { %7244 = vmatmul.mubr.msk.f32.vlgmr.msra.gmra.mrb[18].mxu0 %vm556_vm8, %v2397_v46 }
 0xe27   :  { %7247 = vmatpush3.xpose.msk.msra.mxu0 %vm556_vm8, %v2490_v11  ;;  %7248 = vmatprep.mubr.msk.f32.mxu0 %vm7989_vm7, %v7988_v44 }
 0xe28   :  { %7256 = vmatprep.subr.mxu0 %v7988_v44 }
 0xe2a   :  { %7249 = vmatmul.mubr.msk.f32.vlgmr.msra.gmra.mrb[20].mxu0 %vm556_vm8, %v2402_v53 }
 0xe2b   :  { %7257 = vmatpush3.msra.mxu0 %v2578_v48  ;;  %7258 = vmatprep.mubr.msk.f32.mxu0 %vm7989_vm7, %v7988_v44 }
 0xe2c   :  { %7261 = vmatprep.subr.mxu0 %v6534_v42 }
 0xef9   :  { %v2653_v12 = vpop.f32.mrb[18].mxu0 }
 0xefa   :  { %v2733_v13 = vmul.f32 0.35355338, %v2653_v12  ;;  %v7245_v14 = vpop.f32.mrb[19].mxu0 }
 0xefb   :  { %v6538_v14 = vld [vmem:[%s9121_s16] ss:$0 sm:$0xff] }
 0xefc   :  { %v2735_v15 = vadd.f32 %v2733_v13, %v8331_v16 }
 0xefd   :  { %v2729_v17 = vpop.f32.mrb[20].mxu0 }
 0xefe   :  { %v2734_v18 = vmul.f32 0.35355338, %v2729_v17  ;;  %v7250_v19 = vpop.f32.mrb[21].mxu0  ;;  %v2737_v21 = vsel %vm556_vm8, %v2735_v15, -inf }
 0xeff   :  { %2738 = vmax.xlane.f32.xlu1 %v2737_v21  ;;  %v6539_v19 = vld [vmem:[%s9122_s17] ss:$0 sm:$0xff] }
 0xf00   :  { %v2736_v22 = vadd.f32 %v2734_v18, %v8333_v20 }
 0xf02   :  { %v2740_v23 = vsel %vm556_vm8, %v2736_v22, -inf }
 0xf03   :  { %2741 = vmax.xlane.f32.xlu0 %v2740_v23 }
 0xf8c   :  { %v2739_v24 = vpop.xlane.xlu1 %2738 }
 0xf8d   :  { %v2743_v31 = vsub.f32 %v2735_v15, %v2739_v24 }
 0xf8f   :  { %v2745_v25 = vmul.f32 1.442695, %v2743_v31  ;;  %v3155_v31 = vld [vmem:[%s9125_s20] sm:$0xff] }
 0xf90   :  { %v2742_v26 = vpop.xlane.xlu0 %2741 }
 0xf91   :  { %7896 = vpow2.f32 %v2745_v25  ;;  %v2744_v28 = vsub.f32 %v2736_v22, %v2742_v26  ;;  %v3156_v25 = vld [vmem:[%s9125_s20 + $0x8] sm:$0xff] }
 0xf92   :  { %v7705_v26 = vpack.c.bf16 %v3156_v25, %v3155_v31  ;;  %v6551_v31 = vld [vmem:[%s9157_s29 + $0x98] sm:$0xff] }
 0xf93   :  { %v2747_v29 = vmul.f32 1.442695, %v2744_v28  ;;  %v3157_v28 = vld [vmem:[%s9125_s20 + $0x10] sm:$0xff] }
 0xf95   :  { %7898 = vpow2.f32 %v2747_v29  ;;  %v3158_v29 = vld [vmem:[%s9125_s20 + $0x18] sm:$0xff] }
 0xf9b   :  { %v7897_v30 = vpop.eup %7896 }
 0xf9c   :  { %v2749_v32 = vsel %vm556_vm8, %v7897_v30, 0.0 }
 0xf9d   :  { %2750 = vadd.xlane.f32.xlu1 %v2749_v32  ;;  %v3159_v32 = vld [vmem:[%s9125_s20 + $0x20] sm:$0xff] }
 0xf9f   :  { %v7899_v33 = vpop.eup %7898 }
 0xfa0   :  { %v2752_v34 = vsel %vm556_vm8, %v7899_v33, 0.0 }
 0xfa1   :  { %2753 = vadd.xlane.f32.xlu0 %v2752_v34 }
0x102a   :  { %v2751_v36 = vpop.xlane.xlu1 %2750 }
0x102b   :  { %7900 = vrcp.f32 %v2751_v36  ;;  %v3161_v36 = vld [vmem:[%s9125_s20 + $0x30] sm:$0xff] }
0x102e   :  { %v2754_v37 = vpop.xlane.xlu0 %2753 }
0x102f   :  { %7902 = vrcp.f32 %v2754_v37  ;;  %v3162_v37 = vld [vmem:[%s9125_s20 + $0x38] sm:$0xff] }
0x1035   :  { %v7901_v38 = vpop.eup %7900 }
0x1036   :  { %v2757_v39 = vmul.f32 %v7901_v38, %v7897_v30  ;;  %v7709_v30 = vpack.c.bf16 %v3158_v29, %v3157_v28  ;;  %v7717_v38 = vpack.c.bf16 %v3162_v37, %v3161_v36  ;;  %v6567_v28 = vld [vmem:[%s9117_s12 + $0x98] sm:$0xff] }
0x1038   :  { %7254 = vmatmul.mubr.msk.f32.vlgmr.msra.gmra.mrb[34].mxu1 %vm556_vm8, %v2757_v39  ;;  %v6540_v39 = vld [vmem:[%s9124_s19] ss:$0 sm:$0xff] }
0x1039   :  { %v7903_v40 = vpop.eup %7902 }
0x103a   :  { %v2758_v41 = vmul.f32 %v7903_v40, %v7899_v33  ;;  %v3160_v33 = vld [vmem:[%s9125_s20 + $0x28] sm:$0xff] }
0x103b   :  { %v7713_v34 = vpack.c.bf16 %v3160_v33, %v3159_v32  ;;  %v6557_v32 = vld [vmem:[%s9158_s9 + $0x88] sm:$0xff] }
0x103c   :  { %7259 = vmatmul.mubr.msk.f32.vlgmr.msra.gmra.mrb[22].mxu0 %vm556_vm8, %v2758_v41 }
0x103d   :  { %7262 = vmatpush3.msra.mxu0 %v6534_v42 }
0x103e   :  { %7706 = vmatprep.subr.bf16.mxu0 %v7705_v26 }
0x110b   :  { %v2828_v43 = vpop.f32.mrb[34].mxu1 }
0x110c   :  { %v7255_v45 = vpop.f32.mrb[35].mxu1  ;;  %7263 = vmatprep.mubr.msk.f32.mxu0 %vm556_vm8, %v2828_v43 }
0x110f   :  { %v2901_v47 = vpop.f32.mrb[22].mxu0 }
0x1110   :  { %v7260_v49 = vpop.f32.mrb[23].mxu0  ;;  %7264 = vmatmul.mubr.msk.f32.vlgmr.msra.gmra.mrb[8].mxu0 %vm556_vm8, %v2901_v47 }
0x1111   :  { %7708 = vmatpush3.bf16.msra.mxu0 %v7705_v26  ;;  %v6566_v26 = vld [vmem:[%s9117_s12 + $0x90] sm:$0xff] }
0x1112   :  { %7710 = vmatprep.subr.bf16.mxu0 %v7709_v30  ;;  %v7741_v29 = vpack.c.bf16 %v6567_v28, %v6566_v26  ;;  %v6580_v26 = vld [vmem:[%s9157_s29 + $0xa8] sm:$0xff] }
0x1115   :  { %7712 = vmatpush3.bf16.msra.mxu0 %v7709_v30  ;;  %v6556_v30 = vld [vmem:[%s9158_s9 + $0x80] sm:$0xff] }
0x1116   :  { %7714 = vmatprep.subr.bf16.mxu0 %v7713_v34  ;;  %v7729_v33 = vpack.c.bf16 %v6557_v32, %v6556_v30  ;;  %v6588_v30 = vld [vmem:[%s9158_s9 + $0xa8] sm:$0xff] }
0x1119   :  { %7716 = vmatpush3.bf16.msra.mxu0 %v7713_v34 }
0x111a   :  { %7718 = vmatprep.subr.bf16.mxu0 %v7717_v38 }
0x111d   :  { %7720 = vmatpush3.bf16.msra.mxu0 %v7717_v38 }
0x11e3   :  { %v7265_v51 = vpop.f32.mrb[8].mxu0 }
0x11e4   :  { %v2998_v52 = vadd.f32 %v7265_v51, %v6537_v50  ;;  %v2979_v54 = vpop.f32.mrb[9].mxu0 }
0x11e5   :  { %v2997_v55 = vadd.f32 %v6537_v50, %v2979_v54 }
0x11e6   :  { %v3000_v57 = vadd.f32 %v2998_v52, %v8262_v35 }
0x11e7   :  { %v2999_v59 = vadd.f32 %v2997_v55, %v8244_v27  ;;  %v3045_v27 = vld [vmem:[%s9123_s18] sm:$0xff] }
0x11e8   :  { %v3006_v60 = vsel %vm222_vm6, %v3000_v57, 0.0  ;;  %v7697_v5 = vpack.c.bf16 %v3046_v4, %v3045_v27 }
0x11e9   :  { %3007 = vadd.xlane.f32.xlu0 %v3006_v60  ;;  %v3003_v61 = vsel %vm222_vm6, %v2999_v59, 0.0 }
0x11ea   :  { %3004 = vadd.xlane.f32.xlu1 %v3003_v61  ;;  %7698 = vmatprep.subr.bf16.mxu1 %v7697_v5 }
0x11eb   :  { %7700 = vmatpush3.bf16.msra.mxu1 %v7697_v5 }
0x11ec   :  { %7702 = vmatprep.subr.bf16.mxu1 %v7701_v8 }
0x11ef   :  { %7704 = vmatpush3.bf16.msra.mxu1 %v7701_v8 }
0x1276   :  { %v3008_v62 = vpop.xlane.xlu0 %3007 }
0x1277   :  { %v3010_v56 = vmul.f32 0.03125, %v3008_v62  ;;  %v3005_v63 = vpop.xlane.xlu1 %3004 }
0x1278   :  { %v3009_v58 = vmul.f32 0.03125, %v3005_v63 }
0x1279   :  { %v3012_v0 = vsub.f32 %v3000_v57, %v3010_v56 }
0x127a   :  { %v3011_v1 = vsub.f32 %v2999_v59, %v3009_v58 }
0x127b   :  { %v3014_v2 = vmul.f32 %v3012_v0, %v3012_v0 }
0x127c   :  { %v3013_v3 = vmul.f32 %v3011_v1, %v3011_v1 }
0x127d   :  { %v3018_v48 = vsel %vm222_vm6, %v3014_v2, 0.0  ;;  %v6543_v2 = vld [vmem:[%s9163_s28] ss:$0 sm:$0xff] }
0x127e   :  { %3019 = vadd.xlane.f32.xlu0 %v3018_v48  ;;  %v3015_v35 = vsel %vm222_vm6, %v3013_v3, 0.0 }
0x127f   :  { %3016 = vadd.xlane.f32.xlu1 %v3015_v35 }
0x130b   :  { %v3020_v9 = vpop.xlane.xlu0 %3019 }
0x130c   :  { %v3022_v10 = vmul.f32 0.03125, %v3020_v9  ;;  %v3017_v46 = vpop.xlane.xlu1 %3016 }
0x130d   :  { %v3021_v11 = vmul.f32 0.03125, %v3017_v46 }
0x130e   :  { %v3024_v53 = vadd.f32 1e-12, %v3022_v10 }
0x130f   :  { %v3023_v12 = vadd.f32 1e-12, %v3021_v11 }
0x1310   :  { %7904 = vrsqrt.f32 %v3024_v53 }
0x1311   :  { %7906 = vrsqrt.f32 %v3023_v12 }
0x131a   :  { %v7905_v13 = vpop.eup %7904 }
0x131b   :  { %v7907_v15 = vpop.eup %7906  ;;  %v3028_v17 = vmul.f32 %v7905_v13, %v3012_v0 }
0x131c   :  { %v3027_v18 = vmul.f32 %v7907_v15, %v3011_v1 }
0x131d   :  { %v3036_v21 = vmul.f32 %v6538_v14, %v3028_v17  ;;  %v6548_v17 = vld [vmem:[%s9157_s29 + $0x80] sm:$0xff] }
0x131e   :  { %v3035_v22 = vmul.f32 %v6538_v14, %v3027_v18  ;;  %v6549_v18 = vld [vmem:[%s9157_s29 + $0x88] sm:$0xff] }
0x131f   :  { %v3044_v24 = vadd.f32 %v6539_v19, %v3036_v21  ;;  %v6564_v21 = vld [vmem:[%s9117_s12 + $0x80] sm:$0xff] }
0x1320   :  { %v3043_v23 = vadd.f32 %v6539_v19, %v3035_v22  ;;  %v7721_v19 = vpack.c.bf16 %v6549_v18, %v6548_v17  ;;  %v6565_v22 = vld [vmem:[%s9117_s12 + $0x88] sm:$0xff] }
0x1322   :  { %7274 = vmatprep.mubr.msk.f32.mxu1 %vm222_vm6, %v3043_v23  ;;  %7722 = vmatprep.subr.bf16.mxu1 %v7721_v19 }
0x1323   :  { %7275 = vmatmul.mubr.msk.f32.vlgmr.msra.gmra.mrb[36].mxu1 %vm222_vm6, %v3044_v24 }
0x1324   :  { %7724 = vmatpush3.bf16.msra.mxu1 %v7721_v19 }
0x13f6   :  { %v7276_v40 = vpop.f32.mrb[36].mxu1 }
0x13f7   :  { %v3134_v41 = vadd.f32 %v7276_v40, %v6540_v39  ;;  %v3128_v42 = vpop.f32.mrb[37].mxu1 }
0x13f8   :  { %v3129_v43 = vadd.f32 %v6540_v39, %v3128_v42  ;;  %v6546_v42 = vld [vmem:[%s9127_s22] ss:$0 sm:$0xff] }
0x13f9   :  { %v3138_v45 = vmul.f32 %v3134_v41, %v3134_v41 }
0x13fa   :  { %v3137_v47 = vmul.f32 %v3129_v43, %v3129_v43 }
0x13fb   :  { %v3140_v49 = vmul.f32 %v3138_v45, %v3134_v41 }
0x13fc   :  { %v3139_v50 = vmul.f32 %v3137_v47, %v3129_v43 }
0x13fd   :  { %v3142_v51 = vmul.f32 0.044715, %v3140_v49  ;;  %v6547_v49 = vld [vmem:[%s9128_s23] ss:$0 sm:$0xff] }
0x13fe   :  { %v3141_v52 = vmul.f32 0.044715, %v3139_v50 }
0x13ff   :  { %v3144_v54 = vadd.f32 %v3142_v51, %v3134_v41 }
0x1400   :  { %v3143_v55 = vadd.f32 %v3141_v52, %v3129_v43  ;;  %v6558_v52 = vld [vmem:[%s9158_s9 + $0x90] sm:$0xff] }
0x1401   :  { %v3146_v57 = vmul.f32 0.7978846, %v3144_v54  ;;  %v6559_v54 = vld [vmem:[%s9158_s9 + $0x98] sm:$0xff] }
0x1402   :  { %v3145_v59 = vmul.f32 0.7978846, %v3143_v55 }
0x1403   :  { %7908 = vtanh.f32 %v3146_v57 }
0x1404   :  { %7910 = vtanh.f32 %v3145_v59  ;;  %v7733_v59 = vpack.c.bf16 %v6559_v54, %v6558_v52  ;;  %v6597_v52 = vld [vmem:[%s9117_s12 + $0xb0] sm:$0xff]  ;;  %v6598_v54 = vld [vmem:[%s9117_s12 + $0xb8] sm:$0xff] }
0x140d   :  { %v7909_v60 = vpop.eup %7908 }
0x140e   :  { %v7911_v61 = vpop.eup %7910  ;;  %v3150_v62 = vadd.f32 1.0, %v7909_v60  ;;  %v6569_v60 = vld [vmem:[%s9118_s13 + $0x4] ss:$0 sm:$0xff] }
0x140f   :  { %v3149_v56 = vadd.f32 1.0, %v7911_v61 }
0x1410   :  { %v3152_v63 = vmul.f32 0.5, %v3150_v62 }
0x1411   :  { %v3151_v58 = vmul.f32 0.5, %v3149_v56 }
0x1412   :  { %v3154_v1 = vmul.f32 %v3152_v63, %v3134_v41 }
0x1413   :  { %v3153_v0 = vmul.f32 %v3151_v58, %v3129_v43 }
0x1415   :  { %7293 = vmatprep.mubr.msk.f32.mxu0 %vm3170_vm9, %v3153_v0  ;;  %v6561_v0 = vld [vmem:[%s9116_s11 + $0x4] ss:$0 sm:$0xff] }
0x1416   :  { %7294 = vmatmul.mubr.msk.f32.vlgmr.msra.gmra.mrb[24].mxu0 %vm3170_vm9, %v3154_v1 }
0x14e9   :  { %v7295_v3 = vpop.f32.mrb[24].mxu0 }
0x14ea   :  { %v3249_v48 = vadd.f32 %v7295_v3, %v6543_v2  ;;  %v3243_v35 = vpop.f32.mrb[25].mxu0  ;;  %v6553_v3 = vld [vmem:[%s9161_s1 + $0x4] ss:$0 sm:$0xff] }
0x14eb   :  { %v3244_v27 = vadd.f32 %v6543_v2, %v3243_v35 }
0x14ec   :  { %v3253_v4 = vadd.f32 %v3249_v48, %v3044_v24  ;;  %v6550_v24 = vld [vmem:[%s9157_s29 + $0x90] sm:$0xff] }
0x14ed   :  { %v3252_v5 = vadd.f32 %v3244_v27, %v3043_v23  ;;  %v7737_v23 = vpack.c.bf16 %v6565_v22, %v6564_v21  ;;  %v7725_v25 = vpack.c.bf16 %v6551_v31, %v6550_v24 }
0x14ee   :  { %v3259_v6 = vsel %vm222_vm6, %v3253_v4, 0.0 }
0x14ef   :  { %3260 = vadd.xlane.f32.xlu0 %v3259_v6  ;;  %v3256_v7 = vsel %vm222_vm6, %v3252_v5, 0.0  ;;  %7738 = vmatprep.subr.bf16.mxu0 %v7737_v23 }
0x14f0   :  { %3257 = vadd.xlane.f32.xlu1 %v3256_v7  ;;  %7740 = vmatpush3.bf16.msra.mxu0 %v7737_v23 }
0x14f1   :  { %7726 = vmatprep.subr.bf16.mxu1 %v7725_v25  ;;  %7742 = vmatprep.subr.bf16.mxu0 %v7741_v29 }
0x14f2   :  { %7728 = vmatpush3.bf16.msra.mxu1 %v7725_v25  ;;  %v6579_v25 = vld [vmem:[%s9157_s29 + $0xa0] sm:$0xff] }
0x14f3   :  { %7730 = vmatprep.subr.bf16.mxu1 %v7729_v33  ;;  %v7745_v28 = vpack.c.bf16 %v6580_v26, %v6579_v25 }
0x14f4   :  { %7744 = vmatpush3.bf16.msra.mxu0 %v7741_v29  ;;  %v6587_v29 = vld [vmem:[%s9158_s9 + $0xa0] sm:$0xff] }
0x14f5   :  { %7339 = vmatprep.subr.mxu0 %v7988_v44  ;;  %v7753_v32 = vpack.c.bf16 %v6588_v30, %v6587_v29  ;;  %v6614_v30 = vld [vmem:[%s9157_s29 + $0xc0] sm:$0xff] }
0x157c   :  { %v3261_v8 = vpop.xlane.xlu0 %3260 }
0x157d   :  { %v3263_v9 = vmul.f32 0.03125, %v3261_v8  ;;  %v3258_v10 = vpop.xlane.xlu1 %3257 }
0x157e   :  { %v3262_v46 = vmul.f32 0.03125, %v3258_v10 }
0x157f   :  { %v3265_v11 = vsub.f32 %v3253_v4, %v3263_v9 }
0x1580   :  { %v3264_v53 = vsub.f32 %v3252_v5, %v3262_v46 }
0x1581   :  { %v3267_v12 = vmul.f32 %v3265_v11, %v3265_v11 }
0x1582   :  { %v3266_v13 = vmul.f32 %v3264_v53, %v3264_v53 }
0x1583   :  { %v3271_v14 = vsel %vm222_vm6, %v3267_v12, 0.0 }
0x1584   :  { %3272 = vadd.xlane.f32.xlu0 %v3271_v14  ;;  %v3268_v15 = vsel %vm222_vm6, %v3266_v13, 0.0 }
0x1585   :  { %3269 = vadd.xlane.f32.xlu1 %v3268_v15 }
0x1611   :  { %v3273_v34 = vpop.xlane.xlu0 %3272 }
0x1612   :  { %v3275_v36 = vmul.f32 0.03125, %v3273_v34  ;;  %v3270_v37 = vpop.xlane.xlu1 %3269 }
0x1613   :  { %v3274_v38 = vmul.f32 0.03125, %v3270_v37  ;;  %v6582_v37 = vld [vmem:[%s9157_s29 + $0xb8] sm:$0xff] }
0x1614   :  { %v3277_v39 = vadd.f32 1e-12, %v3275_v36  ;;  %v6581_v36 = vld [vmem:[%s9157_s29 + $0xb0] sm:$0xff] }
0x1615   :  { %v3276_v40 = vadd.f32 1e-12, %v3274_v38 }
0x1616   :  { %7912 = vrsqrt.f32 %v3277_v39 }
0x1617   :  { %7914 = vrsqrt.f32 %v3276_v40  ;;  %v7749_v40 = vpack.c.bf16 %v6582_v37, %v6581_v36 }
0x1620   :  { %v7913_v41 = vpop.eup %7912 }
0x1621   :  { %v7915_v43 = vpop.eup %7914  ;;  %v3281_v45 = vmul.f32 %v7913_v41, %v3265_v11  ;;  %v6589_v41 = vld [vmem:[%s9158_s9 + $0xb0] sm:$0xff] }
0x1622   :  { %v3280_v47 = vmul.f32 %v7915_v43, %v3264_v53  ;;  %v6595_v43 = vld [vmem:[%s9117_s12 + $0xa0] sm:$0xff] }
0x1623   :  { %v3289_v50 = vmul.f32 %v6546_v42, %v3281_v45  ;;  %v6596_v45 = vld [vmem:[%s9117_s12 + $0xa8] sm:$0xff] }
0x1624   :  { %v3288_v51 = vmul.f32 %v6546_v42, %v3280_v47  ;;  %v6590_v42 = vld [vmem:[%s9158_s9 + $0xb8] sm:$0xff] }
0x1625   :  { %v8689_v57 = vadd.f32 %v6547_v49, %v3289_v50  ;;  %v7757_v50 = vpack.c.bf16 %v6590_v42, %v6589_v41 }
0x1626   :  { %v8687_v55 = vadd.f32 %v6547_v49, %v3288_v51  ;;  %v7761_v51 = vpack.c.bf16 %v6596_v45, %v6595_v43  ;;  %v6630_v45 = vld [vmem:[%s9117_s12 + $0xc0] sm:$0xff] }
0x1628   :  { %7304 = vmatprep.mubr.msk.f32.mxu1 %vm222_vm6, %v8687_v55  ;;  %7326 = vmatprep.mubr.msk.f32.mxu0 %vm222_vm6, %v8687_v55 }
0x1629   :  { %7305 = vmatmul.mubr.msk.f32.vlgmr.msra.gmra.mrb[38].mxu1 %vm222_vm6, %v8689_v57  ;;  %7327 = vmatmul.mubr.msk.f32.vlgmr.msra.gmra.mrb[26].mxu0 %vm222_vm6, %v8689_v57 }
0x162a   :  { %7732 = vmatpush3.bf16.msra.mxu1 %v7729_v33  ;;  %7315 = vmatprep.mubr.msk.f32.mxu1 %vm222_vm6, %v8687_v55 }
0x162b   :  { %7734 = vmatprep.subr.bf16.mxu1 %v7733_v59  ;;  %7341 = vmatprep.mubr.msk.f32.mxu0 %vm7989_vm7, %v7988_v44 }
0x162e   :  { %7736 = vmatpush3.bf16.msra.mxu1 %v7733_v59  ;;  %v7765_v59 = vpack.c.bf16 %v6598_v54, %v6597_v52  ;;  %v6609_v54 = vld [vmem:[%s9119_s14 + $0x28] sm:$0xff] }
0x162f   :  { %7329 = vmatprep.subr.mxu1 %v7988_v44 }
0x1631   :  { %7316 = vmatmul.mubr.msk.f32.vlgmr.msra.gmra.mrb[40].mxu1 %vm222_vm6, %v8689_v57 }
0x1632   :  { %7331 = vmatprep.mubr.msk.f32.mxu1 %vm7989_vm7, %v7988_v44 }
0x16fc   :  { %v7306_v61 = vpop.f32.mrb[38].mxu1  ;;  %v7328_v62 = vpop.f32.mrb[26].mxu0 }
0x16fd   :  { %v3383_v56 = vpop.f32.mrb[39].mxu1  ;;  %v3559_v63 = vpop.f32.mrb[27].mxu0  ;;  %v3389_v4 = vadd.f32 %v7306_v61, %v6553_v3  ;;  %v3565_v5 = vadd.f32 %v7328_v62, %v6569_v60 }
0x16fe   :  { %v3560_v58 = vadd.f32 %v6569_v60, %v3559_v63  ;;  %v3384_v35 = vadd.f32 %v6553_v3, %v3383_v56  ;;  %v6584_v3 = vld [vmem:[%s9161_s1 + $0x5] ss:$0 sm:$0xff] }
0x1700   :  { %7340 = vmatpush3.msra.mxu0 %v3560_v58 }
0x1701   :  { %7746 = vmatprep.subr.bf16.mxu0 %v7745_v28 }
0x1704   :  { %v7317_v1 = vpop.f32.mrb[40].mxu1 }
0x1705   :  { %v3471_v2 = vpop.f32.mrb[41].mxu1  ;;  %v3477_v27 = vadd.f32 %v7317_v1, %v6561_v0 }
0x1706   :  { %v3472_v48 = vadd.f32 %v6561_v0, %v3471_v2  ;;  %v6592_v0 = vld [vmem:[%s9116_s11 + $0x5] ss:$0 sm:$0xff] }
0x1708   :  { %7330 = vmatpush3.xpose.msk.msra.mxu1 %vm556_vm8, %v3472_v48 }
0x1709   :  { %7334 = vmatprep.subr.mxu1 %v7988_v44 }
0x170b   :  { %7332 = vmatmul.mubr.msk.f32.vlgmr.msra.gmra.mrb[42].mxu1 %vm556_vm8, %v3384_v35  ;;  %v6600_v35 = vld [vmem:[%s9118_s13 + $0x5] ss:$0 sm:$0xff] }
0x170c   :  { %7335 = vmatpush3.xpose.msk.msra.mxu1 %vm556_vm8, %v3477_v27  ;;  %7336 = vmatprep.mubr.msk.f32.mxu1 %vm7989_vm7, %v7988_v44 }
0x170d   :  { %7344 = vmatprep.subr.mxu1 %v7988_v44 }
0x170f   :  { %7337 = vmatmul.mubr.msk.f32.vlgmr.msra.gmra.mrb[44].mxu1 %vm556_vm8, %v3389_v4 }
0x1710   :  { %7345 = vmatpush3.msra.mxu1 %v3565_v5  ;;  %7346 = vmatprep.mubr.msk.f32.mxu1 %vm7989_vm7, %v7988_v44 }
0x1711   :  { %7754 = vmatprep.subr.bf16.mxu1 %v7753_v32 }
0x17de   :  { %v3640_v6 = vpop.f32.mrb[42].mxu1 }
0x17df   :  { %v3720_v7 = vmul.f32 0.35355338, %v3640_v6  ;;  %v7333_v8 = vpop.f32.mrb[43].mxu1 }
0x17e1   :  { %v3722_v9 = vadd.f32 %v3720_v7, %v8331_v16 }
0x17e2   :  { %v3716_v10 = vpop.f32.mrb[44].mxu1 }
0x17e3   :  { %v3721_v46 = vmul.f32 0.35355338, %v3716_v10  ;;  %v7338_v11 = vpop.f32.mrb[45].mxu1  ;;  %v3724_v53 = vsel %vm556_vm8, %v3722_v9, -inf }
0x17e4   :  { %3725 = vmax.xlane.f32.xlu0 %v3724_v53 }
0x17e5   :  { %v3723_v12 = vadd.f32 %v3721_v46, %v8333_v20 }
0x17e7   :  { %v3727_v13 = vsel %vm556_vm8, %v3723_v12, -inf }
0x17e8   :  { %3728 = vmax.xlane.f32.xlu1 %v3727_v13 }
0x1871   :  { %v3726_v14 = vpop.xlane.xlu0 %3725 }
0x1872   :  { %v3730_v15 = vsub.f32 %v3722_v9, %v3726_v14 }
0x1874   :  { %v3732_v17 = vmul.f32 1.442695, %v3730_v15 }
0x1875   :  { %v3729_v18 = vpop.xlane.xlu1 %3728 }
0x1876   :  { %7916 = vpow2.f32 %v3732_v17  ;;  %v3731_v19 = vsub.f32 %v3723_v12, %v3729_v18 }
0x1878   :  { %v3734_v21 = vmul.f32 1.442695, %v3731_v19 }
0x187a   :  { %7918 = vpow2.f32 %v3734_v21 }
0x1880   :  { %v7917_v22 = vpop.eup %7916 }
0x1881   :  { %v3736_v23 = vsel %vm556_vm8, %v7917_v22, 0.0 }
0x1882   :  { %3737 = vadd.xlane.f32.xlu0 %v3736_v23 }
0x1884   :  { %v7919_v24 = vpop.eup %7918 }
0x1885   :  { %v3739_v31 = vsel %vm556_vm8, %v7919_v24, 0.0 }
0x1886   :  { %3740 = vadd.xlane.f32.xlu1 %v3739_v31 }
0x190f   :  { %v3738_v33 = vpop.xlane.xlu0 %3737 }
0x1910   :  { %7920 = vrcp.f32 %v3738_v33 }
0x1913   :  { %v3741_v34 = vpop.xlane.xlu1 %3740 }
0x1914   :  { %7922 = vrcp.f32 %v3741_v34 }
0x191a   :  { %v7921_v38 = vpop.eup %7920 }
0x191b   :  { %v3744_v39 = vmul.f32 %v7921_v38, %v7917_v22 }
0x191d   :  { %7342 = vmatmul.mubr.msk.f32.vlgmr.msra.gmra.mrb[28].mxu0 %vm556_vm8, %v3744_v39  ;;  %v6616_v39 = vld [vmem:[%s9157_s29 + $0xd0] sm:$0xff] }
0x191e   :  { %v7923_v47 = vpop.eup %7922  ;;  %7748 = vmatpush3.bf16.msra.mxu0 %v7745_v28  ;;  %7357 = vmatprep.mubr.msk.f32.mxu0 %vm222_vm6, %v8687_v55 }
0x191f   :  { %v3745_v49 = vmul.f32 %v7923_v47, %v7919_v24  ;;  %7750 = vmatprep.subr.bf16.mxu0 %v7749_v40  ;;  %v6631_v47 = vld [vmem:[%s9117_s12 + $0xc8] sm:$0xff] }
0x1921   :  { %7347 = vmatmul.mubr.msk.f32.vlgmr.msra.gmra.mrb[46].mxu1 %vm556_vm8, %v3745_v49  ;;  %v7785_v49 = vpack.c.bf16 %v6631_v47, %v6630_v45  ;;  %v6649_v45 = vld [vmem:[%s9157_s29 + $0xf0] sm:$0xff]  ;;  %v6650_v47 = vld [vmem:[%s9157_s29 + $0xf8] sm:$0xff] }
0x1922   :  { %7752 = vmatpush3.bf16.msra.mxu0 %v7749_v40  ;;  %7756 = vmatpush3.bf16.msra.mxu1 %v7753_v32  ;;  %v6615_v32 = vld [vmem:[%s9157_s29 + $0xc8] sm:$0xff]  ;;  %v6617_v40 = vld [vmem:[%s9157_s29 + $0xd8] sm:$0xff] }
0x1923   :  { %7368 = vmatprep.mubr.msk.f32.mxu1 %vm222_vm6, %v8687_v55  ;;  %7758 = vmatprep.subr.bf16.mxu1 %v7757_v50  ;;  %v7769_v33 = vpack.c.bf16 %v6615_v32, %v6614_v30  ;;  %v7773_v43 = vpack.c.bf16 %v6617_v40, %v6616_v39  ;;  %v6648_v39 = vld [vmem:[%s9157_s29 + $0xe8] sm:$0xff] }
0x1924   :  { %7762 = vmatprep.subr.bf16.mxu0 %v7761_v51 }
0x1925   :  { %7358 = vmatmul.mubr.msk.f32.vlgmr.msra.gmra.mrb[30].mxu0 %vm222_vm6, %v8689_v57 }
0x1926   :  { %7760 = vmatpush3.bf16.msra.mxu1 %v7757_v50  ;;  %7764 = vmatpush3.bf16.msra.mxu0 %v7761_v51  ;;  %v6632_v50 = vld [vmem:[%s9117_s12 + $0xd0] sm:$0xff]  ;;  %v6633_v51 = vld [vmem:[%s9117_s12 + $0xd8] sm:$0xff] }
0x1927   :  { %7379 = vmatprep.mubr.msk.f32.mxu0 %vm222_vm6, %v8687_v55  ;;  %7766 = vmatprep.subr.bf16.mxu0 %v7765_v59  ;;  %v7789_v52 = vpack.c.bf16 %v6633_v51, %v6632_v50 }
0x1928   :  { %7382 = vmatprep.subr.mxu1 %v7988_v44 }
0x1929   :  { %7369 = vmatmul.mubr.msk.f32.vlgmr.msra.gmra.mrb[48].mxu1 %vm222_vm6, %v8689_v57 }
0x192a   :  { %7768 = vmatpush3.bf16.msra.mxu0 %v7765_v59  ;;  %7384 = vmatprep.mubr.msk.f32.mxu1 %vm7989_vm7, %v7988_v44  ;;  %v6578_v59 = vld [vmem:[%s9119_s14 + $0x20] sm:$0xff] }
0x192b   :  { %7392 = vmatprep.subr.mxu0 %v7988_v44 }
0x192d   :  { %7380 = vmatmul.mubr.msk.f32.vlgmr.msra.gmra.mrb[32].mxu0 %vm222_vm6, %v8689_v57 }
0x192e   :  { %7394 = vmatprep.mubr.msk.f32.mxu0 %vm7989_vm7, %v7988_v44 }
0x19f0   :  { %v8789_v60 = vpop.f32.mrb[28].mxu0 }
0x19f1   :  { %v7343_v61 = vpop.f32.mrb[29].mxu0 }
0x19f4   :  { %v8791_v62 = vpop.f32.mrb[46].mxu1 }
0x19f5   :  { %v7348_v56 = vpop.f32.mrb[47].mxu1 }
0x19f6   :  { %v6622_v56 = vld [vmem:[%s9158_s9 + $0xc0] sm:$0xff] }
0x19f8   :  { %v7359_v63 = vpop.f32.mrb[30].mxu0 }
0x19f9   :  { %v3973_v58 = vpop.f32.mrb[31].mxu0  ;;  %v3979_v8 = vadd.f32 %v7359_v63, %v6584_v3  ;;  %v6623_v63 = vld [vmem:[%s9158_s9 + $0xc8] sm:$0xff] }
0x19fa   :  { %v3974_v4 = vadd.f32 %v6584_v3, %v3973_v58  ;;  %v6624_v3 = vld [vmem:[%s9158_s9 + $0xd0] sm:$0xff] }
0x19fc   :  { %v7370_v1 = vpop.f32.mrb[48].mxu1 }
0x19fd   :  { %v4061_v2 = vpop.f32.mrb[49].mxu1  ;;  %v4067_v6 = vadd.f32 %v7370_v1, %v6592_v0 }
0x19fe   :  { %v4062_v48 = vadd.f32 %v6592_v0, %v4061_v2  ;;  %v7777_v0 = vpack.c.bf16 %v6623_v63, %v6622_v56  ;;  %v6665_v63 = vld [vmem:[%s9117_s12 + $0xf0] sm:$0xff] }
0x1a00   :  { %v7381_v27 = vpop.f32.mrb[32].mxu0  ;;  %7383 = vmatpush3.xpose.msk.msra.mxu1 %vm556_vm8, %v4062_v48  ;;  %v6625_v48 = vld [vmem:[%s9158_s9 + $0xd8] sm:$0xff] }
0x1a01   :  { %v4149_v5 = vpop.f32.mrb[33].mxu0  ;;  %7387 = vmatprep.subr.mxu1 %v7988_v44  ;;  %v4155_v9 = vadd.f32 %v7381_v27, %v6600_v35 }
0x1a02   :  { %v4150_v7 = vadd.f32 %v6600_v35, %v4149_v5  ;;  %v7781_v35 = vpack.c.bf16 %v6625_v48, %v6624_v3  ;;  %v6657_v48 = vld [vmem:[%s9158_s9 + $0xf0] sm:$0xff] }
0x1a03   :  { %7385 = vmatmul.mubr.msk.f32.vlgmr.msra.gmra.mrb[50].mxu1 %vm556_vm8, %v3974_v4 }
0x1a04   :  { %7388 = vmatpush3.xpose.msk.msra.mxu1 %vm556_vm8, %v4067_v6  ;;  %7393 = vmatpush3.msra.mxu0 %v4150_v7  ;;  %v6619_v7 = vld [vmem:[%s9161_s1 + $0x6] ss:$0 sm:$0xff] }
0x1a05   :  { %7389 = vmatprep.mubr.msk.f32.mxu1 %vm7989_vm7, %v7988_v44  ;;  %7397 = vmatprep.subr.mxu1 %v7988_v44 }
0x1a06   :  { %7402 = vmatprep.subr.mxu0 %v6609_v54 }
0x1a07   :  { %7390 = vmatmul.mubr.msk.f32.vlgmr.msra.gmra.mrb[52].mxu1 %vm556_vm8, %v3979_v8 }
0x1a08   :  { %7398 = vmatpush3.msra.mxu1 %v4155_v9  ;;  %7399 = vmatprep.mubr.msk.f32.mxu1 %vm7989_vm7, %v7988_v44 }
0x1a09   :  { %7770 = vmatprep.subr.bf16.mxu1 %v7769_v33 }
0x1ad6   :  { %v4230_v10 = vpop.f32.mrb[50].mxu1 }
0x1ad7   :  { %v4310_v46 = vmul.f32 0.35355338, %v4230_v10  ;;  %v7386_v11 = vpop.f32.mrb[51].mxu1  ;;  %v6635_v10 = vld [vmem:[%s9118_s13 + $0x6] ss:$0 sm:$0xff] }
0x1ad9   :  { %v4312_v53 = vadd.f32 %v4310_v46, %v8331_v16 }
0x1ada   :  { %v4306_v12 = vpop.f32.mrb[52].mxu1 }
0x1adb   :  { %v4311_v13 = vmul.f32 0.35355338, %v4306_v12  ;;  %v7391_v14 = vpop.f32.mrb[53].mxu1  ;;  %v4314_v15 = vsel %vm556_vm8, %v4312_v53, -inf }
0x1adc   :  { %4315 = vmax.xlane.f32.xlu1 %v4314_v15 }
0x1add   :  { %v4313_v17 = vadd.f32 %v4311_v13, %v8333_v20 }
0x1adf   :  { %v4317_v18 = vsel %vm556_vm8, %v4313_v17, -inf }
0x1ae0   :  { %4318 = vmax.xlane.f32.xlu0 %v4317_v18 }
0x1b69   :  { %v4316_v19 = vpop.xlane.xlu1 %4315 }
0x1b6a   :  { %v4320_v21 = vsub.f32 %v4312_v53, %v4316_v19 }
0x1b6c   :  { %v4322_v22 = vmul.f32 1.442695, %v4320_v21 }
0x1b6d   :  { %v4319_v23 = vpop.xlane.xlu0 %4318 }
0x1b6e   :  { %7924 = vpow2.f32 %v4322_v22  ;;  %v4321_v24 = vsub.f32 %v4313_v17, %v4319_v23 }
0x1b70   :  { %v4324_v31 = vmul.f32 1.442695, %v4321_v24 }
0x1b72   :  { %7926 = vpow2.f32 %v4324_v31 }
0x1b78   :  { %v7925_v25 = vpop.eup %7924 }
0x1b79   :  { %v4326_v26 = vsel %vm556_vm8, %v7925_v25, 0.0 }
0x1b7a   :  { %4327 = vadd.xlane.f32.xlu1 %v4326_v26 }
0x1b7c   :  { %v7927_v28 = vpop.eup %7926 }
0x1b7d   :  { %v4329_v29 = vsel %vm556_vm8, %v7927_v28, 0.0 }
0x1b7e   :  { %4330 = vadd.xlane.f32.xlu0 %v4329_v29 }
0x1c07   :  { %v4328_v34 = vpop.xlane.xlu1 %4327 }
0x1c08   :  { %7928 = vrcp.f32 %v4328_v34 }
0x1c0b   :  { %v4331_v36 = vpop.xlane.xlu0 %4330 }
0x1c0c   :  { %7930 = vrcp.f32 %v4331_v36 }
0x1c12   :  { %v7929_v37 = vpop.eup %7928 }
0x1c13   :  { %v4334_v38 = vmul.f32 %v7929_v37, %v7925_v25 }
0x1c15   :  { %7395 = vmatmul.mubr.msk.f32.vlgmr.msra.gmra.mrb[34].mxu0 %vm556_vm8, %v4334_v38  ;;  %v6647_v38 = vld [vmem:[%s9157_s29 + $0xe0] sm:$0xff] }
0x1c16   :  { %v7931_v41 = vpop.eup %7930  ;;  %7403 = vmatpush3.msra.mxu0 %v6609_v54  ;;  %v7793_v40 = vpack.c.bf16 %v6648_v39, %v6647_v38 }
0x1c17   :  { %v4335_v42 = vmul.f32 %v7931_v41, %v7927_v28  ;;  %7407 = vmatprep.subr.mxu0 %v6578_v59  ;;  %v6644_v41 = vld [vmem:[%s9119_s14 + $0x30] sm:$0xff] }
0x1c19   :  { %7400 = vmatmul.mubr.msk.f32.vlgmr.msra.gmra.mrb[54].mxu1 %vm556_vm8, %v4335_v42 }
0x1c1a   :  { %7772 = vmatpush3.bf16.msra.mxu1 %v7769_v33  ;;  %7420 = vmatprep.mubr.msk.f32.mxu1 %vm222_vm6, %v8687_v55 }
0x1c1b   :  { %7774 = vmatprep.subr.bf16.mxu1 %v7773_v43 }
0x1c1e   :  { %7776 = vmatpush3.bf16.msra.mxu1 %v7773_v43 }
0x1c1f   :  { %7786 = vmatprep.subr.bf16.mxu1 %v7785_v49 }
0x1c21   :  { %7421 = vmatmul.mubr.msk.f32.vlgmr.msra.gmra.mrb[56].mxu1 %vm222_vm6, %v8689_v57 }
0x1c22   :  { %7788 = vmatpush3.bf16.msra.mxu1 %v7785_v49  ;;  %7442 = vmatprep.mubr.msk.f32.mxu1 %vm222_vm6, %v8687_v55 }
0x1c23   :  { %7790 = vmatprep.subr.bf16.mxu1 %v7789_v52 }
0x1c26   :  { %7792 = vmatpush3.bf16.msra.mxu1 %v7789_v52  ;;  %v7797_v52 = vpack.c.bf16 %v6650_v47, %v6649_v45 }
0x1c27   :  { %7450 = vmatprep.subr.mxu1 %v7988_v44 }
0x1c29   :  { %7443 = vmatmul.mubr.msk.f32.vlgmr.msra.gmra.mrb[58].mxu1 %vm222_vm6, %v8689_v57 }
0x1c2a   :  { %7452 = vmatprep.mubr.msk.f32.mxu1 %vm7989_vm7, %v7988_v44 }
0x1ce8   :  { %v4405_v61 = vpop.f32.mrb[34].mxu0 }
0x1ce9   :  { %v7396_v58 = vpop.f32.mrb[35].mxu0  ;;  %7404 = vmatprep.mubr.msk.f32.mxu0 %vm556_vm8, %v4405_v61  ;;  %v6664_v61 = vld [vmem:[%s9117_s12 + $0xe8] sm:$0xff] }
0x1cea   :  { %v6666_v58 = vld [vmem:[%s9117_s12 + $0xf8] sm:$0xff] }
0x1cec   :  { %v4478_v1 = vpop.f32.mrb[54].mxu1 }
0x1ced   :  { %v7401_v2 = vpop.f32.mrb[55].mxu1  ;;  %7405 = vmatmul.mubr.msk.f32.vlgmr.msra.gmra.mrb[36].mxu0 %vm556_vm8, %v4478_v1  ;;  %v6655_v1 = vld [vmem:[%s9158_s9 + $0xe0] sm:$0xff] }
0x1cee   :  { %7408 = vmatpush3.msra.mxu0 %v6578_v59  ;;  %7409 = vmatprep.mubr.msk.f32.mxu0 %vm556_vm8, %v8789_v60  ;;  %v6663_v59 = vld [vmem:[%s9117_s12 + $0xe0] sm:$0xff]  ;;  %v6656_v2 = vld [vmem:[%s9158_s9 + $0xe8] sm:$0xff] }
0x1cef   :  { %7778 = vmatprep.subr.bf16.mxu0 %v7777_v0  ;;  %v7809_v56 = vpack.c.bf16 %v6664_v61, %v6663_v59  ;;  %v7801_v3 = vpack.c.bf16 %v6656_v2, %v6655_v1  ;;  %v6681_v61 = vld [vmem:[%s9120_s15 + $0x1] ss:$0 sm:$0xff] }
0x1cf4   :  { %v7422_v27 = vpop.f32.mrb[56].mxu1 }
0x1cf5   :  { %v4725_v4 = vpop.f32.mrb[57].mxu1  ;;  %7410 = vmatmul.mubr.msk.f32.vlgmr.msra.gmra.mrb[36].mxu0 %vm556_vm8, %v8791_v62  ;;  %v6627_v62 = vld [vmem:[%s9116_s11 + $0x6] ss:$0 sm:$0xff]  ;;  %v4731_v11 = vadd.f32 %v7422_v27, %v6619_v7 }
0x1cf6   :  { %7780 = vmatpush3.bf16.msra.mxu0 %v7777_v0  ;;  %7431 = vmatprep.mubr.msk.f32.mxu0 %vm222_vm6, %v8687_v55  ;;  %v4726_v53 = vadd.f32 %v6619_v7, %v4725_v4  ;;  %v7813_v0 = vpack.c.bf16 %v6666_v58, %v6665_v63 }
0x1cf7   :  { %7782 = vmatprep.subr.bf16.mxu0 %v7781_v35 }
0x1cfa   :  { %7784 = vmatpush3.bf16.msra.mxu0 %v7781_v35  ;;  %v6658_v35 = vld [vmem:[%s9158_s9 + $0xf8] sm:$0xff] }
0x1cfb   :  { %7445 = vmatprep.subr.mxu0 %v7988_v44 }
0x1cfc   :  { %v7444_v60 = vpop.f32.mrb[58].mxu1 }
0x1cfd   :  { %7432 = vmatmul.mubr.msk.f32.vlgmr.msra.gmra.mrb[38].mxu0 %vm222_vm6, %v8689_v57  ;;  %v4901_v5 = vpop.f32.mrb[59].mxu1  ;;  %v4907_v12 = vadd.f32 %v7444_v60, %v6635_v10 }
0x1cfe   :  { %7447 = vmatprep.mubr.msk.f32.mxu0 %vm7989_vm7, %v7988_v44  ;;  %v4902_v13 = vadd.f32 %v6635_v10, %v4901_v5  ;;  %v7805_v5 = vpack.c.bf16 %v6658_v35, %v6657_v48 }
0x1dd0   :  { %v7433_v6 = vpop.f32.mrb[38].mxu0 }
0x1dd1   :  { %v4819_v8 = vadd.f32 %v7433_v6, %v6627_v62  ;;  %v4813_v9 = vpop.f32.mrb[39].mxu0 }
0x1dd2   :  { %v4814_v46 = vadd.f32 %v6627_v62, %v4813_v9 }
0x1dd3   :  { %7451 = vmatpush3.xpose.msk.msra.mxu1 %vm556_vm8, %v4819_v8  ;;  %v6668_v8 = vld [vmem:[%s9118_s13 + $0x7] ss:$0 sm:$0xff] }
0x1dd4   :  { %7446 = vmatpush3.xpose.msk.msra.mxu0 %vm556_vm8, %v4814_v46  ;;  %7460 = vmatprep.subr.mxu1 %v7988_v44 }
0x1dd5   :  { %7455 = vmatprep.subr.mxu0 %v7988_v44 }
0x1dd6   :  { %7453 = vmatmul.mubr.msk.f32.vlgmr.msra.gmra.mrb[60].mxu1 %vm556_vm8, %v4731_v11 }
0x1dd7   :  { %7448 = vmatmul.mubr.msk.f32.vlgmr.msra.gmra.mrb[40].mxu0 %vm556_vm8, %v4726_v53  ;;  %7461 = vmatpush3.msra.mxu1 %v4907_v12  ;;  %v6660_v53 = vld [vmem:[%s9116_s11 + $0x7] ss:$0 sm:$0xff] }
0x1dd8   :  { %7456 = vmatpush3.msra.mxu0 %v4902_v13  ;;  %7462 = vmatprep.mubr.msk.f32.mxu1 %vm7989_vm7, %v7988_v44 }
0x1dd9   :  { %7457 = vmatprep.mubr.msk.f32.mxu0 %vm7989_vm7, %v7988_v44  ;;  %7794 = vmatprep.subr.bf16.mxu1 %v7793_v40 }
0x1dda   :  { %7465 = vmatprep.subr.mxu0 %v6644_v41 }
0x1ea9   :  { %v5058_v14 = vpop.f32.mrb[60].mxu1 }
0x1eaa   :  { %v5063_v15 = vmul.f32 0.35355338, %v5058_v14  ;;  %v4982_v17 = vpop.f32.mrb[40].mxu0  ;;  %v7454_v18 = vpop.f32.mrb[61].mxu1  ;;  %v6652_v14 = vld [vmem:[%s9161_s1 + $0x7] ss:$0 sm:$0xff] }
0x1eab   :  { %v5062_v19 = vmul.f32 0.35355338, %v4982_v17  ;;  %v7449_v21 = vpop.f32.mrb[41].mxu0 }
0x1eac   :  { %v5065_v22 = vadd.f32 %v5063_v15, %v8333_v20 }
0x1ead   :  { %v5064_v23 = vadd.f32 %v5062_v19, %v8331_v16 }
0x1eae   :  { %v5069_v24 = vsel %vm556_vm8, %v5065_v22, -inf }
0x1eaf   :  { %5070 = vmax.xlane.f32.xlu0 %v5069_v24  ;;  %v5066_v31 = vsel %vm556_vm8, %v5064_v23, -inf }
0x1eb0   :  { %5067 = vmax.xlane.f32.xlu1 %v5066_v31 }
0x1f3c   :  { %v5071_v25 = vpop.xlane.xlu0 %5070 }
0x1f3d   :  { %v5073_v26 = vsub.f32 %v5065_v22, %v5071_v25  ;;  %v5068_v28 = vpop.xlane.xlu1 %5067 }
0x1f3e   :  { %v5072_v29 = vsub.f32 %v5064_v23, %v5068_v28 }
0x1f3f   :  { %v5076_v30 = vmul.f32 1.442695, %v5073_v26 }
0x1f40   :  { %v5074_v32 = vmul.f32 1.442695, %v5072_v29 }
0x1f41   :  { %7932 = vpow2.f32 %v5076_v30 }
0x1f42   :  { %7934 = vpow2.f32 %v5074_v32 }
0x1f4b   :  { %v7933_v33 = vpop.eup %7932 }
0x1f4c   :  { %v7935_v34 = vpop.eup %7934  ;;  %v5081_v36 = vsel %vm556_vm8, %v7933_v33, 0.0 }
0x1f4d   :  { %5082 = vadd.xlane.f32.xlu0 %v5081_v36  ;;  %v5078_v37 = vsel %vm556_vm8, %v7935_v34, 0.0 }
0x1f4e   :  { %5079 = vadd.xlane.f32.xlu1 %v5078_v37 }
0x1fda   :  { %v5083_v42 = vpop.xlane.xlu0 %5082 }
0x1fdb   :  { %7936 = vrcp.f32 %v5083_v42  ;;  %v5080_v43 = vpop.xlane.xlu1 %5079 }
0x1fdc   :  { %7938 = vrcp.f32 %v5080_v43 }
0x1fe5   :  { %v7937_v49 = vpop.eup %7936 }
0x1fe6   :  { %v7939_v50 = vpop.eup %7938  ;;  %v5087_v51 = vmul.f32 %v7937_v49, %v7933_v33 }
0x1fe7   :  { %v5086_v54 = vmul.f32 %v7939_v50, %v7935_v34  ;;  %v6677_v50 = vld [vmem:[%s9119_s14 + $0x38] sm:$0xff] }
0x1fe8   :  { %7463 = vmatmul.mubr.msk.f32.vlgmr.msra.gmra.mrb[62].mxu1 %vm556_vm8, %v5087_v51 }
0x1fe9   :  { %7796 = vmatpush3.bf16.msra.mxu1 %v7793_v40  ;;  %7458 = vmatmul.mubr.msk.f32.vlgmr.msra.gmra.mrb[42].mxu0 %vm556_vm8, %v5086_v54 }
0x1fea   :  { %7478 = vmatprep.mubr.msk.f32.mxu1 %vm222_vm6, %v8687_v55  ;;  %7798 = vmatprep.subr.bf16.mxu1 %v7797_v52 }
0x1feb   :  { %7466 = vmatpush3.msra.mxu0 %v6644_v41 }
0x1fec   :  { %7802 = vmatprep.subr.bf16.mxu0 %v7801_v3 }
0x1fed   :  { %7800 = vmatpush3.bf16.msra.mxu1 %v7797_v52 }
0x1fee   :  { %7810 = vmatprep.subr.bf16.mxu1 %v7809_v56 }
0x1ff0   :  { %7479 = vmatmul.mubr.msk.f32.vlgmr.msra.gmra.mrb[64].mxu1 %vm222_vm6, %v8689_v57 }
0x1ff1   :  { %7812 = vmatpush3.bf16.msra.mxu1 %v7809_v56  ;;  %7500 = vmatprep.mubr.msk.f32.mxu1 %vm222_vm6, %v8687_v55 }
0x1ff2   :  { %7814 = vmatprep.subr.bf16.mxu1 %v7813_v0 }
0x1ff5   :  { %7816 = vmatpush3.bf16.msra.mxu1 %v7813_v0 }
0x1ff6   :  { %7513 = vmatprep.subr.mxu1 %v7988_v44 }
0x1ff8   :  { %7501 = vmatmul.mubr.msk.f32.vlgmr.msra.gmra.mrb[66].mxu1 %vm222_vm6, %v8689_v57 }
0x1ff9   :  { %7515 = vmatprep.mubr.msk.f32.mxu1 %vm7989_vm7, %v7988_v44 }
0x20bb   :  { %v5230_v27 = vpop.f32.mrb[62].mxu1 }
0x20bc   :  { %v5157_v4 = vpop.f32.mrb[42].mxu0  ;;  %v7464_v60 = vpop.f32.mrb[63].mxu1 }
0x20bd   :  { %v7459_v62 = vpop.f32.mrb[43].mxu0  ;;  %7467 = vmatprep.mubr.msk.f32.mxu0 %vm556_vm8, %v5157_v4 }
0x20be   :  { %7468 = vmatmul.mubr.msk.f32.vlgmr.msra.gmra.mrb[36].mxu0 %vm556_vm8, %v5230_v27 }
0x20bf   :  { %7804 = vmatpush3.bf16.msra.mxu0 %v7801_v3  ;;  %7489 = vmatprep.mubr.msk.f32.mxu0 %vm222_vm6, %v8687_v55 }
0x20c0   :  { %7806 = vmatprep.subr.bf16.mxu0 %v7805_v5 }
0x20c3   :  { %v7480_v6 = vpop.f32.mrb[64].mxu1  ;;  %7808 = vmatpush3.bf16.msra.mxu0 %v7805_v5 }
0x20c4   :  { %v5398_v7 = vpop.f32.mrb[65].mxu1  ;;  %7503 = vmatprep.subr.mxu0 %v7988_v44  ;;  %v5404_v19 = vadd.f32 %v7480_v6, %v6652_v14 }
0x20c5   :  { %v5399_v17 = vadd.f32 %v6652_v14, %v5398_v7 }
0x20c6   :  { %7490 = vmatmul.mubr.msk.f32.vlgmr.msra.gmra.mrb[44].mxu0 %vm222_vm6, %v8689_v57 }
0x20c7   :  { %7505 = vmatprep.mubr.msk.f32.mxu0 %vm7989_vm7, %v7988_v44 }
0x20cb   :  { %v7502_v9 = vpop.f32.mrb[66].mxu1 }
0x20cc   :  { %v5580_v10 = vadd.f32 %v7502_v9, %v6668_v8  ;;  %v5574_v46 = vpop.f32.mrb[67].mxu1  ;;  %v6687_v9 = vld [vmem:[%s9123_s18 + $0x28] sm:$0xff] }
0x20cd   :  { %v5575_v11 = vadd.f32 %v6668_v8, %v5574_v46  ;;  %v6688_v46 = vld [vmem:[%s9123_s18 + $0x30] sm:$0xff] }
0x20cf   :  { %7514 = vmatpush3.msra.mxu1 %v5575_v11  ;;  %v6689_v11 = vld [vmem:[%s9123_s18 + $0x38] sm:$0xff] }
0x2199   :  { %v7491_v12 = vpop.f32.mrb[44].mxu0 }
0x219a   :  { %v5486_v13 = vpop.f32.mrb[45].mxu0  ;;  %v5492_v18 = vadd.f32 %v7491_v12, %v6660_v53 }
0x219b   :  { %v5487_v15 = vadd.f32 %v6660_v53, %v5486_v13  ;;  %v7821_v53 = vpack.c.bf16 %v6689_v11, %v6688_v46 }
0x219d   :  { %7504 = vmatpush3.xpose.msk.msra.mxu0 %vm556_vm8, %v5487_v15 }
0x219e   :  { %7508 = vmatprep.subr.mxu0 %v7988_v44 }
0x21a0   :  { %7506 = vmatmul.mubr.msk.f32.vlgmr.msra.gmra.mrb[46].mxu0 %vm556_vm8, %v5399_v17 }
0x21a1   :  { %7509 = vmatpush3.xpose.msk.msra.mxu0 %vm556_vm8, %v5492_v18  ;;  %7510 = vmatprep.mubr.msk.f32.mxu0 %vm7989_vm7, %v7988_v44 }
0x21a2   :  { %7518 = vmatprep.subr.mxu0 %v7988_v44 }
0x21a4   :  { %7511 = vmatmul.mubr.msk.f32.vlgmr.msra.gmra.mrb[48].mxu0 %vm556_vm8, %v5404_v19 }
0x21a5   :  { %7519 = vmatpush3.msra.mxu0 %v5580_v10  ;;  %7520 = vmatprep.mubr.msk.f32.mxu0 %vm7989_vm7, %v7988_v44 }
0x21a6   :  { %7523 = vmatprep.subr.mxu0 %v6677_v50 }
0x2273   :  { %v5655_v21 = vpop.f32.mrb[46].mxu0 }
0x2274   :  { %v5735_v22 = vmul.f32 0.35355338, %v5655_v21  ;;  %v7507_v23 = vpop.f32.mrb[47].mxu0  ;;  %v6684_v21 = vld [vmem:[%s9121_s16 + $0x1] ss:$0 sm:$0xff] }
0x2276   :  { %v5737_v24 = vadd.f32 %v5735_v22, %v8331_v16 }
0x2277   :  { %v5731_v31 = vpop.f32.mrb[48].mxu0 }
0x2278   :  { %v5736_v25 = vmul.f32 0.35355338, %v5731_v31  ;;  %v7512_v26 = vpop.f32.mrb[49].mxu0  ;;  %v5739_v28 = vsel %vm556_vm8, %v5737_v24, -inf  ;;  %v6685_v31 = vld [vmem:[%s9122_s17 + $0x1] ss:$0 sm:$0xff] }
0x2279   :  { %5740 = vmax.xlane.f32.xlu1 %v5739_v28 }
0x227a   :  { %v5738_v29 = vadd.f32 %v5736_v25, %v8333_v20 }
0x227c   :  { %v5742_v30 = vsel %vm556_vm8, %v5738_v29, -inf }
0x227d   :  { %5743 = vmax.xlane.f32.xlu0 %v5742_v30  ;;  %v6694_v30 = vld [vmem:[%s9125_s20 + $0x40] sm:$0xff] }
0x2306   :  { %v5741_v32 = vpop.xlane.xlu1 %5740 }
0x2307   :  { %v5745_v33 = vsub.f32 %v5737_v24, %v5741_v32  ;;  %v6695_v32 = vld [vmem:[%s9125_s20 + $0x48] sm:$0xff] }
0x2309   :  { %v5747_v34 = vmul.f32 1.442695, %v5745_v33  ;;  %v7825_v33 = vpack.c.bf16 %v6695_v32, %v6694_v30 }
0x230a   :  { %v5744_v36 = vpop.xlane.xlu0 %5743 }
0x230b   :  { %7940 = vpow2.f32 %v5747_v34  ;;  %v5746_v37 = vsub.f32 %v5738_v29, %v5744_v36  ;;  %v6696_v34 = vld [vmem:[%s9125_s20 + $0x50] sm:$0xff]  ;;  %v6697_v36 = vld [vmem:[%s9125_s20 + $0x58] sm:$0xff] }
0x230d   :  { %v5749_v38 = vmul.f32 1.442695, %v5746_v37  ;;  %v6698_v37 = vld [vmem:[%s9125_s20 + $0x60] sm:$0xff] }
0x230f   :  { %7942 = vpow2.f32 %v5749_v38  ;;  %v6699_v38 = vld [vmem:[%s9125_s20 + $0x68] sm:$0xff] }
0x2315   :  { %v7941_v16 = vpop.eup %7940 }
0x2316   :  { %v5751_v39 = vsel %vm556_vm8, %v7941_v16, 0.0 }
0x2317   :  { %5752 = vadd.xlane.f32.xlu1 %v5751_v39  ;;  %v6700_v39 = vld [vmem:[%s9125_s20 + $0x70] sm:$0xff] }
0x2319   :  { %v7943_v40 = vpop.eup %7942 }
0x231a   :  { %v5754_v41 = vsel %vm556_vm8, %v7943_v40, 0.0 }
0x231b   :  { %5755 = vadd.xlane.f32.xlu0 %v5754_v41 }
0x23a4   :  { %v5753_v20 = vpop.xlane.xlu1 %5752 }
0x23a5   :  { %7944 = vrcp.f32 %v5753_v20  ;;  %v6691_v20 = vld [vmem:[%s9124_s19 + $0x1] ss:$0 sm:$0xff] }
0x23a8   :  { %v5756_v42 = vpop.xlane.xlu0 %5755 }
0x23a9   :  { %7946 = vrcp.f32 %v5756_v42 }
0x23af   :  { %v7945_v43 = vpop.eup %7944 }
0x23b0   :  { %v5759_v45 = vmul.f32 %v7945_v43, %v7941_v16  ;;  %v7833_v16 = vpack.c.bf16 %v6699_v38, %v6698_v37 }
0x23b2   :  { %7516 = vmatmul.mubr.msk.f32.vlgmr.msra.gmra.mrb[68].mxu1 %vm556_vm8, %v5759_v45 }
0x23b3   :  { %v7947_v47 = vpop.eup %7946 }
0x23b4   :  { %v5760_v49 = vmul.f32 %v7947_v47, %v7943_v40  ;;  %v6701_v40 = vld [vmem:[%s9125_s20 + $0x78] sm:$0xff] }
0x23b5   :  { %v7837_v41 = vpack.c.bf16 %v6701_v40, %v6700_v39 }
0x23b6   :  { %7521 = vmatmul.mubr.msk.f32.vlgmr.msra.gmra.mrb[50].mxu0 %vm556_vm8, %v5760_v49 }
0x23b7   :  { %7524 = vmatpush3.msra.mxu0 %v6677_v50 }
0x23b8   :  { %7826 = vmatprep.subr.bf16.mxu0 %v7825_v33 }
0x2485   :  { %v5830_v51 = vpop.f32.mrb[68].mxu1 }
0x2486   :  { %v7517_v52 = vpop.f32.mrb[69].mxu1  ;;  %7525 = vmatprep.mubr.msk.f32.mxu0 %vm556_vm8, %v5830_v51 }
0x2489   :  { %v5903_v54 = vpop.f32.mrb[50].mxu0 }
0x248a   :  { %v7522_v59 = vpop.f32.mrb[51].mxu0  ;;  %7526 = vmatmul.mubr.msk.f32.vlgmr.msra.gmra.mrb[36].mxu0 %vm556_vm8, %v5903_v54 }
0x248b   :  { %7828 = vmatpush3.bf16.msra.mxu0 %v7825_v33 }
0x255d   :  { %v7527_v56 = vpop.f32.mrb[36].mxu0 }
0x255e   :  { %v6001_v63 = vadd.f32 %v7527_v56, %v6681_v61  ;;  %v5981_v58 = vpop.f32.mrb[37].mxu0 }
0x255f   :  { %v6000_v0 = vadd.f32 %v6681_v61, %v5981_v58 }
0x2560   :  { %v6003_v1 = vadd.f32 %v6001_v63, %v8689_v57 }
0x2561   :  { %v6002_v2 = vadd.f32 %v6000_v0, %v8687_v55  ;;  %v6686_v55 = vld [vmem:[%s9123_s18 + $0x20] sm:$0xff] }
0x2562   :  { %v6011_v3 = vsel %vm222_vm6, %v6003_v1, 0.0  ;;  %v7817_v10 = vpack.c.bf16 %v6687_v9, %v6686_v55 }
0x2563   :  { %6012 = vadd.xlane.f32.xlu0 %v6011_v3  ;;  %v6008_v48 = vsel %vm222_vm6, %v6002_v2, 0.0 }
0x2564   :  { %6009 = vadd.xlane.f32.xlu1 %v6008_v48  ;;  %7818 = vmatprep.subr.bf16.mxu1 %v7817_v10 }
0x2565   :  { %7820 = vmatpush3.bf16.msra.mxu1 %v7817_v10 }
0x2566   :  { %7822 = vmatprep.subr.bf16.mxu1 %v7821_v53 }
0x2569   :  { %7824 = vmatpush3.bf16.msra.mxu1 %v7821_v53 }
0x25f0   :  { %v6013_v35 = vpop.xlane.xlu0 %6012 }
0x25f1   :  { %v6015_v27 = vmul.f32 0.03125, %v6013_v35  ;;  %v6010_v4 = vpop.xlane.xlu1 %6009 }
0x25f2   :  { %v6014_v60 = vmul.f32 0.03125, %v6010_v4 }
0x25f3   :  { %v6017_v5 = vsub.f32 %v6003_v1, %v6015_v27 }
0x25f4   :  { %v6016_v62 = vsub.f32 %v6002_v2, %v6014_v60  ;;  %v6703_v60 = vld [vmem:[%s9163_s28 + $0x1] ss:$0 sm:$0xff] }
0x25f5   :  { %v6019_v6 = vmul.f32 %v6017_v5, %v6017_v5 }
0x25f6   :  { %v6018_v7 = vmul.f32 %v6016_v62, %v6016_v62 }
0x25f7   :  { %v6023_v8 = vsel %vm222_vm6, %v6019_v6, 0.0 }
0x25f8   :  { %6024 = vadd.xlane.f32.xlu0 %v6023_v8  ;;  %v6020_v57 = vsel %vm222_vm6, %v6018_v7, 0.0 }
0x25f9   :  { %6021 = vadd.xlane.f32.xlu1 %v6020_v57 }
0x2685   :  { %v6025_v12 = vpop.xlane.xlu0 %6024 }
0x2686   :  { %v6027_v13 = vmul.f32 0.03125, %v6025_v12  ;;  %v6022_v14 = vpop.xlane.xlu1 %6021 }
0x2687   :  { %v6026_v15 = vmul.f32 0.03125, %v6022_v14 }
0x2688   :  { %v6029_v17 = vadd.f32 1e-12, %v6027_v13 }
0x2689   :  { %v6028_v18 = vadd.f32 1e-12, %v6026_v15 }
0x268a   :  { %7948 = vrsqrt.f32 %v6029_v17 }
0x268b   :  { %7950 = vrsqrt.f32 %v6028_v18 }
0x2694   :  { %v7949_v19 = vpop.eup %7948 }
0x2695   :  { %v7951_v22 = vpop.eup %7950  ;;  %v6033_v23 = vmul.f32 %v7949_v19, %v6017_v5  ;;  %v6308_v19 = vld [vmem:[%s9129_s24] sm:$0xff] }
0x2696   :  { %v6032_v24 = vmul.f32 %v7951_v22, %v6016_v62 }
0x2697   :  { %v6041_v25 = vmul.f32 %v6684_v21, %v6033_v23  ;;  %v7991_v23 = vmov 0.0|0.0  }
0x2698   :  { %v6040_v26 = vmul.f32 %v6684_v21, %v6032_v24  ;;  %v6309_v21 = vld [vmem:[%s9129_s24 + $0x8] sm:$0xff]  ;;  %7841 = vmatprep.subr.bf16.mxu1 %v7991_v23  ;;  %v6310_v24 = vld [vmem:[%s9129_s24 + $0x10] sm:$0xff] }
0x2699   :  { %v6049_v29 = vadd.f32 %v6685_v31, %v6041_v25  ;;  %v7842_v22 = vpack.c.bf16 %v6309_v21, %v6308_v19 }
0x269a   :  { %v6048_v28 = vadd.f32 %v6685_v31, %v6040_v26  ;;  %v6311_v31 = vld [vmem:[%s9129_s24 + $0x18] sm:$0xff] }
0x269b   :  { %v7845_v25 = vpack.c.bf16 %v6311_v31, %v6310_v24 }
0x269c   :  { %7536 = vmatprep.mubr.msk.f32.mxu1 %vm222_vm6, %v6048_v28 }
0x269d   :  { %7537 = vmatmul.mubr.msk.f32.vlgmr.msra.gmra.mrb[70].mxu1 %vm222_vm6, %v6049_v29 }
0x269e   :  { %7566 = vmatprep.mubr.msk.f32.mxu1 %vm7989_vm7, %v7988_v44  ;;  %v7829_v44 = vpack.c.bf16 %v6697_v36, %v6696_v34  ;;  %7843 = vmatpush3.bf16.msra.mxu1 %v7842_v22  ;;  %v6708_v36 = vld [vmem:[%s9127_s22 + $0x1] ss:$0 sm:$0xff]  ;;  %s7992_s22 = smov [#allocation2]  }
0x269f   :  { %7844 = vmatprep.subr.bf16.mxu1 %v7991_v23  ;;  %s6405_s11 = sshll.u32 %s7992_s22, 4  ;;  %s6406_s11 = int_to_ptr.vmem [resolvable:$true] %s6405_s11 }
0x26a0   :  { %7830 = vmatprep.subr.bf16.mxu0 %v7829_v44  ;;  %p7967_p1 = scmp.lt.s32.totalorder %s6406_s11, %s6406_s11 }
0x26a1   :  { %7832 = vmatpush3.bf16.msra.mxu0 %v7829_v44 }
0x26a2   :  { %7834 = vmatprep.subr.bf16.mxu0 %v7833_v16  ;;  %7846 = vmatpush3.bf16.msra.mxu1 %v7845_v25 }
0x26a5   :  { %7836 = vmatpush3.bf16.msra.mxu0 %v7833_v16  ;;  %v6709_v16 = vld [vmem:[%s9128_s23 + $0x1] ss:$0 sm:$0xff]  ;;  %s7962_s23 = scalar_lea.vmem %s6406_s11, 32 }
0x26a6   :  { %7838 = vmatprep.subr.bf16.mxu0 %v7837_v41  ;;  %p7963_p0 = scmp.ne.s32.totalorder %s6406_s11, %s7962_s23  ;;  %p7968_p2 = scmp.lt.s32.totalorder %s7962_s23, %s7962_s23 }
0x26a8   :  { %p7969_p3 = por %p7968_p2, %p7967_p1 }
0x26a9   :  { %7840 = vmatpush3.bf16.msra.mxu0 %v7837_v41 }
0x26aa   :  { %p7970_p4 = pnand %p7969_p3, %p7963_p0 }
0x2770   :  { %v7538_v42 = vpop.f32.mrb[70].mxu1 }
0x2771   :  { %v6141_v43 = vadd.f32 %v7538_v42, %v6691_v20  ;;  %v6135_v45 = vpop.f32.mrb[71].mxu1 }
0x2772   :  { %v6136_v47 = vadd.f32 %v6691_v20, %v6135_v45  ;;  %v6710_v45 = vld [vmem:[%s9130_s25] ss:$0 sm:$0xff] }
0x2773   :  { %v6145_v49 = vmul.f32 %v6141_v43, %v6141_v43 }
0x2774   :  { %v6144_v50 = vmul.f32 %v6136_v47, %v6136_v47 }
0x2775   :  { %v6147_v51 = vmul.f32 %v6145_v49, %v6141_v43 }
0x2776   :  { %v6146_v52 = vmul.f32 %v6144_v50, %v6136_v47 }
0x2777   :  { %v6149_v54 = vmul.f32 0.044715, %v6147_v51 }
0x2778   :  { %v6148_v59 = vmul.f32 0.044715, %v6146_v52 }
0x2779   :  { %v6151_v61 = vadd.f32 %v6149_v54, %v6141_v43 }
0x277a   :  { %v6150_v56 = vadd.f32 %v6148_v59, %v6136_v47 }
0x277b   :  { %v6153_v63 = vmul.f32 0.7978846, %v6151_v61 }
0x277c   :  { %v6152_v58 = vmul.f32 0.7978846, %v6150_v56 }
0x277d   :  { %7952 = vtanh.f32 %v6153_v63 }
0x277e   :  { %7954 = vtanh.f32 %v6152_v58 }
0x2787   :  { %v7953_v0 = vpop.eup %7952 }
0x2788   :  { %v7955_v1 = vpop.eup %7954  ;;  %v6157_v2 = vadd.f32 1.0, %v7953_v0 }
0x2789   :  { %v6156_v3 = vadd.f32 1.0, %v7955_v1 }
0x278a   :  { %v6159_v48 = vmul.f32 0.5, %v6157_v2 }
0x278b   :  { %v6158_v35 = vmul.f32 0.5, %v6156_v3 }
0x278c   :  { %v6161_v4 = vmul.f32 %v6159_v48, %v6141_v43 }
0x278d   :  { %v6160_v27 = vmul.f32 %v6158_v35, %v6136_v47 }
0x278f   :  { %7555 = vmatprep.mubr.msk.f32.mxu0 %vm3170_vm9, %v6160_v27 }
0x2790   :  { %7556 = vmatmul.mubr.msk.f32.vlgmr.msra.gmra.mrb[52].mxu0 %vm3170_vm9, %v6161_v4 }
0x2863   :  { %v7557_v5 = vpop.f32.mrb[52].mxu0 }
0x2864   :  { %v6257_v62 = vadd.f32 %v7557_v5, %v6703_v60  ;;  %v6251_v6 = vpop.f32.mrb[53].mxu0 }
0x2865   :  { %v6252_v7 = vadd.f32 %v6703_v60, %v6251_v6 }
0x2866   :  { %v6261_v8 = vadd.f32 %v6257_v62, %v6049_v29 }
0x2867   :  { %v6260_v57 = vadd.f32 %v6252_v7, %v6048_v28 }
0x2868   :  { %v6269_v55 = vsel %vm222_vm6, %v6261_v8, 0.0 }
0x2869   :  { %6270 = vadd.xlane.f32.xlu1 %v6269_v55  ;;  %v6266_v9 = vsel %vm222_vm6, %v6260_v57, 0.0 }
0x286a   :  { %6267 = vadd.xlane.f32.xlu0 %v6266_v9 }
0x28f6   :  { %v6271_v10 = vpop.xlane.xlu1 %6270 }
0x28f7   :  { %v6273_v46 = vmul.f32 0.03125, %v6271_v10  ;;  %v6268_v11 = vpop.xlane.xlu0 %6267 }
0x28f8   :  { %v6272_v53 = vmul.f32 0.03125, %v6268_v11 }
0x28f9   :  { %v6275_v12 = vsub.f32 %v6261_v8, %v6273_v46 }
0x28fa   :  { %v6274_v13 = vsub.f32 %v6260_v57, %v6272_v53 }
0x28fb   :  { %v6277_v14 = vmul.f32 %v6275_v12, %v6275_v12 }
0x28fc   :  { %v6276_v15 = vmul.f32 %v6274_v13, %v6274_v13 }
0x28fd   :  { %v6281_v17 = vsel %vm222_vm6, %v6277_v14, 0.0 }
0x28fe   :  { %6282 = vadd.xlane.f32.xlu1 %v6281_v17  ;;  %v6278_v18 = vsel %vm222_vm6, %v6276_v15, 0.0 }
0x28ff   :  { %6279 = vadd.xlane.f32.xlu0 %v6278_v18 }
0x298b   :  { %v6283_v26 = vpop.xlane.xlu1 %6282 }
0x298c   :  { %v6285_v28 = vmul.f32 0.03125, %v6283_v26  ;;  %v6280_v29 = vpop.xlane.xlu0 %6279 }
0x298d   :  { %v6284_v30 = vmul.f32 0.03125, %v6280_v29 }
0x298e   :  { %v6287_v32 = vadd.f32 1e-12, %v6285_v28 }
0x298f   :  { %v6286_v33 = vadd.f32 1e-12, %v6284_v30 }
0x2990   :  { %7956 = vrsqrt.f32 %v6287_v32 }
0x2991   :  { %7958 = vrsqrt.f32 %v6286_v33 }
0x299a   :  { %v7957_v34 = vpop.eup %7956 }
0x299b   :  { %v7959_v44 = vpop.eup %7958  ;;  %v6291_v37 = vmul.f32 %v7957_v34, %v6275_v12 }
0x299c   :  { %v6290_v38 = vmul.f32 %v7959_v44, %v6274_v13 }
0x299d   :  { %v6299_v39 = vmul.f32 %v6708_v36, %v6291_v37 }
0x299e   :  { %v6298_v40 = vmul.f32 %v6708_v36, %v6290_v38 }
0x299f   :  { %v6307_v41 = vadd.f32 %v6709_v16, %v6299_v39 }
0x29a0   :  { %v6306_v20 = vadd.f32 %v6709_v16, %v6298_v40 }
0x29a1   :  { %v6321_v42 = vrot.slane %v6307_v41, 7 }
0x29a3   :  { %v6323_v43 = vsel %vm6322_vm10, %v6321_v42, %v6306_v20 }
0x29a4   :  { %7567 = vmatmul.mubr.msk.f32.vlgmr.msra.gmra.mrb[72].mxu1 %vm222_vm6, %v6323_v43 }
0x2a77   :  { %v6392_v47 = vpop.f32.mrb[72].mxu1 }
0x2a78   :  { %v6393_v49 = vadd.f32 %v6710_v45, %v6392_v47  ;;  %v7568_v50 = vpop.f32.mrb[73].mxu1 }
0x2a7a   :  { %7960 = vtanh.f32 %v6393_v49 }
0x2a84   :  { %v7961_v51 = vpop.eup %7960 }
0x2a85   :  { %6398 = vst.msk [vmem:[#allocation2] sm:$0x3] %vm6397_vm11, %v7961_v51 }
0x2a86   :  { %7973 = shalt.err (!%p7970_p4)
}
0x2a87   :  { %s7974_s25 = scalar_lea.hbm %s9131_s26, 32 }
0x2a88   :  { %p7975_p5 = scmp.ne.s32.totalorder %s9131_s26, %s7974_s25  ;;  %p7978_p6 = scmp.lt.u32.totalorder %s7974_s25, %s9131_s26 }
0x2a8a   :  { %p7980_p7 = pnand %p7978_p6, %p7975_p5 }
0x2a8c   :  { %7983 = shalt.err (!%p7980_p7)
}
0x2a8d   :  { %6408 = dma.vmem_to_hbm [thread:$0]  %s6406_s11, 32, %s9131_s26, [#allocation3]  }
0x2a8e   :  { %7984 = dma.done.wait [#allocation3], 32  }
0x2a8f   :  { %7985 = vsyncadd [#allocation3], 4294967264 }
0x2a90   :  { %6412 = vsyncpa [#allocation3], 1 }

</bundles_post_ra>
